<compile_context>
chip_gen: v7x
topology: tpu7x:2x2x1
jax: 0.10.0
libtpu: 0.0.40
codegen_flags: <defaults>
</compile_context>

<pallas_src>
import math
import functools
import numpy as np

import jax
import jax.numpy as jnp
from jax.experimental import pallas as pl
from jax.experimental.pallas import tpu as pltpu

F32 = jnp.float32
BF16 = jnp.bfloat16
ACT_DTYPE = BF16          # dtype of inter-kernel activations (residual stream / token stages)
LN_EPS = 1e-5

_VMEM_LIMIT = None


def _vmem_limit():
    """Generation-aware scoped-VMEM budget: ~3/4 of capacity, capped at 96 MiB."""
    global _VMEM_LIMIT
    if _VMEM_LIMIT is None:
        cap = 64 * 1024 * 1024            # conservative fallback (v7x capacity)
        try:
            cap = int(pltpu.get_tpu_info().vmem_capacity_bytes)
        except Exception:
            pass
        _VMEM_LIMIT = int(min(cap * 3 // 4, 96 * 1024 * 1024))
    return _VMEM_LIMIT


def _cparams(n_axes=1):
    return pltpu.CompilerParams(
        dimension_semantics=("parallel",) * n_axes,
        vmem_limit_bytes=_vmem_limit())


# ----------------------------------------------------------------------------------
# in-kernel helpers
# ----------------------------------------------------------------------------------
def _layernorm(x, g, b, eps=LN_EPS):
    mu = jnp.mean(x, axis=-1, keepdims=True)
    var = jnp.mean(jnp.square(x - mu), axis=-1, keepdims=True)
    return (x - mu) * jax.lax.rsqrt(var + eps) * g + b


def _gelu_tanh(x):
    # TODO(synk): PyTorch nn.GELU default is the exact erf form; tanh approximation here.
    return 0.5 * x * (1.0 + jnp.tanh(0.7978845608028654 * (x + 0.044715 * x * x * x)))


# ----------------------------------------------------------------------------------
# Pallas kernels
# ----------------------------------------------------------------------------------
def _linear_kernel(x_ref, w_ref, b_ref, o_ref):
    y = jnp.dot(x_ref[...].astype(BF16), w_ref[...], preferred_element_type=F32)
    o_ref[...] = (y + b_ref[...]).astype(o_ref.dtype)


def _ln_linear_kernel(x_ref, g_ref, b_ref, w_ref, bias_ref, o_ref):
    xn = _layernorm(x_ref[...].astype(F32), g_ref[...], b_ref[...])
    y = jnp.dot(xn.astype(BF16), w_ref[...], preferred_element_type=F32) + bias_ref[...]
    o_ref[...] = y.astype(o_ref.dtype)


def _block_kernel(x_ref, g1_ref, b1_ref, qkvw_ref, projw_ref, projb_ref,
                  g2_ref, b2_ref, w1_ref, fb1_ref, w2_ref, fb2_ref, o_ref,
                  *, num_heads):
    """Fused transformer Block: LN1+qkv+MHA+proj+residual, then LN2+MLP+residual."""
    x = x_ref[0].astype(F32)                                        # (N, C)
    C = x.shape[-1]
    hd = C // num_heads

    # ---- attention (1/sqrt(hd) scale folded into the Q columns of qkv_w at init) ----
    xn = _layernorm(x, g1_ref[...], b1_ref[...])
    qkv = jnp.dot(xn.astype(BF16), qkvw_ref[...],
                  preferred_element_type=F32)                       # (N, 3C), qkv_bias=False
    qkv = qkv.astype(BF16)                                          # single cast; slice per head
    heads = []
    for h in range(num_heads):         # static unroll (small head count; fori_loop for >=12 heads)
        q = qkv[:, h * hd:(h + 1) * hd]
        k = qkv[:, C + h * hd:C + (h + 1) * hd]
        v = qkv[:, 2 * C + h * hd:2 * C + (h + 1) * hd]
        s = jax.lax.dot_general(q, k, (((1,), (1,)), ((), ())),
                                preferred_element_type=F32)         # (N, N)
        s = s - jnp.max(s, axis=-1, keepdims=True)
        p = jnp.exp(s)
        p = p * pl.reciprocal(jnp.sum(p, axis=-1, keepdims=True), approx=True)
        heads.append(jnp.dot(p.astype(BF16), v, preferred_element_type=F32))   # (N, hd)
    attn = jnp.concatenate(heads, axis=-1)                          # (N, C)
    x = x + jnp.dot(attn.astype(BF16), projw_ref[...],
                    preferred_element_type=F32) + projb_ref[...]    # single full-depth proj

    # ---- MLP ----
    xn2 = _layernorm(x, g2_ref[...], b2_ref[...])
    h = jnp.dot(xn2.astype(BF16), w1_ref[...], preferred_element_type=F32) + fb1_ref[...]
    h = _gelu_tanh(h)
    h = jnp.dot(h.astype(BF16), w2_ref[...], preferred_element_type=F32) + fb2_ref[...]
    o_ref[0] = (x + h).astype(o_ref.dtype)


def _performer_block_kernel(x_ref, g1_ref, b1_ref, kqvw_ref, kqvb_ref, w_ref,
                            projw_ref, projb_ref, g2_ref, b2_ref,
                            m1w_ref, m1b_ref, m2w_ref, m2b_ref, o_ref,
                            *, emb, m, eps):
    """Fused Token_performer: single_attn(norm1(x)) then x + mlp(norm2(x))."""
    x = x_ref[0].astype(F32)                                        # (T, dim)
    xn = _layernorm(x, g1_ref[...], b1_ref[...])
    kqv = jnp.dot(xn.astype(BF16), kqvw_ref[...],
                  preferred_element_type=F32) + kqvb_ref[...]       # (T, 3*emb)
    k = kqv[:, :emb]
    q = kqv[:, emb:2 * emb]
    v = kqv[:, 2 * emb:3 * emb]

    # prm_exp(z) = exp(z @ w.T - ||z||^2 / 2) / sqrt(m); two matmuls (no concat/split copies).
    inv_sqrt_m = 1.0 / math.sqrt(m)
    kw = jax.lax.dot_general(k.astype(BF16), w_ref[...], (((1,), (1,)), ((), ())),
                             preferred_element_type=F32)            # (T, m)
    qw = jax.lax.dot_general(q.astype(BF16), w_ref[...], (((1,), (1,)), ((), ())),
                             preferred_element_type=F32)            # (T, m)
    kp = jnp.exp(kw - 0.5 * jnp.sum(k * k, axis=-1, keepdims=True)) * inv_sqrt_m
    qp = jnp.exp(qw - 0.5 * jnp.sum(q * q, axis=-1, keepdims=True)) * inv_sqrt_m

    kp_sum = jnp.sum(kp, axis=0, keepdims=True)                     # (1, m)
    D = jnp.sum(qp * kp_sum, axis=-1, keepdims=True)                # (T, 1)
    kptv = jax.lax.dot_general(v.astype(BF16), kp.astype(BF16), (((0,), (0,)), ((), ())),
                               preferred_element_type=F32)          # (emb, m)
    y = jax.lax.dot_general(qp.astype(BF16), kptv.astype(BF16), (((1,), (1,)), ((), ())),
                            preferred_element_type=F32)             # (T, emb)
    y = y * pl.reciprocal(D + eps, approx=True)
    att = v + jnp.dot(y.astype(BF16), projw_ref[...],
                      preferred_element_type=F32) + projb_ref[...]  # residual on v

    # ---- MLP with residual ----
    xn2 = _layernorm(att, g2_ref[...], b2_ref[...])
    h = jnp.dot(xn2.astype(BF16), m1w_ref[...], preferred_element_type=F32) + m1b_ref[...]
    h = _gelu_tanh(h)
    h = jnp.dot(h.astype(BF16), m2w_ref[...], preferred_element_type=F32) + m2b_ref[...]
    o_ref[0] = (att + h).astype(o_ref.dtype)


# ----------------------------------------------------------------------------------
# wrappers (tiled pallas_calls)
# ----------------------------------------------------------------------------------
def _wspec(shape):
    return pl.BlockSpec(shape, lambda i: (0,) * len(shape))


def linear(x, w, b, out_dtype=ACT_DTYPE, tile_m=512):
    """x: (..., K) @ w(K, N) + b; tiled over rows, weights VMEM-resident."""
    *lead, K = x.shape
    N = w.shape[1]
    M = int(np.prod(lead)) if lead else 1
    x2 = x.reshape(M, K)
    tm = M if M <= tile_m else tile_m
    out = pl.pallas_call(
        _linear_kernel,
        grid=(pl.cdiv(M, tm),),
        in_specs=[pl.BlockSpec((tm, K), lambda i: (i, 0)),
                  _wspec((K, N)),
                  _wspec((1, N))],
        out_specs=pl.BlockSpec((tm, N), lambda i: (i, 0)),
        out_shape=jax.ShapeDtypeStruct((M, N), out_dtype),
        compiler_params=_cparams(1),
    )(x2, w, b.reshape(1, N))
    return out.reshape(*lead, N)


def ln_linear(x, g, b, w, bias, out_dtype=F32, tile_m=512):
    *lead, D = x.shape
    N = w.shape[1]
    M = int(np.prod(lead)) if lead else 1
    x2 = x.reshape(M, D)
    tm = M if M <= tile_m else tile_m
    out = pl.pallas_call(
        _ln_linear_kernel,
        grid=(pl.cdiv(M, tm),),
        in_specs=[pl.BlockSpec((tm, D), lambda i: (i, 0)),
                  _wspec((1, D)), _wspec((1, D)),
                  _wspec((D, N)), _wspec((1, N))],
        out_specs=pl.BlockSpec((tm, N), lambda i: (i, 0)),
        out_shape=jax.ShapeDtypeStruct((M, N), out_dtype),
        compiler_params=_cparams(1),
    )(x2, g.reshape(1, D), b.reshape(1, D), w, bias.reshape(1, N))
    return out.reshape(*lead, N)


def block_forward(x, p, num_heads):
    """One transformer Block, fully fused per batch element."""
    B, N, C = x.shape
    Dh = p["fc1_w"].shape[1]
    tok = pl.BlockSpec((1, N, C), lambda i: (i, 0, 0))
    return pl.pallas_call(
        functools.partial(_block_kernel, num_heads=num_heads),
        grid=(B,),
        in_specs=[tok,
                  _wspec((1, C)), _wspec((1, C)),
                  _wspec((C, 3 * C)),
                  _wspec((C, C)), _wspec((1, C)),
                  _wspec((1, C)), _wspec((1, C)),
                  _wspec((C, Dh)), _wspec((1, Dh)),
                  _wspec((Dh, C)), _wspec((1, C))],
        out_specs=tok,
        out_shape=jax.ShapeDtypeStruct((B, N, C), ACT_DTYPE),
        compiler_params=_cparams(1),
    )(x, p["norm1_w"].reshape(1, C), p["norm1_b"].reshape(1, C),
      p["qkv_w"], p["proj_w"], p["proj_b"].reshape(1, C),
      p["norm2_w"].reshape(1, C), p["norm2_b"].reshape(1, C),
      p["fc1_w"], p["fc1_b"].reshape(1, Dh),
      p["fc2_w"], p["fc2_b"].reshape(1, C))


def performer_block(x, p):
    """One Token_performer (attention + MLP), fully fused per batch element."""
    B, T, dim = x.shape
    emb, m = p["emb"], p["m"]
    return pl.pallas_call(
        functools.partial(_performer_block_kernel, emb=emb, m=m, eps=1e-8),
        grid=(B,),
        in_specs=[pl.BlockSpec((1, T, dim), lambda i: (i, 0, 0)),
                  _wspec((1, dim)), _wspec((1, dim)),
                  _wspec((dim, 3 * emb)), _wspec((1, 3 * emb)),
                  _wspec((m, emb)),
                  _wspec((emb, emb)), _wspec((1, emb)),
                  _wspec((1, emb)), _wspec((1, emb)),
                  _wspec((emb, emb)), _wspec((1, emb)),
                  _wspec((emb, emb)), _wspec((1, emb))],
        out_specs=pl.BlockSpec((1, T, emb), lambda i: (i, 0, 0)),
        out_shape=jax.ShapeDtypeStruct((B, T, emb), ACT_DTYPE),
        compiler_params=_cparams(1),
    )(x, p["norm1_w"].reshape(1, dim), p["norm1_b"].reshape(1, dim),
      p["kqv_w"], p["kqv_b"].reshape(1, 3 * emb), p["w"],
      p["proj_w"], p["proj_b"].reshape(1, emb),
      p["norm2_w"].reshape(1, emb), p["norm2_b"].reshape(1, emb),
      p["mlp1_w"], p["mlp1_b"].reshape(1, emb),
      p["mlp2_w"], p["mlp2_b"].reshape(1, emb))


# ----------------------------------------------------------------------------------
# Glue: nn.Unfold equivalent in channel-last token layout (XLA, between Pallas calls)
# ----------------------------------------------------------------------------------
# TODO(synk): nn.Unfold patch extraction has no single Pallas primitive; it stays as XLA glue
# (emitted directly in channel-last token layout so no extra HBM transposes are needed).
def _unfold_nhwc(img, k, s, p):
    """NHWC image -> (B, L, C*k*k) tokens, matching PyTorch nn.Unfold channel ordering
    (channel slowest, kernel position fastest) followed by .transpose(1, 2)."""
    B, H, W, C = img.shape
    img = jnp.pad(img, ((0, 0), (p, p), (p, p), (0, 0)))
    Ho = (H + 2 * p - k) // s + 1
    Wo = (W + 2 * p - k) // s + 1
    patches = []
    for i in range(k):
        for j in range(k):
            patches.append(img[:, i:i + (Ho - 1) * s + 1:s, j:j + (Wo - 1) * s + 1:s, :])
    cols = jnp.stack(patches, axis=-1)                    # (B, Ho, Wo, C, k*k)
    return cols.reshape(B, Ho * Wo, C * k * k)


def _tokens_to_nhwc(tok):
    B, T, C = tok.shape
    side = int(round(math.sqrt(T)))
    return tok.reshape(B, side, side, C)


# ----------------------------------------------------------------------------------
# Parameter init (deterministic; mirrors _init_weights; matmul weights stored bf16)
# ----------------------------------------------------------------------------------
def _tn(key, shape):
    return (jax.random.truncated_normal(key, -2.0, 2.0, shape, F32) * 0.02).astype(F32)


def init_token_performer(key, dim, in_dim, kernel_ratio=0.5):
    emb = in_dim
    m = int(emb * kernel_ratio)
    keys = jax.random.split(key, 5)
    g = jax.random.normal(keys[0], (emb, m), F32)
    qmat, _ = jnp.linalg.qr(g)                            # orthonormal columns (emb, m)
    w = (qmat.T * math.sqrt(m)).astype(BF16)              # (m, emb), orthonormal rows * sqrt(m)
    return dict(
        emb=emb, m=m,
        norm1_w=jnp.ones((dim,), F32), norm1_b=jnp.zeros((dim,), F32),
        kqv_w=_tn(keys[1], (dim, 3 * emb)).astype(BF16), kqv_b=jnp.zeros((3 * emb,), F32),
        proj_w=_tn(keys[2], (emb, emb)).astype(BF16), proj_b=jnp.zeros((emb,), F32),
        norm2_w=jnp.ones((emb,), F32), norm2_b=jnp.zeros((emb,), F32),
        mlp1_w=_tn(keys[3], (emb, emb)).astype(BF16), mlp1_b=jnp.zeros((emb,), F32),
        mlp2_w=_tn(keys[4], (emb, emb)).astype(BF16), mlp2_b=jnp.zeros((emb,), F32),
        w=w,
    )


def init_block(key, dim, num_heads, mlp_ratio):
    hidden = int(dim * mlp_ratio)
    scale = (dim // num_heads) ** -0.5
    keys = jax.random.split(key, 4)
    qkv_w = _tn(keys[0], (dim, 3 * dim))
    qkv_w = qkv_w.at[:, :dim].multiply(scale)             # fold 1/sqrt(hd) into the Q columns
    return dict(
        norm1_w=jnp.ones((dim,), F32), norm1_b=jnp.zeros((dim,), F32),
        qkv_w=qkv_w.astype(BF16),                         # qkv_bias=False
        proj_w=_tn(keys[1], (dim, dim)).astype(BF16),     # flat (C, C) for one full-depth matmul
        proj_b=jnp.zeros((dim,), F32),
        norm2_w=jnp.ones((dim,), F32), norm2_b=jnp.zeros((dim,), F32),
        fc1_w=_tn(keys[2], (dim, hidden)).astype(BF16), fc1_b=jnp.zeros((hidden,), F32),
        fc2_w=_tn(keys[3], (hidden, dim)).astype(BF16), fc2_b=jnp.zeros((dim,), F32),
    )


def get_sinusoid_encoding(n_position, d_hid):
    table = np.array([[pos / np.power(10000, 2 * (j // 2) / d_hid) for j in range(d_hid)]
                      for pos in range(n_position)], dtype=np.float64)
    table[:, 0::2] = np.sin(table[:, 0::2])
    table[:, 1::2] = np.cos(table[:, 1::2])
    return jnp.asarray(table[None], F32)                  # (1, n_position, d_hid)


def _unfold_shape(size, kernel, stride, padding):
    return math.floor((size - kernel + 2 * padding) / stride + 1)


def init_t2t_vit(key, *, img_size, in_chans, num_classes, embed_dim, depth, num_heads,
                 mlp_ratio, token_dim, kernel_size, overlap_ratio):
    sp0_stride = round(kernel_size * (1 - overlap_ratio))    # equals 4 for the performer unfold
    n = _unfold_shape(img_size, kernel_size, sp0_stride, 2)
    n = _unfold_shape(n, 3, 2, 1)
    n = _unfold_shape(n, 3, 2, 1)
    num_patches = n ** 2

    keys = jax.random.split(key, depth + 6)
    params = dict(
        num_heads=num_heads,
        t2t=dict(
            att1=init_token_performer(keys[0], dim=in_chans * 7 * 7, in_dim=token_dim),
            att2=init_token_performer(keys[1], dim=token_dim * 3 * 3, in_dim=token_dim),
            proj_w=_tn(keys[2], (token_dim * 3 * 3, embed_dim)).astype(BF16),
            proj_b=jnp.zeros((embed_dim,), F32),
        ),
        cls_token=_tn(keys[3], (1, 1, embed_dim)),
        pos_embed=get_sinusoid_encoding(num_patches + 1, embed_dim),
        blocks=[init_block(keys[4 + i], embed_dim, num_heads, mlp_ratio) for i in range(depth)],
        norm_w=jnp.ones((embed_dim,), F32), norm_b=jnp.zeros((embed_dim,), F32),
        head_w=_tn(keys[4 + depth], (embed_dim, num_classes)).astype(BF16),
        head_b=jnp.zeros((num_classes,), F32),
    )
    return params, num_patches


# ----------------------------------------------------------------------------------
# Forward passes (eval mode: Dropout / DropPath are identity)
# ----------------------------------------------------------------------------------
def t2t_module_forward(p, x_nchw):
    x = jnp.transpose(x_nchw, (0, 2, 3, 1))               # NCHW -> NHWC once
    tok = _unfold_nhwc(x, 7, 4, 2)                        # soft_split0 -> (B, L0, C*49)
    tok = performer_block(tok, p["att1"])
    tok = _unfold_nhwc(_tokens_to_nhwc(tok), 3, 2, 1)     # soft_split1
    tok = performer_block(tok, p["att2"])
    tok = _unfold_nhwc(_tokens_to_nhwc(tok), 3, 2, 1)     # soft_split2
    return linear(tok, p["proj_w"], p["proj_b"])          # project -> (B, L, embed_dim)


def t2t_vit_forward(params, x):
    B = x.shape[0]
    x = t2t_module_forward(params["t2t"], x)              # (B, num_patches, embed_dim) bf16
    cls = jnp.broadcast_to(params["cls_token"], (B, 1, x.shape[-1])).astype(x.dtype)
    x = jnp.concatenate([cls, x], axis=1)
    x = (x.astype(F32) + params["pos_embed"]).astype(ACT_DTYPE)
    for bp in params["blocks"]:
        x = block_forward(x, bp, params["num_heads"])
    # Final LayerNorm + classifier head applied to the cls token only (LN is per-token,
    # so this matches norm(x)[:, 0] -> head).
    return ln_linear(x[:, 0], params["norm_w"], params["norm_b"],
                     params["head_w"], params["head_b"], out_dtype=F32)


# ----------------------------------------------------------------------------------
if __name__ == "__main__":
    # Small config: img 32x32, 3 chans, token_dim=16, embed_dim=32, depth=2, heads=4,
    # num_classes=10.  overlap_ratio=3/7 so round(7*(1-r))=4 matches the performer
    # unfold stride of 4.
    B, C, H, W = 2, 3, 32, 32
    key = jax.random.PRNGKey(0)
    kparams, kx = jax.random.split(key)
    params, num_patches = init_t2t_vit(
        kparams, img_size=H, in_chans=C, num_classes=10, embed_dim=32, depth=2,
        num_heads=4, mlp_ratio=4.0, token_dim=16, kernel_size=7, overlap_ratio=3.0 / 7.0)

    x = jax.random.normal(kx, (B, C, H, W), F32)
    fwd = jax.jit(lambda img: t2t_vit_forward(params, img))
    out = jax.block_until_ready(fwd(x))
    assert out.shape == (B, 10), out.shape
    assert bool(jnp.all(jnp.isfinite(out)))
    print("KERNEL_OK")
</pallas_src>

<mosaic_0001>
module attributes {stable_mosaic.version = 11 : i64} {
  func.func @_performer_block_kernel(%arg0: i32, %arg1: memref<1x64x147xf32, #tpu.memory_space<vmem>>, %arg2: memref<1x147xf32, #tpu.memory_space<vmem>>, %arg3: memref<1x147xf32, #tpu.memory_space<vmem>>, %arg4: memref<147x48xbf16, #tpu.memory_space<vmem>>, %arg5: memref<1x48xf32, #tpu.memory_space<vmem>>, %arg6: memref<8x16xbf16, #tpu.memory_space<vmem>>, %arg7: memref<16x16xbf16, #tpu.memory_space<vmem>>, %arg8: memref<1x16xf32, #tpu.memory_space<vmem>>, %arg9: memref<1x16xf32, #tpu.memory_space<vmem>>, %arg10: memref<1x16xf32, #tpu.memory_space<vmem>>, %arg11: memref<16x16xbf16, #tpu.memory_space<vmem>>, %arg12: memref<1x16xf32, #tpu.memory_space<vmem>>, %arg13: memref<16x16xbf16, #tpu.memory_space<vmem>>, %arg14: memref<1x16xf32, #tpu.memory_space<vmem>>, %arg15: memref<1x64x16xbf16, #tpu.memory_space<vmem>>) attributes {dimension_semantics = [#tpu.dimension_semantics<parallel>], iteration_bounds = array<i64: 2>, scalar_prefetch = 0 : i64, scratch_operands = 0 : i64, tpu.core_type = #tpu.core_type<tc>, window_params = [{transform_indices = @transform_0, window_bounds = array<i64: 1, 64, 147>}, {pipeline_mode = #tpu.pipeline_mode<synchronous>, transform_indices = @transform_1, window_bounds = array<i64: 1, 147>}, {pipeline_mode = #tpu.pipeline_mode<synchronous>, transform_indices = @transform_2, window_bounds = array<i64: 1, 147>}, {pipeline_mode = #tpu.pipeline_mode<synchronous>, transform_indices = @transform_3, window_bounds = array<i64: 147, 48>}, {pipeline_mode = #tpu.pipeline_mode<synchronous>, transform_indices = @transform_4, window_bounds = array<i64: 1, 48>}, {pipeline_mode = #tpu.pipeline_mode<synchronous>, transform_indices = @transform_5, window_bounds = array<i64: 8, 16>}, {pipeline_mode = #tpu.pipeline_mode<synchronous>, transform_indices = @transform_6, window_bounds = array<i64: 16, 16>}, {pipeline_mode = #tpu.pipeline_mode<synchronous>, transform_indices = @transform_7, window_bounds = array<i64: 1, 16>}, {pipeline_mode = #tpu.pipeline_mode<synchronous>, transform_indices = @transform_8, window_bounds = array<i64: 1, 16>}, {pipeline_mode = #tpu.pipeline_mode<synchronous>, transform_indices = @transform_9, window_bounds = array<i64: 1, 16>}, {pipeline_mode = #tpu.pipeline_mode<synchronous>, transform_indices = @transform_10, window_bounds = array<i64: 16, 16>}, {pipeline_mode = #tpu.pipeline_mode<synchronous>, transform_indices = @transform_11, window_bounds = array<i64: 1, 16>}, {pipeline_mode = #tpu.pipeline_mode<synchronous>, transform_indices = @transform_12, window_bounds = array<i64: 16, 16>}, {pipeline_mode = #tpu.pipeline_mode<synchronous>, transform_indices = @transform_13, window_bounds = array<i64: 1, 16>}, {transform_indices = @transform_14, window_bounds = array<i64: 1, 64, 16>}]} {
    %c0 = arith.constant 0 : index
    %c0_0 = arith.constant 0 : index
    %c0_1 = arith.constant 0 : index
    %0 = vector.load %arg1[%c0, %c0_0, %c0_1] : memref<1x64x147xf32, #tpu.memory_space<vmem>>, vector<1x64x147xf32>
    %1 = vector.shape_cast %0 : vector<1x64x147xf32> to vector<64x147xf32>
    %c0_2 = arith.constant 0 : index
    %c0_3 = arith.constant 0 : index
    %2 = vector.load %arg2[%c0_2, %c0_3] : memref<1x147xf32, #tpu.memory_space<vmem>>, vector<1x147xf32>
    %c0_4 = arith.constant 0 : index
    %c0_5 = arith.constant 0 : index
    %3 = vector.load %arg3[%c0_4, %c0_5] : memref<1x147xf32, #tpu.memory_space<vmem>>, vector<1x147xf32>
    %cst = arith.constant dense<0.000000e+00> : vector<64xf32>
    %4 = vector.multi_reduction <add>, %1, %cst [1] : vector<64x147xf32> to vector<64xf32>
    %5 = vector.shape_cast %4 : vector<64xf32> to vector<64x1xf32>
    %cst_6 = arith.constant 1.470000e+02 : f32
    %6 = vector.broadcast %cst_6 : f32 to vector<64x1xf32>
    %7 = arith.divf %5, %6 : vector<64x1xf32>
    %8 = vector.broadcast %7 : vector<64x1xf32> to vector<64x147xf32>
    %9 = arith.subf %1, %8 : vector<64x147xf32>
    %10 = arith.mulf %9, %9 : vector<64x147xf32>
    %cst_7 = arith.constant dense<0.000000e+00> : vector<64xf32>
    %11 = vector.multi_reduction <add>, %10, %cst_7 [1] : vector<64x147xf32> to vector<64xf32>
    %12 = vector.shape_cast %11 : vector<64xf32> to vector<64x1xf32>
    %cst_8 = arith.constant 1.470000e+02 : f32
    %13 = vector.broadcast %cst_8 : f32 to vector<64x1xf32>
    %14 = arith.divf %12, %13 : vector<64x1xf32>
    %15 = vector.broadcast %7 : vector<64x1xf32> to vector<64x147xf32>
    %16 = arith.subf %1, %15 : vector<64x147xf32>
    %cst_9 = arith.constant 9.99999974E-6 : f32
    %17 = vector.broadcast %cst_9 : f32 to vector<64x1xf32>
    %18 = arith.addf %14, %17 : vector<64x1xf32>
    %19 = math.rsqrt %18 : vector<64x1xf32>
    %20 = vector.broadcast %19 : vector<64x1xf32> to vector<64x147xf32>
    %21 = arith.mulf %16, %20 : vector<64x147xf32>
    %22 = vector.broadcast %2 : vector<1x147xf32> to vector<64x147xf32>
    %23 = arith.mulf %21, %22 : vector<64x147xf32>
    %24 = vector.broadcast %3 : vector<1x147xf32> to vector<64x147xf32>
    %25 = arith.addf %23, %24 : vector<64x147xf32>
    %26 = arith.truncf %25 : vector<64x147xf32> to vector<64x147xbf16>
    %c0_10 = arith.constant 0 : index
    %c0_11 = arith.constant 0 : index
    %27 = vector.load %arg4[%c0_10, %c0_11] : memref<147x48xbf16, #tpu.memory_space<vmem>>, vector<147x48xbf16>
    %cst_12 = arith.constant dense<0.000000e+00> : vector<64x48xf32>
    %28 = tpu.matmul %26, %27, %cst_12 {dimension_numbers = #tpu.dot_dimension_numbers<[1], [0], [0], [1], [0, 0, 1, 1], [], []>} : vector<64x147xbf16>, vector<147x48xbf16>, vector<64x48xf32> -> vector<64x48xf32>
    %c0_13 = arith.constant 0 : index
    %c0_14 = arith.constant 0 : index
    %29 = vector.load %arg5[%c0_13, %c0_14] : memref<1x48xf32, #tpu.memory_space<vmem>>, vector<1x48xf32>
    %30 = vector.broadcast %29 : vector<1x48xf32> to vector<64x48xf32>
    %31 = arith.addf %28, %30 : vector<64x48xf32>
    %32 = vector.extract_strided_slice %31 {offsets = [0, 0], sizes = [64, 16], strides = [1, 1]} : vector<64x48xf32> to vector<64x16xf32>
    %33 = vector.extract_strided_slice %31 {offsets = [0, 16], sizes = [64, 16], strides = [1, 1]} : vector<64x48xf32> to vector<64x16xf32>
    %34 = vector.extract_strided_slice %31 {offsets = [0, 32], sizes = [64, 16], strides = [1, 1]} : vector<64x48xf32> to vector<64x16xf32>
    %35 = arith.truncf %32 : vector<64x16xf32> to vector<64x16xbf16>
    %c0_15 = arith.constant 0 : index
    %c0_16 = arith.constant 0 : index
    %36 = vector.load %arg6[%c0_15, %c0_16] : memref<8x16xbf16, #tpu.memory_space<vmem>>, vector<8x16xbf16>
    %cst_17 = arith.constant dense<0.000000e+00> : vector<64x8xf32>
    %37 = tpu.matmul %35, %36, %cst_17 {dimension_numbers = #tpu.dot_dimension_numbers<[1], [1], [0], [0], [0, 0, 1, 0], [], []>} : vector<64x16xbf16>, vector<8x16xbf16>, vector<64x8xf32> -> vector<64x8xf32>
    %38 = arith.truncf %33 : vector<64x16xf32> to vector<64x16xbf16>
    %c0_18 = arith.constant 0 : index
    %c0_19 = arith.constant 0 : index
    %39 = vector.load %arg6[%c0_18, %c0_19] : memref<8x16xbf16, #tpu.memory_space<vmem>>, vector<8x16xbf16>
    %cst_20 = arith.constant dense<0.000000e+00> : vector<64x8xf32>
    %40 = tpu.matmul %38, %39, %cst_20 {dimension_numbers = #tpu.dot_dimension_numbers<[1], [1], [0], [0], [0, 0, 1, 0], [], []>} : vector<64x16xbf16>, vector<8x16xbf16>, vector<64x8xf32> -> vector<64x8xf32>
    %41 = arith.mulf %32, %32 : vector<64x16xf32>
    %cst_21 = arith.constant dense<0.000000e+00> : vector<64xf32>
    %42 = vector.multi_reduction <add>, %41, %cst_21 [1] : vector<64x16xf32> to vector<64xf32>
    %43 = vector.shape_cast %42 : vector<64xf32> to vector<64x1xf32>
    %cst_22 = arith.constant 5.000000e-01 : f32
    %44 = vector.broadcast %cst_22 : f32 to vector<64x1xf32>
    %45 = arith.mulf %44, %43 : vector<64x1xf32>
    %46 = vector.broadcast %45 : vector<64x1xf32> to vector<64x8xf32>
    %47 = arith.subf %37, %46 : vector<64x8xf32>
    %48 = math.exp %47 : vector<64x8xf32>
    %cst_23 = arith.constant 0.353553385 : f32
    %49 = vector.broadcast %cst_23 : f32 to vector<64x8xf32>
    %50 = arith.mulf %48, %49 : vector<64x8xf32>
    %51 = arith.mulf %33, %33 : vector<64x16xf32>
    %cst_24 = arith.constant dense<0.000000e+00> : vector<64xf32>
    %52 = vector.multi_reduction <add>, %51, %cst_24 [1] : vector<64x16xf32> to vector<64xf32>
    %53 = vector.shape_cast %52 : vector<64xf32> to vector<64x1xf32>
    %cst_25 = arith.constant 5.000000e-01 : f32
    %54 = vector.broadcast %cst_25 : f32 to vector<64x1xf32>
    %55 = arith.mulf %54, %53 : vector<64x1xf32>
    %56 = vector.broadcast %55 : vector<64x1xf32> to vector<64x8xf32>
    %57 = arith.subf %40, %56 : vector<64x8xf32>
    %58 = math.exp %57 : vector<64x8xf32>
    %cst_26 = arith.constant 0.353553385 : f32
    %59 = vector.broadcast %cst_26 : f32 to vector<64x8xf32>
    %60 = arith.mulf %58, %59 : vector<64x8xf32>
    %cst_27 = arith.constant dense<0.000000e+00> : vector<8xf32>
    %61 = vector.multi_reduction <add>, %50, %cst_27 [0] : vector<64x8xf32> to vector<8xf32>
    %62 = vector.shape_cast %61 : vector<8xf32> to vector<1x8xf32>
    %63 = vector.broadcast %62 : vector<1x8xf32> to vector<64x8xf32>
    %64 = arith.mulf %60, %63 : vector<64x8xf32>
    %cst_28 = arith.constant dense<0.000000e+00> : vector<64xf32>
    %65 = vector.multi_reduction <add>, %64, %cst_28 [1] : vector<64x8xf32> to vector<64xf32>
    %66 = vector.shape_cast %65 : vector<64xf32> to vector<64x1xf32>
    %67 = arith.truncf %34 : vector<64x16xf32> to vector<64x16xbf16>
    %68 = arith.truncf %50 : vector<64x8xf32> to vector<64x8xbf16>
    %cst_29 = arith.constant dense<0.000000e+00> : vector<16x8xf32>
    %69 = tpu.matmul %67, %68, %cst_29 {dimension_numbers = #tpu.dot_dimension_numbers<[0], [0], [1], [1], [0, 1, 1, 1], [], []>} : vector<64x16xbf16>, vector<64x8xbf16>, vector<16x8xf32> -> vector<16x8xf32>
    %70 = arith.truncf %60 : vector<64x8xf32> to vector<64x8xbf16>
    %71 = arith.truncf %69 : vector<16x8xf32> to vector<16x8xbf16>
    %cst_30 = arith.constant dense<0.000000e+00> : vector<64x16xf32>
    %72 = tpu.matmul %70, %71, %cst_30 {dimension_numbers = #tpu.dot_dimension_numbers<[1], [1], [0], [0], [0, 0, 1, 0], [], []>} : vector<64x8xbf16>, vector<16x8xbf16>, vector<64x16xf32> -> vector<64x16xf32>
    %cst_31 = arith.constant 9.99999993E-9 : f32
    %73 = vector.broadcast %cst_31 : f32 to vector<64x1xf32>
    %74 = arith.addf %66, %73 : vector<64x1xf32>
    %75 = tpu.reciprocal %74 {approx = true} : vector<64x1xf32> -> vector<64x1xf32>
    %76 = vector.broadcast %75 : vector<64x1xf32> to vector<64x16xf32>
    %77 = arith.mulf %72, %76 : vector<64x16xf32>
    %78 = arith.truncf %77 : vector<64x16xf32> to vector<64x16xbf16>
    %c0_32 = arith.constant 0 : index
    %c0_33 = arith.constant 0 : index
    %79 = vector.load %arg7[%c0_32, %c0_33] : memref<16x16xbf16, #tpu.memory_space<vmem>>, vector<16x16xbf16>
    %cst_34 = arith.constant dense<0.000000e+00> : vector<64x16xf32>
    %80 = tpu.matmul %78, %79, %cst_34 {dimension_numbers = #tpu.dot_dimension_numbers<[1], [0], [0], [1], [0, 0, 1, 1], [], []>} : vector<64x16xbf16>, vector<16x16xbf16>, vector<64x16xf32> -> vector<64x16xf32>
    %81 = arith.addf %34, %80 : vector<64x16xf32>
    %c0_35 = arith.constant 0 : index
    %c0_36 = arith.constant 0 : index
    %82 = vector.load %arg8[%c0_35, %c0_36] : memref<1x16xf32, #tpu.memory_space<vmem>>, vector<1x16xf32>
    %83 = vector.broadcast %82 : vector<1x16xf32> to vector<64x16xf32>
    %84 = arith.addf %81, %83 : vector<64x16xf32>
    %c0_37 = arith.constant 0 : index
    %c0_38 = arith.constant 0 : index
    %85 = vector.load %arg9[%c0_37, %c0_38] : memref<1x16xf32, #tpu.memory_space<vmem>>, vector<1x16xf32>
    %c0_39 = arith.constant 0 : index
    %c0_40 = arith.constant 0 : index
    %86 = vector.load %arg10[%c0_39, %c0_40] : memref<1x16xf32, #tpu.memory_space<vmem>>, vector<1x16xf32>
    %cst_41 = arith.constant dense<0.000000e+00> : vector<64xf32>
    %87 = vector.multi_reduction <add>, %84, %cst_41 [1] : vector<64x16xf32> to vector<64xf32>
    %88 = vector.shape_cast %87 : vector<64xf32> to vector<64x1xf32>
    %cst_42 = arith.constant 1.600000e+01 : f32
    %89 = vector.broadcast %cst_42 : f32 to vector<64x1xf32>
    %90 = arith.divf %88, %89 : vector<64x1xf32>
    %91 = vector.broadcast %90 : vector<64x1xf32> to vector<64x16xf32>
    %92 = arith.subf %84, %91 : vector<64x16xf32>
    %93 = arith.mulf %92, %92 : vector<64x16xf32>
    %cst_43 = arith.constant dense<0.000000e+00> : vector<64xf32>
    %94 = vector.multi_reduction <add>, %93, %cst_43 [1] : vector<64x16xf32> to vector<64xf32>
    %95 = vector.shape_cast %94 : vector<64xf32> to vector<64x1xf32>
    %cst_44 = arith.constant 1.600000e+01 : f32
    %96 = vector.broadcast %cst_44 : f32 to vector<64x1xf32>
    %97 = arith.divf %95, %96 : vector<64x1xf32>
    %98 = vector.broadcast %90 : vector<64x1xf32> to vector<64x16xf32>
    %99 = arith.subf %84, %98 : vector<64x16xf32>
    %cst_45 = arith.constant 9.99999974E-6 : f32
    %100 = vector.broadcast %cst_45 : f32 to vector<64x1xf32>
    %101 = arith.addf %97, %100 : vector<64x1xf32>
    %102 = math.rsqrt %101 : vector<64x1xf32>
    %103 = vector.broadcast %102 : vector<64x1xf32> to vector<64x16xf32>
    %104 = arith.mulf %99, %103 : vector<64x16xf32>
    %105 = vector.broadcast %85 : vector<1x16xf32> to vector<64x16xf32>
    %106 = arith.mulf %104, %105 : vector<64x16xf32>
    %107 = vector.broadcast %86 : vector<1x16xf32> to vector<64x16xf32>
    %108 = arith.addf %106, %107 : vector<64x16xf32>
    %109 = arith.truncf %108 : vector<64x16xf32> to vector<64x16xbf16>
    %c0_46 = arith.constant 0 : index
    %c0_47 = arith.constant 0 : index
    %110 = vector.load %arg11[%c0_46, %c0_47] : memref<16x16xbf16, #tpu.memory_space<vmem>>, vector<16x16xbf16>
    %cst_48 = arith.constant dense<0.000000e+00> : vector<64x16xf32>
    %111 = tpu.matmul %109, %110, %cst_48 {dimension_numbers = #tpu.dot_dimension_numbers<[1], [0], [0], [1], [0, 0, 1, 1], [], []>} : vector<64x16xbf16>, vector<16x16xbf16>, vector<64x16xf32> -> vector<64x16xf32>
    %c0_49 = arith.constant 0 : index
    %c0_50 = arith.constant 0 : index
    %112 = vector.load %arg12[%c0_49, %c0_50] : memref<1x16xf32, #tpu.memory_space<vmem>>, vector<1x16xf32>
    %113 = vector.broadcast %112 : vector<1x16xf32> to vector<64x16xf32>
    %114 = arith.addf %111, %113 : vector<64x16xf32>
    %cst_51 = arith.constant 5.000000e-01 : f32
    %115 = vector.broadcast %cst_51 : f32 to vector<64x16xf32>
    %116 = arith.mulf %115, %114 : vector<64x16xf32>
    %cst_52 = arith.constant 4.471500e-02 : f32
    %117 = vector.broadcast %cst_52 : f32 to vector<64x16xf32>
    %118 = arith.mulf %117, %114 : vector<64x16xf32>
    %119 = arith.mulf %118, %114 : vector<64x16xf32>
    %120 = arith.mulf %119, %114 : vector<64x16xf32>
    %121 = arith.addf %114, %120 : vector<64x16xf32>
    %cst_53 = arith.constant 0.797884583 : f32
    %122 = vector.broadcast %cst_53 : f32 to vector<64x16xf32>
    %123 = arith.mulf %122, %121 : vector<64x16xf32>
    %124 = math.tanh %123 : vector<64x16xf32>
    %cst_54 = arith.constant 1.000000e+00 : f32
    %125 = vector.broadcast %cst_54 : f32 to vector<64x16xf32>
    %126 = arith.addf %125, %124 : vector<64x16xf32>
    %127 = arith.mulf %116, %126 : vector<64x16xf32>
    %128 = arith.truncf %127 : vector<64x16xf32> to vector<64x16xbf16>
    %c0_55 = arith.constant 0 : index
    %c0_56 = arith.constant 0 : index
    %129 = vector.load %arg13[%c0_55, %c0_56] : memref<16x16xbf16, #tpu.memory_space<vmem>>, vector<16x16xbf16>
    %cst_57 = arith.constant dense<0.000000e+00> : vector<64x16xf32>
    %130 = tpu.matmul %128, %129, %cst_57 {dimension_numbers = #tpu.dot_dimension_numbers<[1], [0], [0], [1], [0, 0, 1, 1], [], []>} : vector<64x16xbf16>, vector<16x16xbf16>, vector<64x16xf32> -> vector<64x16xf32>
    %c0_58 = arith.constant 0 : index
    %c0_59 = arith.constant 0 : index
    %131 = vector.load %arg14[%c0_58, %c0_59] : memref<1x16xf32, #tpu.memory_space<vmem>>, vector<1x16xf32>
    %132 = vector.broadcast %131 : vector<1x16xf32> to vector<64x16xf32>
    %133 = arith.addf %130, %132 : vector<64x16xf32>
    %134 = arith.addf %84, %133 : vector<64x16xf32>
    %135 = arith.truncf %134 : vector<64x16xf32> to vector<64x16xbf16>
    %c0_60 = arith.constant 0 : index
    %c0_61 = arith.constant 0 : index
    %c0_62 = arith.constant 0 : index
    %136 = vector.load %arg15[%c0_60, %c0_61, %c0_62] : memref<1x64x16xbf16, #tpu.memory_space<vmem>>, vector<1x64x16xbf16>
    %137 = vector.shape_cast %136 : vector<1x64x16xbf16> to vector<64x16xbf16>
    %138 = vector.shape_cast %135 : vector<64x16xbf16> to vector<1x64x16xbf16>
    tpu.vector_store %arg15[%c0_60, %c0_61, %c0_62], %138 {strides = array<i32>} : memref<1x64x16xbf16, #tpu.memory_space<vmem>>, vector<1x64x16xbf16>,
    return
  }
  func.func @transform_0(%arg0: i32) -> (i32, i32, i32) {
    %c0_i32 = arith.constant 0 : i32
    %c0_i32_0 = arith.constant 0 : i32
    %c0_i32_1 = arith.constant 0 : i32
    return %arg0, %c0_i32, %c0_i32_0 : i32, i32, i32
  }
  func.func @transform_1(%arg0: i32) -> (i32, i32) {
    %c0_i32 = arith.constant 0 : i32
    %c0_i32_0 = arith.constant 0 : i32
    %c0_i32_1 = arith.constant 0 : i32
    return %c0_i32, %c0_i32_0 : i32, i32
  }
  func.func @transform_2(%arg0: i32) -> (i32, i32) {
    %c0_i32 = arith.constant 0 : i32
    %c0_i32_0 = arith.constant 0 : i32
    %c0_i32_1 = arith.constant 0 : i32
    return %c0_i32, %c0_i32_0 : i32, i32
  }
  func.func @transform_3(%arg0: i32) -> (i32, i32) {
    %c0_i32 = arith.constant 0 : i32
    %c0_i32_0 = arith.constant 0 : i32
    %c0_i32_1 = arith.constant 0 : i32
    return %c0_i32, %c0_i32_0 : i32, i32
  }
  func.func @transform_4(%arg0: i32) -> (i32, i32) {
    %c0_i32 = arith.constant 0 : i32
    %c0_i32_0 = arith.constant 0 : i32
    %c0_i32_1 = arith.constant 0 : i32
    return %c0_i32, %c0_i32_0 : i32, i32
  }
  func.func @transform_5(%arg0: i32) -> (i32, i32) {
    %c0_i32 = arith.constant 0 : i32
    %c0_i32_0 = arith.constant 0 : i32
    %c0_i32_1 = arith.constant 0 : i32
    return %c0_i32, %c0_i32_0 : i32, i32
  }
  func.func @transform_6(%arg0: i32) -> (i32, i32) {
    %c0_i32 = arith.constant 0 : i32
    %c0_i32_0 = arith.constant 0 : i32
    %c0_i32_1 = arith.constant 0 : i32
    return %c0_i32, %c0_i32_0 : i32, i32
  }
  func.func @transform_7(%arg0: i32) -> (i32, i32) {
    %c0_i32 = arith.constant 0 : i32
    %c0_i32_0 = arith.constant 0 : i32
    %c0_i32_1 = arith.constant 0 : i32
    return %c0_i32, %c0_i32_0 : i32, i32
  }
  func.func @transform_8(%arg0: i32) -> (i32, i32) {
    %c0_i32 = arith.constant 0 : i32
    %c0_i32_0 = arith.constant 0 : i32
    %c0_i32_1 = arith.constant 0 : i32
    return %c0_i32, %c0_i32_0 : i32, i32
  }
  func.func @transform_9(%arg0: i32) -> (i32, i32) {
    %c0_i32 = arith.constant 0 : i32
    %c0_i32_0 = arith.constant 0 : i32
    %c0_i32_1 = arith.constant 0 : i32
    return %c0_i32, %c0_i32_0 : i32, i32
  }
  func.func @transform_10(%arg0: i32) -> (i32, i32) {
    %c0_i32 = arith.constant 0 : i32
    %c0_i32_0 = arith.constant 0 : i32
    %c0_i32_1 = arith.constant 0 : i32
    return %c0_i32, %c0_i32_0 : i32, i32
  }
  func.func @transform_11(%arg0: i32) -> (i32, i32) {
    %c0_i32 = arith.constant 0 : i32
    %c0_i32_0 = arith.constant 0 : i32
    %c0_i32_1 = arith.constant 0 : i32
    return %c0_i32, %c0_i32_0 : i32, i32
  }
  func.func @transform_12(%arg0: i32) -> (i32, i32) {
    %c0_i32 = arith.constant 0 : i32
    %c0_i32_0 = arith.constant 0 : i32
    %c0_i32_1 = arith.constant 0 : i32
    return %c0_i32, %c0_i32_0 : i32, i32
  }
  func.func @transform_13(%arg0: i32) -> (i32, i32) {
    %c0_i32 = arith.constant 0 : i32
    %c0_i32_0 = arith.constant 0 : i32
    %c0_i32_1 = arith.constant 0 : i32
    return %c0_i32, %c0_i32_0 : i32, i32
  }
  func.func @transform_14(%arg0: i32) -> (i32, i32, i32) {
    %c0_i32 = arith.constant 0 : i32
    %c0_i32_0 = arith.constant 0 : i32
    %c0_i32_1 = arith.constant 0 : i32
    return %arg0, %c0_i32, %c0_i32_0 : i32, i32, i32
  }
}

module attributes {stable_mosaic.version = 11 : i64} {
  func.func @_performer_block_kernel(%arg0: i32, %arg1: memref<1x16x144xbf16, #tpu.memory_space<vmem>>, %arg2: memref<1x144xf32, #tpu.memory_space<vmem>>, %arg3: memref<1x144xf32, #tpu.memory_space<vmem>>, %arg4: memref<144x48xbf16, #tpu.memory_space<vmem>>, %arg5: memref<1x48xf32, #tpu.memory_space<vmem>>, %arg6: memref<8x16xbf16, #tpu.memory_space<vmem>>, %arg7: memref<16x16xbf16, #tpu.memory_space<vmem>>, %arg8: memref<1x16xf32, #tpu.memory_space<vmem>>, %arg9: memref<1x16xf32, #tpu.memory_space<vmem>>, %arg10: memref<1x16xf32, #tpu.memory_space<vmem>>, %arg11: memref<16x16xbf16, #tpu.memory_space<vmem>>, %arg12: memref<1x16xf32, #tpu.memory_space<vmem>>, %arg13: memref<16x16xbf16, #tpu.memory_space<vmem>>, %arg14: memref<1x16xf32, #tpu.memory_space<vmem>>, %arg15: memref<1x16x16xbf16, #tpu.memory_space<vmem>>) attributes {dimension_semantics = [#tpu.dimension_semantics<parallel>], iteration_bounds = array<i64: 2>, scalar_prefetch = 0 : i64, scratch_operands = 0 : i64, tpu.core_type = #tpu.core_type<tc>, window_params = [{transform_indices = @transform_0, window_bounds = array<i64: 1, 16, 144>}, {pipeline_mode = #tpu.pipeline_mode<synchronous>, transform_indices = @transform_1, window_bounds = array<i64: 1, 144>}, {pipeline_mode = #tpu.pipeline_mode<synchronous>, transform_indices = @transform_2, window_bounds = array<i64: 1, 144>}, {pipeline_mode = #tpu.pipeline_mode<synchronous>, transform_indices = @transform_3, window_bounds = array<i64: 144, 48>}, {pipeline_mode = #tpu.pipeline_mode<synchronous>, transform_indices = @transform_4, window_bounds = array<i64: 1, 48>}, {pipeline_mode = #tpu.pipeline_mode<synchronous>, transform_indices = @transform_5, window_bounds = array<i64: 8, 16>}, {pipeline_mode = #tpu.pipeline_mode<synchronous>, transform_indices = @transform_6, window_bounds = array<i64: 16, 16>}, {pipeline_mode = #tpu.pipeline_mode<synchronous>, transform_indices = @transform_7, window_bounds = array<i64: 1, 16>}, {pipeline_mode = #tpu.pipeline_mode<synchronous>, transform_indices = @transform_8, window_bounds = array<i64: 1, 16>}, {pipeline_mode = #tpu.pipeline_mode<synchronous>, transform_indices = @transform_9, window_bounds = array<i64: 1, 16>}, {pipeline_mode = #tpu.pipeline_mode<synchronous>, transform_indices = @transform_10, window_bounds = array<i64: 16, 16>}, {pipeline_mode = #tpu.pipeline_mode<synchronous>, transform_indices = @transform_11, window_bounds = array<i64: 1, 16>}, {pipeline_mode = #tpu.pipeline_mode<synchronous>, transform_indices = @transform_12, window_bounds = array<i64: 16, 16>}, {pipeline_mode = #tpu.pipeline_mode<synchronous>, transform_indices = @transform_13, window_bounds = array<i64: 1, 16>}, {transform_indices = @transform_14, window_bounds = array<i64: 1, 16, 16>}]} {
    %c0 = arith.constant 0 : index
    %c0_0 = arith.constant 0 : index
    %c0_1 = arith.constant 0 : index
    %0 = vector.load %arg1[%c0, %c0_0, %c0_1] : memref<1x16x144xbf16, #tpu.memory_space<vmem>>, vector<1x16x144xbf16>
    %1 = vector.shape_cast %0 : vector<1x16x144xbf16> to vector<16x144xbf16>
    %2 = arith.extf %1 : vector<16x144xbf16> to vector<16x144xf32>
    %c0_2 = arith.constant 0 : index
    %c0_3 = arith.constant 0 : index
    %3 = vector.load %arg2[%c0_2, %c0_3] : memref<1x144xf32, #tpu.memory_space<vmem>>, vector<1x144xf32>
    %c0_4 = arith.constant 0 : index
    %c0_5 = arith.constant 0 : index
    %4 = vector.load %arg3[%c0_4, %c0_5] : memref<1x144xf32, #tpu.memory_space<vmem>>, vector<1x144xf32>
    %cst = arith.constant dense<0.000000e+00> : vector<16xf32>
    %5 = vector.multi_reduction <add>, %2, %cst [1] : vector<16x144xf32> to vector<16xf32>
    %6 = vector.shape_cast %5 : vector<16xf32> to vector<16x1xf32>
    %cst_6 = arith.constant 1.440000e+02 : f32
    %7 = vector.broadcast %cst_6 : f32 to vector<16x1xf32>
    %8 = arith.divf %6, %7 : vector<16x1xf32>
    %9 = vector.broadcast %8 : vector<16x1xf32> to vector<16x144xf32>
    %10 = arith.subf %2, %9 : vector<16x144xf32>
    %11 = arith.mulf %10, %10 : vector<16x144xf32>
    %cst_7 = arith.constant dense<0.000000e+00> : vector<16xf32>
    %12 = vector.multi_reduction <add>, %11, %cst_7 [1] : vector<16x144xf32> to vector<16xf32>
    %13 = vector.shape_cast %12 : vector<16xf32> to vector<16x1xf32>
    %cst_8 = arith.constant 1.440000e+02 : f32
    %14 = vector.broadcast %cst_8 : f32 to vector<16x1xf32>
    %15 = arith.divf %13, %14 : vector<16x1xf32>
    %16 = vector.broadcast %8 : vector<16x1xf32> to vector<16x144xf32>
    %17 = arith.subf %2, %16 : vector<16x144xf32>
    %cst_9 = arith.constant 9.99999974E-6 : f32
    %18 = vector.broadcast %cst_9 : f32 to vector<16x1xf32>
    %19 = arith.addf %15, %18 : vector<16x1xf32>
    %20 = math.rsqrt %19 : vector<16x1xf32>
    %21 = vector.broadcast %20 : vector<16x1xf32> to vector<16x144xf32>
    %22 = arith.mulf %17, %21 : vector<16x144xf32>
    %23 = vector.broadcast %3 : vector<1x144xf32> to vector<16x144xf32>
    %24 = arith.mulf %22, %23 : vector<16x144xf32>
    %25 = vector.broadcast %4 : vector<1x144xf32> to vector<16x144xf32>
    %26 = arith.addf %24, %25 : vector<16x144xf32>
    %27 = arith.truncf %26 : vector<16x144xf32> to vector<16x144xbf16>
    %c0_10 = arith.constant 0 : index
    %c0_11 = arith.constant 0 : index
    %28 = vector.load %arg4[%c0_10, %c0_11] : memref<144x48xbf16, #tpu.memory_space<vmem>>, vector<144x48xbf16>
    %cst_12 = arith.constant dense<0.000000e+00> : vector<16x48xf32>
    %29 = tpu.matmul %27, %28, %cst_12 {dimension_numbers = #tpu.dot_dimension_numbers<[1], [0], [0], [1], [0, 0, 1, 1], [], []>} : vector<16x144xbf16>, vector<144x48xbf16>, vector<16x48xf32> -> vector<16x48xf32>
    %c0_13 = arith.constant 0 : index
    %c0_14 = arith.constant 0 : index
    %30 = vector.load %arg5[%c0_13, %c0_14] : memref<1x48xf32, #tpu.memory_space<vmem>>, vector<1x48xf32>
    %31 = vector.broadcast %30 : vector<1x48xf32> to vector<16x48xf32>
    %32 = arith.addf %29, %31 : vector<16x48xf32>
    %33 = vector.extract_strided_slice %32 {offsets = [0, 0], sizes = [16, 16], strides = [1, 1]} : vector<16x48xf32> to vector<16x16xf32>
    %34 = vector.extract_strided_slice %32 {offsets = [0, 16], sizes = [16, 16], strides = [1, 1]} : vector<16x48xf32> to vector<16x16xf32>
    %35 = vector.extract_strided_slice %32 {offsets = [0, 32], sizes = [16, 16], strides = [1, 1]} : vector<16x48xf32> to vector<16x16xf32>
    %36 = arith.truncf %33 : vector<16x16xf32> to vector<16x16xbf16>
    %c0_15 = arith.constant 0 : index
    %c0_16 = arith.constant 0 : index
    %37 = vector.load %arg6[%c0_15, %c0_16] : memref<8x16xbf16, #tpu.memory_space<vmem>>, vector<8x16xbf16>
    %cst_17 = arith.constant dense<0.000000e+00> : vector<16x8xf32>
    %38 = tpu.matmul %36, %37, %cst_17 {dimension_numbers = #tpu.dot_dimension_numbers<[1], [1], [0], [0], [0, 0, 1, 0], [], []>} : vector<16x16xbf16>, vector<8x16xbf16>, vector<16x8xf32> -> vector<16x8xf32>
    %39 = arith.truncf %34 : vector<16x16xf32> to vector<16x16xbf16>
    %c0_18 = arith.constant 0 : index
    %c0_19 = arith.constant 0 : index
    %40 = vector.load %arg6[%c0_18, %c0_19] : memref<8x16xbf16, #tpu.memory_space<vmem>>, vector<8x16xbf16>
    %cst_20 = arith.constant dense<0.000000e+00> : vector<16x8xf32>
    %41 = tpu.matmul %39, %40, %cst_20 {dimension_numbers = #tpu.dot_dimension_numbers<[1], [1], [0], [0], [0, 0, 1, 0], [], []>} : vector<16x16xbf16>, vector<8x16xbf16>, vector<16x8xf32> -> vector<16x8xf32>
    %42 = arith.mulf %33, %33 : vector<16x16xf32>
    %cst_21 = arith.constant dense<0.000000e+00> : vector<16xf32>
    %43 = vector.multi_reduction <add>, %42, %cst_21 [1] : vector<16x16xf32> to vector<16xf32>
    %44 = vector.shape_cast %43 : vector<16xf32> to vector<16x1xf32>
    %cst_22 = arith.constant 5.000000e-01 : f32
    %45 = vector.broadcast %cst_22 : f32 to vector<16x1xf32>
    %46 = arith.mulf %45, %44 : vector<16x1xf32>
    %47 = vector.broadcast %46 : vector<16x1xf32> to vector<16x8xf32>
    %48 = arith.subf %38, %47 : vector<16x8xf32>
    %49 = math.exp %48 : vector<16x8xf32>
    %cst_23 = arith.constant 0.353553385 : f32
    %50 = vector.broadcast %cst_23 : f32 to vector<16x8xf32>
    %51 = arith.mulf %49, %50 : vector<16x8xf32>
    %52 = arith.mulf %34, %34 : vector<16x16xf32>
    %cst_24 = arith.constant dense<0.000000e+00> : vector<16xf32>
    %53 = vector.multi_reduction <add>, %52, %cst_24 [1] : vector<16x16xf32> to vector<16xf32>
    %54 = vector.shape_cast %53 : vector<16xf32> to vector<16x1xf32>
    %cst_25 = arith.constant 5.000000e-01 : f32
    %55 = vector.broadcast %cst_25 : f32 to vector<16x1xf32>
    %56 = arith.mulf %55, %54 : vector<16x1xf32>
    %57 = vector.broadcast %56 : vector<16x1xf32> to vector<16x8xf32>
    %58 = arith.subf %41, %57 : vector<16x8xf32>
    %59 = math.exp %58 : vector<16x8xf32>
    %cst_26 = arith.constant 0.353553385 : f32
    %60 = vector.broadcast %cst_26 : f32 to vector<16x8xf32>
    %61 = arith.mulf %59, %60 : vector<16x8xf32>
    %cst_27 = arith.constant dense<0.000000e+00> : vector<8xf32>
    %62 = vector.multi_reduction <add>, %51, %cst_27 [0] : vector<16x8xf32> to vector<8xf32>
    %63 = vector.shape_cast %62 : vector<8xf32> to vector<1x8xf32>
    %64 = vector.broadcast %63 : vector<1x8xf32> to vector<16x8xf32>
    %65 = arith.mulf %61, %64 : vector<16x8xf32>
    %cst_28 = arith.constant dense<0.000000e+00> : vector<16xf32>
    %66 = vector.multi_reduction <add>, %65, %cst_28 [1] : vector<16x8xf32> to vector<16xf32>
    %67 = vector.shape_cast %66 : vector<16xf32> to vector<16x1xf32>
    %68 = arith.truncf %35 : vector<16x16xf32> to vector<16x16xbf16>
    %69 = arith.truncf %51 : vector<16x8xf32> to vector<16x8xbf16>
    %cst_29 = arith.constant dense<0.000000e+00> : vector<16x8xf32>
    %70 = tpu.matmul %68, %69, %cst_29 {dimension_numbers = #tpu.dot_dimension_numbers<[0], [0], [1], [1], [0, 1, 1, 1], [], []>} : vector<16x16xbf16>, vector<16x8xbf16>, vector<16x8xf32> -> vector<16x8xf32>
    %71 = arith.truncf %61 : vector<16x8xf32> to vector<16x8xbf16>
    %72 = arith.truncf %70 : vector<16x8xf32> to vector<16x8xbf16>
    %cst_30 = arith.constant dense<0.000000e+00> : vector<16x16xf32>
    %73 = tpu.matmul %71, %72, %cst_30 {dimension_numbers = #tpu.dot_dimension_numbers<[1], [1], [0], [0], [0, 0, 1, 0], [], []>} : vector<16x8xbf16>, vector<16x8xbf16>, vector<16x16xf32> -> vector<16x16xf32>
    %cst_31 = arith.constant 9.99999993E-9 : f32
    %74 = vector.broadcast %cst_31 : f32 to vector<16x1xf32>
    %75 = arith.addf %67, %74 : vector<16x1xf32>
    %76 = tpu.reciprocal %75 {approx = true} : vector<16x1xf32> -> vector<16x1xf32>
    %77 = vector.broadcast %76 : vector<16x1xf32> to vector<16x16xf32>
    %78 = arith.mulf %73, %77 : vector<16x16xf32>
    %79 = arith.truncf %78 : vector<16x16xf32> to vector<16x16xbf16>
    %c0_32 = arith.constant 0 : index
    %c0_33 = arith.constant 0 : index
    %80 = vector.load %arg7[%c0_32, %c0_33] : memref<16x16xbf16, #tpu.memory_space<vmem>>, vector<16x16xbf16>
    %cst_34 = arith.constant dense<0.000000e+00> : vector<16x16xf32>
    %81 = tpu.matmul %79, %80, %cst_34 {dimension_numbers = #tpu.dot_dimension_numbers<[1], [0], [0], [1], [0, 0, 1, 1], [], []>} : vector<16x16xbf16>, vector<16x16xbf16>, vector<16x16xf32> -> vector<16x16xf32>
    %82 = arith.addf %35, %81 : vector<16x16xf32>
    %c0_35 = arith.constant 0 : index
    %c0_36 = arith.constant 0 : index
    %83 = vector.load %arg8[%c0_35, %c0_36] : memref<1x16xf32, #tpu.memory_space<vmem>>, vector<1x16xf32>
    %84 = vector.broadcast %83 : vector<1x16xf32> to vector<16x16xf32>
    %85 = arith.addf %82, %84 : vector<16x16xf32>
    %c0_37 = arith.constant 0 : index
    %c0_38 = arith.constant 0 : index
    %86 = vector.load %arg9[%c0_37, %c0_38] : memref<1x16xf32, #tpu.memory_space<vmem>>, vector<1x16xf32>
    %c0_39 = arith.constant 0 : index
    %c0_40 = arith.constant 0 : index
    %87 = vector.load %arg10[%c0_39, %c0_40] : memref<1x16xf32, #tpu.memory_space<vmem>>, vector<1x16xf32>
    %cst_41 = arith.constant dense<0.000000e+00> : vector<16xf32>
    %88 = vector.multi_reduction <add>, %85, %cst_41 [1] : vector<16x16xf32> to vector<16xf32>
    %89 = vector.shape_cast %88 : vector<16xf32> to vector<16x1xf32>
    %cst_42 = arith.constant 1.600000e+01 : f32
    %90 = vector.broadcast %cst_42 : f32 to vector<16x1xf32>
    %91 = arith.divf %89, %90 : vector<16x1xf32>
    %92 = vector.broadcast %91 : vector<16x1xf32> to vector<16x16xf32>
    %93 = arith.subf %85, %92 : vector<16x16xf32>
    %94 = arith.mulf %93, %93 : vector<16x16xf32>
    %cst_43 = arith.constant dense<0.000000e+00> : vector<16xf32>
    %95 = vector.multi_reduction <add>, %94, %cst_43 [1] : vector<16x16xf32> to vector<16xf32>
    %96 = vector.shape_cast %95 : vector<16xf32> to vector<16x1xf32>
    %cst_44 = arith.constant 1.600000e+01 : f32
    %97 = vector.broadcast %cst_44 : f32 to vector<16x1xf32>
    %98 = arith.divf %96, %97 : vector<16x1xf32>
    %99 = vector.broadcast %91 : vector<16x1xf32> to vector<16x16xf32>
    %100 = arith.subf %85, %99 : vector<16x16xf32>
    %cst_45 = arith.constant 9.99999974E-6 : f32
    %101 = vector.broadcast %cst_45 : f32 to vector<16x1xf32>
    %102 = arith.addf %98, %101 : vector<16x1xf32>
    %103 = math.rsqrt %102 : vector<16x1xf32>
    %104 = vector.broadcast %103 : vector<16x1xf32> to vector<16x16xf32>
    %105 = arith.mulf %100, %104 : vector<16x16xf32>
    %106 = vector.broadcast %86 : vector<1x16xf32> to vector<16x16xf32>
    %107 = arith.mulf %105, %106 : vector<16x16xf32>
    %108 = vector.broadcast %87 : vector<1x16xf32> to vector<16x16xf32>
    %109 = arith.addf %107, %108 : vector<16x16xf32>
    %110 = arith.truncf %109 : vector<16x16xf32> to vector<16x16xbf16>
    %c0_46 = arith.constant 0 : index
    %c0_47 = arith.constant 0 : index
    %111 = vector.load %arg11[%c0_46, %c0_47] : memref<16x16xbf16, #tpu.memory_space<vmem>>, vector<16x16xbf16>
    %cst_48 = arith.constant dense<0.000000e+00> : vector<16x16xf32>
    %112 = tpu.matmul %110, %111, %cst_48 {dimension_numbers = #tpu.dot_dimension_numbers<[1], [0], [0], [1], [0, 0, 1, 1], [], []>} : vector<16x16xbf16>, vector<16x16xbf16>, vector<16x16xf32> -> vector<16x16xf32>
    %c0_49 = arith.constant 0 : index
    %c0_50 = arith.constant 0 : index
    %113 = vector.load %arg12[%c0_49, %c0_50] : memref<1x16xf32, #tpu.memory_space<vmem>>, vector<1x16xf32>
    %114 = vector.broadcast %113 : vector<1x16xf32> to vector<16x16xf32>
    %115 = arith.addf %112, %114 : vector<16x16xf32>
    %cst_51 = arith.constant 5.000000e-01 : f32
    %116 = vector.broadcast %cst_51 : f32 to vector<16x16xf32>
    %117 = arith.mulf %116, %115 : vector<16x16xf32>
    %cst_52 = arith.constant 4.471500e-02 : f32
    %118 = vector.broadcast %cst_52 : f32 to vector<16x16xf32>
    %119 = arith.mulf %118, %115 : vector<16x16xf32>
    %120 = arith.mulf %119, %115 : vector<16x16xf32>
    %121 = arith.mulf %120, %115 : vector<16x16xf32>
    %122 = arith.addf %115, %121 : vector<16x16xf32>
    %cst_53 = arith.constant 0.797884583 : f32
    %123 = vector.broadcast %cst_53 : f32 to vector<16x16xf32>
    %124 = arith.mulf %123, %122 : vector<16x16xf32>
    %125 = math.tanh %124 : vector<16x16xf32>
    %cst_54 = arith.constant 1.000000e+00 : f32
    %126 = vector.broadcast %cst_54 : f32 to vector<16x16xf32>
    %127 = arith.addf %126, %125 : vector<16x16xf32>
    %128 = arith.mulf %117, %127 : vector<16x16xf32>
    %129 = arith.truncf %128 : vector<16x16xf32> to vector<16x16xbf16>
    %c0_55 = arith.constant 0 : index
    %c0_56 = arith.constant 0 : index
    %130 = vector.load %arg13[%c0_55, %c0_56] : memref<16x16xbf16, #tpu.memory_space<vmem>>, vector<16x16xbf16>
    %cst_57 = arith.constant dense<0.000000e+00> : vector<16x16xf32>
    %131 = tpu.matmul %129, %130, %cst_57 {dimension_numbers = #tpu.dot_dimension_numbers<[1], [0], [0], [1], [0, 0, 1, 1], [], []>} : vector<16x16xbf16>, vector<16x16xbf16>, vector<16x16xf32> -> vector<16x16xf32>
    %c0_58 = arith.constant 0 : index
    %c0_59 = arith.constant 0 : index
    %132 = vector.load %arg14[%c0_58, %c0_59] : memref<1x16xf32, #tpu.memory_space<vmem>>, vector<1x16xf32>
    %133 = vector.broadcast %132 : vector<1x16xf32> to vector<16x16xf32>
    %134 = arith.addf %131, %133 : vector<16x16xf32>
    %135 = arith.addf %85, %134 : vector<16x16xf32>
    %136 = arith.truncf %135 : vector<16x16xf32> to vector<16x16xbf16>
    %c0_60 = arith.constant 0 : index
    %c0_61 = arith.constant 0 : index
    %c0_62 = arith.constant 0 : index
    %137 = vector.load %arg15[%c0_60, %c0_61, %c0_62] : memref<1x16x16xbf16, #tpu.memory_space<vmem>>, vector<1x16x16xbf16>
    %138 = vector.shape_cast %137 : vector<1x16x16xbf16> to vector<16x16xbf16>
    %139 = vector.shape_cast %136 : vector<16x16xbf16> to vector<1x16x16xbf16>
    tpu.vector_store %arg15[%c0_60, %c0_61, %c0_62], %139 {strides = array<i32>} : memref<1x16x16xbf16, #tpu.memory_space<vmem>>, vector<1x16x16xbf16>,
    return
  }
  func.func @transform_0(%arg0: i32) -> (i32, i32, i32) {
    %c0_i32 = arith.constant 0 : i32
    %c0_i32_0 = arith.constant 0 : i32
    %c0_i32_1 = arith.constant 0 : i32
    return %arg0, %c0_i32, %c0_i32_0 : i32, i32, i32
  }
  func.func @transform_1(%arg0: i32) -> (i32, i32) {
    %c0_i32 = arith.constant 0 : i32
    %c0_i32_0 = arith.constant 0 : i32
    %c0_i32_1 = arith.constant 0 : i32
    return %c0_i32, %c0_i32_0 : i32, i32
  }
  func.func @transform_2(%arg0: i32) -> (i32, i32) {
    %c0_i32 = arith.constant 0 : i32
    %c0_i32_0 = arith.constant 0 : i32
    %c0_i32_1 = arith.constant 0 : i32
    return %c0_i32, %c0_i32_0 : i32, i32
  }
  func.func @transform_3(%arg0: i32) -> (i32, i32) {
    %c0_i32 = arith.constant 0 : i32
    %c0_i32_0 = arith.constant 0 : i32
    %c0_i32_1 = arith.constant 0 : i32
    return %c0_i32, %c0_i32_0 : i32, i32
  }
  func.func @transform_4(%arg0: i32) -> (i32, i32) {
    %c0_i32 = arith.constant 0 : i32
    %c0_i32_0 = arith.constant 0 : i32
    %c0_i32_1 = arith.constant 0 : i32
    return %c0_i32, %c0_i32_0 : i32, i32
  }
  func.func @transform_5(%arg0: i32) -> (i32, i32) {
    %c0_i32 = arith.constant 0 : i32
    %c0_i32_0 = arith.constant 0 : i32
    %c0_i32_1 = arith.constant 0 : i32
    return %c0_i32, %c0_i32_0 : i32, i32
  }
  func.func @transform_6(%arg0: i32) -> (i32, i32) {
    %c0_i32 = arith.constant 0 : i32
    %c0_i32_0 = arith.constant 0 : i32
    %c0_i32_1 = arith.constant 0 : i32
    return %c0_i32, %c0_i32_0 : i32, i32
  }
  func.func @transform_7(%arg0: i32) -> (i32, i32) {
    %c0_i32 = arith.constant 0 : i32
    %c0_i32_0 = arith.constant 0 : i32
    %c0_i32_1 = arith.constant 0 : i32
    return %c0_i32, %c0_i32_0 : i32, i32
  }
  func.func @transform_8(%arg0: i32) -> (i32, i32) {
    %c0_i32 = arith.constant 0 : i32
    %c0_i32_0 = arith.constant 0 : i32
    %c0_i32_1 = arith.constant 0 : i32
    return %c0_i32, %c0_i32_0 : i32, i32
  }
  func.func @transform_9(%arg0: i32) -> (i32, i32) {
    %c0_i32 = arith.constant 0 : i32
    %c0_i32_0 = arith.constant 0 : i32
    %c0_i32_1 = arith.constant 0 : i32
    return %c0_i32, %c0_i32_0 : i32, i32
  }
  func.func @transform_10(%arg0: i32) -> (i32, i32) {
    %c0_i32 = arith.constant 0 : i32
    %c0_i32_0 = arith.constant 0 : i32
    %c0_i32_1 = arith.constant 0 : i32
    return %c0_i32, %c0_i32_0 : i32, i32
  }
  func.func @transform_11(%arg0: i32) -> (i32, i32) {
    %c0_i32 = arith.constant 0 : i32
    %c0_i32_0 = arith.constant 0 : i32
    %c0_i32_1 = arith.constant 0 : i32
    return %c0_i32, %c0_i32_0 : i32, i32
  }
  func.func @transform_12(%arg0: i32) -> (i32, i32) {
    %c0_i32 = arith.constant 0 : i32
    %c0_i32_0 = arith.constant 0 : i32
    %c0_i32_1 = arith.constant 0 : i32
    return %c0_i32, %c0_i32_0 : i32, i32
  }
  func.func @transform_13(%arg0: i32) -> (i32, i32) {
    %c0_i32 = arith.constant 0 : i32
    %c0_i32_0 = arith.constant 0 : i32
    %c0_i32_1 = arith.constant 0 : i32
    return %c0_i32, %c0_i32_0 : i32, i32
  }
  func.func @transform_14(%arg0: i32) -> (i32, i32, i32) {
    %c0_i32 = arith.constant 0 : i32
    %c0_i32_0 = arith.constant 0 : i32
    %c0_i32_1 = arith.constant 0 : i32
    return %arg0, %c0_i32, %c0_i32_0 : i32, i32, i32
  }
}

module attributes {stable_mosaic.version = 11 : i64} {
  func.func @_linear_kernel(%arg0: i32, %arg1: memref<8x144xbf16, #tpu.memory_space<vmem>>, %arg2: memref<144x32xbf16, #tpu.memory_space<vmem>>, %arg3: memref<1x32xf32, #tpu.memory_space<vmem>>, %arg4: memref<8x32xbf16, #tpu.memory_space<vmem>>) attributes {dimension_semantics = [#tpu.dimension_semantics<parallel>], iteration_bounds = array<i64: 1>, scalar_prefetch = 0 : i64, scratch_operands = 0 : i64, tpu.core_type = #tpu.core_type<tc>, window_params = [{transform_indices = @transform_0, window_bounds = array<i64: 8, 144>}, {pipeline_mode = #tpu.pipeline_mode<synchronous>, transform_indices = @transform_1, window_bounds = array<i64: 144, 32>}, {pipeline_mode = #tpu.pipeline_mode<synchronous>, transform_indices = @transform_2, window_bounds = array<i64: 1, 32>}, {transform_indices = @transform_3, window_bounds = array<i64: 8, 32>}]} {
    %c0 = arith.constant 0 : index
    %c0_0 = arith.constant 0 : index
    %0 = vector.load %arg1[%c0, %c0_0] : memref<8x144xbf16, #tpu.memory_space<vmem>>, vector<8x144xbf16>
    %c0_1 = arith.constant 0 : index
    %c0_2 = arith.constant 0 : index
    %1 = vector.load %arg2[%c0_1, %c0_2] : memref<144x32xbf16, #tpu.memory_space<vmem>>, vector<144x32xbf16>
    %cst = arith.constant dense<0.000000e+00> : vector<8x32xf32>
    %2 = tpu.matmul %0, %1, %cst {dimension_numbers = #tpu.dot_dimension_numbers<[1], [0], [0], [1], [0, 0, 1, 1], [], []>} : vector<8x144xbf16>, vector<144x32xbf16>, vector<8x32xf32> -> vector<8x32xf32>
    %c0_3 = arith.constant 0 : index
    %c0_4 = arith.constant 0 : index
    %3 = vector.load %arg3[%c0_3, %c0_4] : memref<1x32xf32, #tpu.memory_space<vmem>>, vector<1x32xf32>
    %4 = vector.broadcast %3 : vector<1x32xf32> to vector<8x32xf32>
    %5 = arith.addf %2, %4 : vector<8x32xf32>
    %6 = arith.truncf %5 : vector<8x32xf32> to vector<8x32xbf16>
    %c0_5 = arith.constant 0 : index
    %c0_6 = arith.constant 0 : index
    %7 = vector.load %arg4[%c0_5, %c0_6] : memref<8x32xbf16, #tpu.memory_space<vmem>>, vector<8x32xbf16>
    tpu.vector_store %arg4[%c0_5, %c0_6], %6 {strides = array<i32>} : memref<8x32xbf16, #tpu.memory_space<vmem>>, vector<8x32xbf16>,
    return
  }
  func.func @transform_0(%arg0: i32) -> (i32, i32) {
    %c0_i32 = arith.constant 0 : i32
    %c0_i32_0 = arith.constant 0 : i32
    return %arg0, %c0_i32 : i32, i32
  }
  func.func @transform_1(%arg0: i32) -> (i32, i32) {
    %c0_i32 = arith.constant 0 : i32
    %c0_i32_0 = arith.constant 0 : i32
    %c0_i32_1 = arith.constant 0 : i32
    return %c0_i32, %c0_i32_0 : i32, i32
  }
  func.func @transform_2(%arg0: i32) -> (i32, i32) {
    %c0_i32 = arith.constant 0 : i32
    %c0_i32_0 = arith.constant 0 : i32
    %c0_i32_1 = arith.constant 0 : i32
    return %c0_i32, %c0_i32_0 : i32, i32
  }
  func.func @transform_3(%arg0: i32) -> (i32, i32) {
    %c0_i32 = arith.constant 0 : i32
    %c0_i32_0 = arith.constant 0 : i32
    return %arg0, %c0_i32 : i32, i32
  }
}

module attributes {stable_mosaic.version = 11 : i64} {
  func.func @_ln_linear_kernel(%arg0: i32, %arg1: memref<2x32xbf16, #tpu.memory_space<vmem>>, %arg2: memref<1x32xf32, #tpu.memory_space<vmem>>, %arg3: memref<1x32xf32, #tpu.memory_space<vmem>>, %arg4: memref<32x10xbf16, #tpu.memory_space<vmem>>, %arg5: memref<1x10xf32, #tpu.memory_space<vmem>>, %arg6: memref<2x10xf32, #tpu.memory_space<vmem>>) attributes {dimension_semantics = [#tpu.dimension_semantics<parallel>], iteration_bounds = array<i64: 1>, scalar_prefetch = 0 : i64, scratch_operands = 0 : i64, tpu.core_type = #tpu.core_type<tc>, window_params = [{transform_indices = @transform_0, window_bounds = array<i64: 2, 32>}, {pipeline_mode = #tpu.pipeline_mode<synchronous>, transform_indices = @transform_1, window_bounds = array<i64: 1, 32>}, {pipeline_mode = #tpu.pipeline_mode<synchronous>, transform_indices = @transform_2, window_bounds = array<i64: 1, 32>}, {pipeline_mode = #tpu.pipeline_mode<synchronous>, transform_indices = @transform_3, window_bounds = array<i64: 32, 10>}, {pipeline_mode = #tpu.pipeline_mode<synchronous>, transform_indices = @transform_4, window_bounds = array<i64: 1, 10>}, {transform_indices = @transform_5, window_bounds = array<i64: 2, 10>}]} {
    %c0 = arith.constant 0 : index
    %c0_0 = arith.constant 0 : index
    %0 = vector.load %arg1[%c0, %c0_0] : memref<2x32xbf16, #tpu.memory_space<vmem>>, vector<2x32xbf16>
    %1 = arith.extf %0 : vector<2x32xbf16> to vector<2x32xf32>
    %c0_1 = arith.constant 0 : index
    %c0_2 = arith.constant 0 : index
    %2 = vector.load %arg2[%c0_1, %c0_2] : memref<1x32xf32, #tpu.memory_space<vmem>>, vector<1x32xf32>
    %c0_3 = arith.constant 0 : index
    %c0_4 = arith.constant 0 : index
    %3 = vector.load %arg3[%c0_3, %c0_4] : memref<1x32xf32, #tpu.memory_space<vmem>>, vector<1x32xf32>
    %cst = arith.constant dense<0.000000e+00> : vector<2xf32>
    %4 = vector.multi_reduction <add>, %1, %cst [1] : vector<2x32xf32> to vector<2xf32>
    %5 = vector.shape_cast %4 : vector<2xf32> to vector<2x1xf32>
    %cst_5 = arith.constant 3.200000e+01 : f32
    %6 = vector.broadcast %cst_5 : f32 to vector<2x1xf32>
    %7 = arith.divf %5, %6 : vector<2x1xf32>
    %8 = vector.broadcast %7 : vector<2x1xf32> to vector<2x32xf32>
    %9 = arith.subf %1, %8 : vector<2x32xf32>
    %10 = arith.mulf %9, %9 : vector<2x32xf32>
    %cst_6 = arith.constant dense<0.000000e+00> : vector<2xf32>
    %11 = vector.multi_reduction <add>, %10, %cst_6 [1] : vector<2x32xf32> to vector<2xf32>
    %12 = vector.shape_cast %11 : vector<2xf32> to vector<2x1xf32>
    %cst_7 = arith.constant 3.200000e+01 : f32
    %13 = vector.broadcast %cst_7 : f32 to vector<2x1xf32>
    %14 = arith.divf %12, %13 : vector<2x1xf32>
    %15 = vector.broadcast %7 : vector<2x1xf32> to vector<2x32xf32>
    %16 = arith.subf %1, %15 : vector<2x32xf32>
    %cst_8 = arith.constant 9.99999974E-6 : f32
    %17 = vector.broadcast %cst_8 : f32 to vector<2x1xf32>
    %18 = arith.addf %14, %17 : vector<2x1xf32>
    %19 = math.rsqrt %18 : vector<2x1xf32>
    %20 = vector.broadcast %19 : vector<2x1xf32> to vector<2x32xf32>
    %21 = arith.mulf %16, %20 : vector<2x32xf32>
    %22 = vector.broadcast %2 : vector<1x32xf32> to vector<2x32xf32>
    %23 = arith.mulf %21, %22 : vector<2x32xf32>
    %24 = vector.broadcast %3 : vector<1x32xf32> to vector<2x32xf32>
    %25 = arith.addf %23, %24 : vector<2x32xf32>
    %26 = arith.truncf %25 : vector<2x32xf32> to vector<2x32xbf16>
    %c0_9 = arith.constant 0 : index
    %c0_10 = arith.constant 0 : index
    %27 = vector.load %arg4[%c0_9, %c0_10] : memref<32x10xbf16, #tpu.memory_space<vmem>>, vector<32x10xbf16>
    %cst_11 = arith.constant dense<0.000000e+00> : vector<2x10xf32>
    %28 = tpu.matmul %26, %27, %cst_11 {dimension_numbers = #tpu.dot_dimension_numbers<[1], [0], [0], [1], [0, 0, 1, 1], [], []>} : vector<2x32xbf16>, vector<32x10xbf16>, vector<2x10xf32> -> vector<2x10xf32>
    %c0_12 = arith.constant 0 : index
    %c0_13 = arith.constant 0 : index
    %29 = vector.load %arg5[%c0_12, %c0_13] : memref<1x10xf32, #tpu.memory_space<vmem>>, vector<1x10xf32>
    %30 = vector.broadcast %29 : vector<1x10xf32> to vector<2x10xf32>
    %31 = arith.addf %28, %30 : vector<2x10xf32>
    %c0_14 = arith.constant 0 : index
    %c0_15 = arith.constant 0 : index
    %32 = vector.load %arg6[%c0_14, %c0_15] : memref<2x10xf32, #tpu.memory_space<vmem>>, vector<2x10xf32>
    tpu.vector_store %arg6[%c0_14, %c0_15], %31 {strides = array<i32>} : memref<2x10xf32, #tpu.memory_space<vmem>>, vector<2x10xf32>,
    return
  }
  func.func @transform_0(%arg0: i32) -> (i32, i32) {
    %c0_i32 = arith.constant 0 : i32
    %c0_i32_0 = arith.constant 0 : i32
    return %arg0, %c0_i32 : i32, i32
  }
  func.func @transform_1(%arg0: i32) -> (i32, i32) {
    %c0_i32 = arith.constant 0 : i32
    %c0_i32_0 = arith.constant 0 : i32
    %c0_i32_1 = arith.constant 0 : i32
    return %c0_i32, %c0_i32_0 : i32, i32
  }
  func.func @transform_2(%arg0: i32) -> (i32, i32) {
    %c0_i32 = arith.constant 0 : i32
    %c0_i32_0 = arith.constant 0 : i32
    %c0_i32_1 = arith.constant 0 : i32
    return %c0_i32, %c0_i32_0 : i32, i32
  }
  func.func @transform_3(%arg0: i32) -> (i32, i32) {
    %c0_i32 = arith.constant 0 : i32
    %c0_i32_0 = arith.constant 0 : i32
    %c0_i32_1 = arith.constant 0 : i32
    return %c0_i32, %c0_i32_0 : i32, i32
  }
  func.func @transform_4(%arg0: i32) -> (i32, i32) {
    %c0_i32 = arith.constant 0 : i32
    %c0_i32_0 = arith.constant 0 : i32
    %c0_i32_1 = arith.constant 0 : i32
    return %c0_i32, %c0_i32_0 : i32, i32
  }
  func.func @transform_5(%arg0: i32) -> (i32, i32) {
    %c0_i32 = arith.constant 0 : i32
    %c0_i32_0 = arith.constant 0 : i32
    return %arg0, %c0_i32 : i32, i32
  }
}

module attributes {stable_mosaic.version = 11 : i64} {
  func.func @_block_kernel(%arg0: i32, %arg1: memref<1x5x32xbf16, #tpu.memory_space<vmem>>, %arg2: memref<1x32xf32, #tpu.memory_space<vmem>>, %arg3: memref<1x32xf32, #tpu.memory_space<vmem>>, %arg4: memref<32x96xbf16, #tpu.memory_space<vmem>>, %arg5: memref<32x32xbf16, #tpu.memory_space<vmem>>, %arg6: memref<1x32xf32, #tpu.memory_space<vmem>>, %arg7: memref<1x32xf32, #tpu.memory_space<vmem>>, %arg8: memref<1x32xf32, #tpu.memory_space<vmem>>, %arg9: memref<32x128xbf16, #tpu.memory_space<vmem>>, %arg10: memref<1x128xf32, #tpu.memory_space<vmem>>, %arg11: memref<128x32xbf16, #tpu.memory_space<vmem>>, %arg12: memref<1x32xf32, #tpu.memory_space<vmem>>, %arg13: memref<1x5x32xbf16, #tpu.memory_space<vmem>>) attributes {dimension_semantics = [#tpu.dimension_semantics<parallel>], iteration_bounds = array<i64: 2>, scalar_prefetch = 0 : i64, scratch_operands = 0 : i64, tpu.core_type = #tpu.core_type<tc>, window_params = [{transform_indices = @transform_0, window_bounds = array<i64: 1, 5, 32>}, {pipeline_mode = #tpu.pipeline_mode<synchronous>, transform_indices = @transform_1, window_bounds = array<i64: 1, 32>}, {pipeline_mode = #tpu.pipeline_mode<synchronous>, transform_indices = @transform_2, window_bounds = array<i64: 1, 32>}, {pipeline_mode = #tpu.pipeline_mode<synchronous>, transform_indices = @transform_3, window_bounds = array<i64: 32, 96>}, {pipeline_mode = #tpu.pipeline_mode<synchronous>, transform_indices = @transform_4, window_bounds = array<i64: 32, 32>}, {pipeline_mode = #tpu.pipeline_mode<synchronous>, transform_indices = @transform_5, window_bounds = array<i64: 1, 32>}, {pipeline_mode = #tpu.pipeline_mode<synchronous>, transform_indices = @transform_6, window_bounds = array<i64: 1, 32>}, {pipeline_mode = #tpu.pipeline_mode<synchronous>, transform_indices = @transform_7, window_bounds = array<i64: 1, 32>}, {pipeline_mode = #tpu.pipeline_mode<synchronous>, transform_indices = @transform_8, window_bounds = array<i64: 32, 128>}, {pipeline_mode = #tpu.pipeline_mode<synchronous>, transform_indices = @transform_9, window_bounds = array<i64: 1, 128>}, {pipeline_mode = #tpu.pipeline_mode<synchronous>, transform_indices = @transform_10, window_bounds = array<i64: 128, 32>}, {pipeline_mode = #tpu.pipeline_mode<synchronous>, transform_indices = @transform_11, window_bounds = array<i64: 1, 32>}, {transform_indices = @transform_12, window_bounds = array<i64: 1, 5, 32>}]} {
    %c0 = arith.constant 0 : index
    %c0_0 = arith.constant 0 : index
    %c0_1 = arith.constant 0 : index
    %0 = vector.load %arg1[%c0, %c0_0, %c0_1] : memref<1x5x32xbf16, #tpu.memory_space<vmem>>, vector<1x5x32xbf16>
    %1 = vector.shape_cast %0 : vector<1x5x32xbf16> to vector<5x32xbf16>
    %2 = arith.extf %1 : vector<5x32xbf16> to vector<5x32xf32>
    %c0_2 = arith.constant 0 : index
    %c0_3 = arith.constant 0 : index
    %3 = vector.load %arg2[%c0_2, %c0_3] : memref<1x32xf32, #tpu.memory_space<vmem>>, vector<1x32xf32>
    %c0_4 = arith.constant 0 : index
    %c0_5 = arith.constant 0 : index
    %4 = vector.load %arg3[%c0_4, %c0_5] : memref<1x32xf32, #tpu.memory_space<vmem>>, vector<1x32xf32>
    %cst = arith.constant dense<0.000000e+00> : vector<5xf32>
    %5 = vector.multi_reduction <add>, %2, %cst [1] : vector<5x32xf32> to vector<5xf32>
    %6 = vector.shape_cast %5 : vector<5xf32> to vector<5x1xf32>
    %cst_6 = arith.constant 3.200000e+01 : f32
    %7 = vector.broadcast %cst_6 : f32 to vector<5x1xf32>
    %8 = arith.divf %6, %7 : vector<5x1xf32>
    %9 = vector.broadcast %8 : vector<5x1xf32> to vector<5x32xf32>
    %10 = arith.subf %2, %9 : vector<5x32xf32>
    %11 = arith.mulf %10, %10 : vector<5x32xf32>
    %cst_7 = arith.constant dense<0.000000e+00> : vector<5xf32>
    %12 = vector.multi_reduction <add>, %11, %cst_7 [1] : vector<5x32xf32> to vector<5xf32>
    %13 = vector.shape_cast %12 : vector<5xf32> to vector<5x1xf32>
    %cst_8 = arith.constant 3.200000e+01 : f32
    %14 = vector.broadcast %cst_8 : f32 to vector<5x1xf32>
    %15 = arith.divf %13, %14 : vector<5x1xf32>
    %16 = vector.broadcast %8 : vector<5x1xf32> to vector<5x32xf32>
    %17 = arith.subf %2, %16 : vector<5x32xf32>
    %cst_9 = arith.constant 9.99999974E-6 : f32
    %18 = vector.broadcast %cst_9 : f32 to vector<5x1xf32>
    %19 = arith.addf %15, %18 : vector<5x1xf32>
    %20 = math.rsqrt %19 : vector<5x1xf32>
    %21 = vector.broadcast %20 : vector<5x1xf32> to vector<5x32xf32>
    %22 = arith.mulf %17, %21 : vector<5x32xf32>
    %23 = vector.broadcast %3 : vector<1x32xf32> to vector<5x32xf32>
    %24 = arith.mulf %22, %23 : vector<5x32xf32>
    %25 = vector.broadcast %4 : vector<1x32xf32> to vector<5x32xf32>
    %26 = arith.addf %24, %25 : vector<5x32xf32>
    %27 = arith.truncf %26 : vector<5x32xf32> to vector<5x32xbf16>
    %c0_10 = arith.constant 0 : index
    %c0_11 = arith.constant 0 : index
    %28 = vector.load %arg4[%c0_10, %c0_11] : memref<32x96xbf16, #tpu.memory_space<vmem>>, vector<32x96xbf16>
    %cst_12 = arith.constant dense<0.000000e+00> : vector<5x96xf32>
    %29 = tpu.matmul %27, %28, %cst_12 {dimension_numbers = #tpu.dot_dimension_numbers<[1], [0], [0], [1], [0, 0, 1, 1], [], []>} : vector<5x32xbf16>, vector<32x96xbf16>, vector<5x96xf32> -> vector<5x96xf32>
    %30 = arith.truncf %29 : vector<5x96xf32> to vector<5x96xbf16>
    %31 = vector.extract_strided_slice %30 {offsets = [0, 0], sizes = [5, 8], strides = [1, 1]} : vector<5x96xbf16> to vector<5x8xbf16>
    %32 = vector.extract_strided_slice %30 {offsets = [0, 32], sizes = [5, 8], strides = [1, 1]} : vector<5x96xbf16> to vector<5x8xbf16>
    %33 = vector.extract_strided_slice %30 {offsets = [0, 64], sizes = [5, 8], strides = [1, 1]} : vector<5x96xbf16> to vector<5x8xbf16>
    %cst_13 = arith.constant dense<0.000000e+00> : vector<5x5xf32>
    %34 = tpu.matmul %31, %32, %cst_13 {dimension_numbers = #tpu.dot_dimension_numbers<[1], [1], [0], [0], [0, 0, 1, 0], [], []>} : vector<5x8xbf16>, vector<5x8xbf16>, vector<5x5xf32> -> vector<5x5xf32>
    %cst_14 = arith.constant dense<0xFF800000> : vector<5xf32>
    %35 = vector.multi_reduction <maximumf>, %34, %cst_14 [1] : vector<5x5xf32> to vector<5xf32>
    %36 = vector.shape_cast %35 : vector<5xf32> to vector<5x1xf32>
    %37 = vector.broadcast %36 : vector<5x1xf32> to vector<5x5xf32>
    %38 = arith.subf %34, %37 : vector<5x5xf32>
    %39 = math.exp %38 : vector<5x5xf32>
    %cst_15 = arith.constant dense<0.000000e+00> : vector<5xf32>
    %40 = vector.multi_reduction <add>, %39, %cst_15 [1] : vector<5x5xf32> to vector<5xf32>
    %41 = vector.shape_cast %40 : vector<5xf32> to vector<5x1xf32>
    %42 = tpu.reciprocal %41 {approx = true} : vector<5x1xf32> -> vector<5x1xf32>
    %43 = vector.broadcast %42 : vector<5x1xf32> to vector<5x5xf32>
    %44 = arith.mulf %39, %43 : vector<5x5xf32>
    %45 = arith.truncf %44 : vector<5x5xf32> to vector<5x5xbf16>
    %cst_16 = arith.constant dense<0.000000e+00> : vector<5x8xf32>
    %46 = tpu.matmul %45, %33, %cst_16 {dimension_numbers = #tpu.dot_dimension_numbers<[1], [0], [0], [1], [0, 0, 1, 1], [], []>} : vector<5x5xbf16>, vector<5x8xbf16>, vector<5x8xf32> -> vector<5x8xf32>
    %47 = vector.extract_strided_slice %30 {offsets = [0, 8], sizes = [5, 8], strides = [1, 1]} : vector<5x96xbf16> to vector<5x8xbf16>
    %48 = vector.extract_strided_slice %30 {offsets = [0, 40], sizes = [5, 8], strides = [1, 1]} : vector<5x96xbf16> to vector<5x8xbf16>
    %49 = vector.extract_strided_slice %30 {offsets = [0, 72], sizes = [5, 8], strides = [1, 1]} : vector<5x96xbf16> to vector<5x8xbf16>
    %cst_17 = arith.constant dense<0.000000e+00> : vector<5x5xf32>
    %50 = tpu.matmul %47, %48, %cst_17 {dimension_numbers = #tpu.dot_dimension_numbers<[1], [1], [0], [0], [0, 0, 1, 0], [], []>} : vector<5x8xbf16>, vector<5x8xbf16>, vector<5x5xf32> -> vector<5x5xf32>
    %cst_18 = arith.constant dense<0xFF800000> : vector<5xf32>
    %51 = vector.multi_reduction <maximumf>, %50, %cst_18 [1] : vector<5x5xf32> to vector<5xf32>
    %52 = vector.shape_cast %51 : vector<5xf32> to vector<5x1xf32>
    %53 = vector.broadcast %52 : vector<5x1xf32> to vector<5x5xf32>
    %54 = arith.subf %50, %53 : vector<5x5xf32>
    %55 = math.exp %54 : vector<5x5xf32>
    %cst_19 = arith.constant dense<0.000000e+00> : vector<5xf32>
    %56 = vector.multi_reduction <add>, %55, %cst_19 [1] : vector<5x5xf32> to vector<5xf32>
    %57 = vector.shape_cast %56 : vector<5xf32> to vector<5x1xf32>
    %58 = tpu.reciprocal %57 {approx = true} : vector<5x1xf32> -> vector<5x1xf32>
    %59 = vector.broadcast %58 : vector<5x1xf32> to vector<5x5xf32>
    %60 = arith.mulf %55, %59 : vector<5x5xf32>
    %61 = arith.truncf %60 : vector<5x5xf32> to vector<5x5xbf16>
    %cst_20 = arith.constant dense<0.000000e+00> : vector<5x8xf32>
    %62 = tpu.matmul %61, %49, %cst_20 {dimension_numbers = #tpu.dot_dimension_numbers<[1], [0], [0], [1], [0, 0, 1, 1], [], []>} : vector<5x5xbf16>, vector<5x8xbf16>, vector<5x8xf32> -> vector<5x8xf32>
    %63 = vector.extract_strided_slice %30 {offsets = [0, 16], sizes = [5, 8], strides = [1, 1]} : vector<5x96xbf16> to vector<5x8xbf16>
    %64 = vector.extract_strided_slice %30 {offsets = [0, 48], sizes = [5, 8], strides = [1, 1]} : vector<5x96xbf16> to vector<5x8xbf16>
    %65 = vector.extract_strided_slice %30 {offsets = [0, 80], sizes = [5, 8], strides = [1, 1]} : vector<5x96xbf16> to vector<5x8xbf16>
    %cst_21 = arith.constant dense<0.000000e+00> : vector<5x5xf32>
    %66 = tpu.matmul %63, %64, %cst_21 {dimension_numbers = #tpu.dot_dimension_numbers<[1], [1], [0], [0], [0, 0, 1, 0], [], []>} : vector<5x8xbf16>, vector<5x8xbf16>, vector<5x5xf32> -> vector<5x5xf32>
    %cst_22 = arith.constant dense<0xFF800000> : vector<5xf32>
    %67 = vector.multi_reduction <maximumf>, %66, %cst_22 [1] : vector<5x5xf32> to vector<5xf32>
    %68 = vector.shape_cast %67 : vector<5xf32> to vector<5x1xf32>
    %69 = vector.broadcast %68 : vector<5x1xf32> to vector<5x5xf32>
    %70 = arith.subf %66, %69 : vector<5x5xf32>
    %71 = math.exp %70 : vector<5x5xf32>
    %cst_23 = arith.constant dense<0.000000e+00> : vector<5xf32>
    %72 = vector.multi_reduction <add>, %71, %cst_23 [1] : vector<5x5xf32> to vector<5xf32>
    %73 = vector.shape_cast %72 : vector<5xf32> to vector<5x1xf32>
    %74 = tpu.reciprocal %73 {approx = true} : vector<5x1xf32> -> vector<5x1xf32>
    %75 = vector.broadcast %74 : vector<5x1xf32> to vector<5x5xf32>
    %76 = arith.mulf %71, %75 : vector<5x5xf32>
    %77 = arith.truncf %76 : vector<5x5xf32> to vector<5x5xbf16>
    %cst_24 = arith.constant dense<0.000000e+00> : vector<5x8xf32>
    %78 = tpu.matmul %77, %65, %cst_24 {dimension_numbers = #tpu.dot_dimension_numbers<[1], [0], [0], [1], [0, 0, 1, 1], [], []>} : vector<5x5xbf16>, vector<5x8xbf16>, vector<5x8xf32> -> vector<5x8xf32>
    %79 = vector.extract_strided_slice %30 {offsets = [0, 24], sizes = [5, 8], strides = [1, 1]} : vector<5x96xbf16> to vector<5x8xbf16>
    %80 = vector.extract_strided_slice %30 {offsets = [0, 56], sizes = [5, 8], strides = [1, 1]} : vector<5x96xbf16> to vector<5x8xbf16>
    %81 = vector.extract_strided_slice %30 {offsets = [0, 88], sizes = [5, 8], strides = [1, 1]} : vector<5x96xbf16> to vector<5x8xbf16>
    %cst_25 = arith.constant dense<0.000000e+00> : vector<5x5xf32>
    %82 = tpu.matmul %79, %80, %cst_25 {dimension_numbers = #tpu.dot_dimension_numbers<[1], [1], [0], [0], [0, 0, 1, 0], [], []>} : vector<5x8xbf16>, vector<5x8xbf16>, vector<5x5xf32> -> vector<5x5xf32>
    %cst_26 = arith.constant dense<0xFF800000> : vector<5xf32>
    %83 = vector.multi_reduction <maximumf>, %82, %cst_26 [1] : vector<5x5xf32> to vector<5xf32>
    %84 = vector.shape_cast %83 : vector<5xf32> to vector<5x1xf32>
    %85 = vector.broadcast %84 : vector<5x1xf32> to vector<5x5xf32>
    %86 = arith.subf %82, %85 : vector<5x5xf32>
    %87 = math.exp %86 : vector<5x5xf32>
    %cst_27 = arith.constant dense<0.000000e+00> : vector<5xf32>
    %88 = vector.multi_reduction <add>, %87, %cst_27 [1] : vector<5x5xf32> to vector<5xf32>
    %89 = vector.shape_cast %88 : vector<5xf32> to vector<5x1xf32>
    %90 = tpu.reciprocal %89 {approx = true} : vector<5x1xf32> -> vector<5x1xf32>
    %91 = vector.broadcast %90 : vector<5x1xf32> to vector<5x5xf32>
    %92 = arith.mulf %87, %91 : vector<5x5xf32>
    %93 = arith.truncf %92 : vector<5x5xf32> to vector<5x5xbf16>
    %cst_28 = arith.constant dense<0.000000e+00> : vector<5x8xf32>
    %94 = tpu.matmul %93, %81, %cst_28 {dimension_numbers = #tpu.dot_dimension_numbers<[1], [0], [0], [1], [0, 0, 1, 1], [], []>} : vector<5x5xbf16>, vector<5x8xbf16>, vector<5x8xf32> -> vector<5x8xf32>
    %95 = tpu.concatenate %46, %62, %78, %94 in 1 : vector<5x8xf32>, vector<5x8xf32>, vector<5x8xf32>, vector<5x8xf32> -> vector<5x32xf32>
    %96 = arith.truncf %95 : vector<5x32xf32> to vector<5x32xbf16>
    %c0_29 = arith.constant 0 : index
    %c0_30 = arith.constant 0 : index
    %97 = vector.load %arg5[%c0_29, %c0_30] : memref<32x32xbf16, #tpu.memory_space<vmem>>, vector<32x32xbf16>
    %cst_31 = arith.constant dense<0.000000e+00> : vector<5x32xf32>
    %98 = tpu.matmul %96, %97, %cst_31 {dimension_numbers = #tpu.dot_dimension_numbers<[1], [0], [0], [1], [0, 0, 1, 1], [], []>} : vector<5x32xbf16>, vector<32x32xbf16>, vector<5x32xf32> -> vector<5x32xf32>
    %99 = arith.addf %2, %98 : vector<5x32xf32>
    %c0_32 = arith.constant 0 : index
    %c0_33 = arith.constant 0 : index
    %100 = vector.load %arg6[%c0_32, %c0_33] : memref<1x32xf32, #tpu.memory_space<vmem>>, vector<1x32xf32>
    %101 = vector.broadcast %100 : vector<1x32xf32> to vector<5x32xf32>
    %102 = arith.addf %99, %101 : vector<5x32xf32>
    %c0_34 = arith.constant 0 : index
    %c0_35 = arith.constant 0 : index
    %103 = vector.load %arg7[%c0_34, %c0_35] : memref<1x32xf32, #tpu.memory_space<vmem>>, vector<1x32xf32>
    %c0_36 = arith.constant 0 : index
    %c0_37 = arith.constant 0 : index
    %104 = vector.load %arg8[%c0_36, %c0_37] : memref<1x32xf32, #tpu.memory_space<vmem>>, vector<1x32xf32>
    %cst_38 = arith.constant dense<0.000000e+00> : vector<5xf32>
    %105 = vector.multi_reduction <add>, %102, %cst_38 [1] : vector<5x32xf32> to vector<5xf32>
    %106 = vector.shape_cast %105 : vector<5xf32> to vector<5x1xf32>
    %cst_39 = arith.constant 3.200000e+01 : f32
    %107 = vector.broadcast %cst_39 : f32 to vector<5x1xf32>
    %108 = arith.divf %106, %107 : vector<5x1xf32>
    %109 = vector.broadcast %108 : vector<5x1xf32> to vector<5x32xf32>
    %110 = arith.subf %102, %109 : vector<5x32xf32>
    %111 = arith.mulf %110, %110 : vector<5x32xf32>
    %cst_40 = arith.constant dense<0.000000e+00> : vector<5xf32>
    %112 = vector.multi_reduction <add>, %111, %cst_40 [1] : vector<5x32xf32> to vector<5xf32>
    %113 = vector.shape_cast %112 : vector<5xf32> to vector<5x1xf32>
    %cst_41 = arith.constant 3.200000e+01 : f32
    %114 = vector.broadcast %cst_41 : f32 to vector<5x1xf32>
    %115 = arith.divf %113, %114 : vector<5x1xf32>
    %116 = vector.broadcast %108 : vector<5x1xf32> to vector<5x32xf32>
    %117 = arith.subf %102, %116 : vector<5x32xf32>
    %cst_42 = arith.constant 9.99999974E-6 : f32
    %118 = vector.broadcast %cst_42 : f32 to vector<5x1xf32>
    %119 = arith.addf %115, %118 : vector<5x1xf32>
    %120 = math.rsqrt %119 : vector<5x1xf32>
    %121 = vector.broadcast %120 : vector<5x1xf32> to vector<5x32xf32>
    %122 = arith.mulf %117, %121 : vector<5x32xf32>
    %123 = vector.broadcast %103 : vector<1x32xf32> to vector<5x32xf32>
    %124 = arith.mulf %122, %123 : vector<5x32xf32>
    %125 = vector.broadcast %104 : vector<1x32xf32> to vector<5x32xf32>
    %126 = arith.addf %124, %125 : vector<5x32xf32>
    %127 = arith.truncf %126 : vector<5x32xf32> to vector<5x32xbf16>
    %c0_43 = arith.constant 0 : index
    %c0_44 = arith.constant 0 : index
    %128 = vector.load %arg9[%c0_43, %c0_44] : memref<32x128xbf16, #tpu.memory_space<vmem>>, vector<32x128xbf16>
    %cst_45 = arith.constant dense<0.000000e+00> : vector<5x128xf32>
    %129 = tpu.matmul %127, %128, %cst_45 {dimension_numbers = #tpu.dot_dimension_numbers<[1], [0], [0], [1], [0, 0, 1, 1], [], []>} : vector<5x32xbf16>, vector<32x128xbf16>, vector<5x128xf32> -> vector<5x128xf32>
    %c0_46 = arith.constant 0 : index
    %c0_47 = arith.constant 0 : index
    %130 = vector.load %arg10[%c0_46, %c0_47] : memref<1x128xf32, #tpu.memory_space<vmem>>, vector<1x128xf32>
    %131 = vector.broadcast %130 : vector<1x128xf32> to vector<5x128xf32>
    %132 = arith.addf %129, %131 : vector<5x128xf32>
    %cst_48 = arith.constant 5.000000e-01 : f32
    %133 = vector.broadcast %cst_48 : f32 to vector<5x128xf32>
    %134 = arith.mulf %133, %132 : vector<5x128xf32>
    %cst_49 = arith.constant 4.471500e-02 : f32
    %135 = vector.broadcast %cst_49 : f32 to vector<5x128xf32>
    %136 = arith.mulf %135, %132 : vector<5x128xf32>
    %137 = arith.mulf %136, %132 : vector<5x128xf32>
    %138 = arith.mulf %137, %132 : vector<5x128xf32>
    %139 = arith.addf %132, %138 : vector<5x128xf32>
    %cst_50 = arith.constant 0.797884583 : f32
    %140 = vector.broadcast %cst_50 : f32 to vector<5x128xf32>
    %141 = arith.mulf %140, %139 : vector<5x128xf32>
    %142 = math.tanh %141 : vector<5x128xf32>
    %cst_51 = arith.constant 1.000000e+00 : f32
    %143 = vector.broadcast %cst_51 : f32 to vector<5x128xf32>
    %144 = arith.addf %143, %142 : vector<5x128xf32>
    %145 = arith.mulf %134, %144 : vector<5x128xf32>
    %146 = arith.truncf %145 : vector<5x128xf32> to vector<5x128xbf16>
    %c0_52 = arith.constant 0 : index
    %c0_53 = arith.constant 0 : index
    %147 = vector.load %arg11[%c0_52, %c0_53] : memref<128x32xbf16, #tpu.memory_space<vmem>>, vector<128x32xbf16>
    %cst_54 = arith.constant dense<0.000000e+00> : vector<5x32xf32>
    %148 = tpu.matmul %146, %147, %cst_54 {dimension_numbers = #tpu.dot_dimension_numbers<[1], [0], [0], [1], [0, 0, 1, 1], [], []>} : vector<5x128xbf16>, vector<128x32xbf16>, vector<5x32xf32> -> vector<5x32xf32>
    %c0_55 = arith.constant 0 : index
    %c0_56 = arith.constant 0 : index
    %149 = vector.load %arg12[%c0_55, %c0_56] : memref<1x32xf32, #tpu.memory_space<vmem>>, vector<1x32xf32>
    %150 = vector.broadcast %149 : vector<1x32xf32> to vector<5x32xf32>
    %151 = arith.addf %148, %150 : vector<5x32xf32>
    %152 = arith.addf %102, %151 : vector<5x32xf32>
    %153 = arith.truncf %152 : vector<5x32xf32> to vector<5x32xbf16>
    %c0_57 = arith.constant 0 : index
    %c0_58 = arith.constant 0 : index
    %c0_59 = arith.constant 0 : index
    %154 = vector.load %arg13[%c0_57, %c0_58, %c0_59] : memref<1x5x32xbf16, #tpu.memory_space<vmem>>, vector<1x5x32xbf16>
    %155 = vector.shape_cast %154 : vector<1x5x32xbf16> to vector<5x32xbf16>
    %156 = vector.shape_cast %153 : vector<5x32xbf16> to vector<1x5x32xbf16>
    tpu.vector_store %arg13[%c0_57, %c0_58, %c0_59], %156 {strides = array<i32>} : memref<1x5x32xbf16, #tpu.memory_space<vmem>>, vector<1x5x32xbf16>,
    return
  }
  func.func @transform_0(%arg0: i32) -> (i32, i32, i32) {
    %c0_i32 = arith.constant 0 : i32
    %c0_i32_0 = arith.constant 0 : i32
    %c0_i32_1 = arith.constant 0 : i32
    return %arg0, %c0_i32, %c0_i32_0 : i32, i32, i32
  }
  func.func @transform_1(%arg0: i32) -> (i32, i32) {
    %c0_i32 = arith.constant 0 : i32
    %c0_i32_0 = arith.constant 0 : i32
    %c0_i32_1 = arith.constant 0 : i32
    return %c0_i32, %c0_i32_0 : i32, i32
  }
  func.func @transform_2(%arg0: i32) -> (i32, i32) {
    %c0_i32 = arith.constant 0 : i32
    %c0_i32_0 = arith.constant 0 : i32
    %c0_i32_1 = arith.constant 0 : i32
    return %c0_i32, %c0_i32_0 : i32, i32
  }
  func.func @transform_3(%arg0: i32) -> (i32, i32) {
    %c0_i32 = arith.constant 0 : i32
    %c0_i32_0 = arith.constant 0 : i32
    %c0_i32_1 = arith.constant 0 : i32
    return %c0_i32, %c0_i32_0 : i32, i32
  }
  func.func @transform_4(%arg0: i32) -> (i32, i32) {
    %c0_i32 = arith.constant 0 : i32
    %c0_i32_0 = arith.constant 0 : i32
    %c0_i32_1 = arith.constant 0 : i32
    return %c0_i32, %c0_i32_0 : i32, i32
  }
  func.func @transform_5(%arg0: i32) -> (i32, i32) {
    %c0_i32 = arith.constant 0 : i32
    %c0_i32_0 = arith.constant 0 : i32
    %c0_i32_1 = arith.constant 0 : i32
    return %c0_i32, %c0_i32_0 : i32, i32
  }
  func.func @transform_6(%arg0: i32) -> (i32, i32) {
    %c0_i32 = arith.constant 0 : i32
    %c0_i32_0 = arith.constant 0 : i32
    %c0_i32_1 = arith.constant 0 : i32
    return %c0_i32, %c0_i32_0 : i32, i32
  }
  func.func @transform_7(%arg0: i32) -> (i32, i32) {
    %c0_i32 = arith.constant 0 : i32
    %c0_i32_0 = arith.constant 0 : i32
    %c0_i32_1 = arith.constant 0 : i32
    return %c0_i32, %c0_i32_0 : i32, i32
  }
  func.func @transform_8(%arg0: i32) -> (i32, i32) {
    %c0_i32 = arith.constant 0 : i32
    %c0_i32_0 = arith.constant 0 : i32
    %c0_i32_1 = arith.constant 0 : i32
    return %c0_i32, %c0_i32_0 : i32, i32
  }
  func.func @transform_9(%arg0: i32) -> (i32, i32) {
    %c0_i32 = arith.constant 0 : i32
    %c0_i32_0 = arith.constant 0 : i32
    %c0_i32_1 = arith.constant 0 : i32
    return %c0_i32, %c0_i32_0 : i32, i32
  }
  func.func @transform_10(%arg0: i32) -> (i32, i32) {
    %c0_i32 = arith.constant 0 : i32
    %c0_i32_0 = arith.constant 0 : i32
    %c0_i32_1 = arith.constant 0 : i32
    return %c0_i32, %c0_i32_0 : i32, i32
  }
  func.func @transform_11(%arg0: i32) -> (i32, i32) {
    %c0_i32 = arith.constant 0 : i32
    %c0_i32_0 = arith.constant 0 : i32
    %c0_i32_1 = arith.constant 0 : i32
    return %c0_i32, %c0_i32_0 : i32, i32
  }
  func.func @transform_12(%arg0: i32) -> (i32, i32, i32) {
    %c0_i32 = arith.constant 0 : i32
    %c0_i32_0 = arith.constant 0 : i32
    %c0_i32_1 = arith.constant 0 : i32
    return %arg0, %c0_i32, %c0_i32_0 : i32, i32, i32
  }
}

</mosaic_0001>

<bundles_post_ra>
// kernel: _lambda_.6
= control target key start
LH: loop header
LB: loop body
LE: loop exit
PB: predicated region body
PF: predicated region fallthrough
CT: control target
= control target key end

     0   :  { %s2623_s29 = smov 0   ;;  %s3245_s0 = inlined_call_operand.vmem [shape: f32[2,64,147], index: 0, kind: input, shape index: {}]   ;;  %s3246_s1 = inlined_call_operand.vmem [shape: f32[1,147], index: 1, kind: input, shape index: {}]   ;;  %s3247_s2 = inlined_call_operand.vmem [shape: f32[1,147], index: 2, kind: input, shape index: {}]   ;;  %s3248_s3 = inlined_call_operand.vmem [shape: bf16[147,48], index: 3, kind: input, shape index: {}]   ;;  %s3249_s4 = inlined_call_operand.vmem [shape: f32[1,48], index: 4, kind: input, shape index: {}]   ;;  %s3250_s5 = inlined_call_operand.vmem [shape: bf16[8,16], index: 5, kind: input, shape index: {}]   ;;  %s3251_s6 = inlined_call_operand.vmem [shape: bf16[16,16], index: 6, kind: input, shape index: {}]   ;;  %s3252_s7 = inlined_call_operand.vmem [shape: f32[1,16], index: 7, kind: input, shape index: {}, may-alias: {7,9,11,13}]   ;;  %s3253_s8 = inlined_call_operand.vmem [shape: f32[1,16], index: 8, kind: input, shape index: {}]   ;;  %s3254_s9 = inlined_call_operand.vmem [shape: f32[1,16], index: 9, kind: input, shape index: {}, may-alias: {7,9,11,13}]   ;;  %s3255_s10 = inlined_call_operand.vmem [shape: bf16[16,16], index: 10, kind: input, shape index: {}]   ;;  %s3256_s11 = inlined_call_operand.vmem [shape: f32[1,16], index: 11, kind: input, shape index: {}, may-alias: {7,9,11,13}]   ;;  %s3257_s12 = inlined_call_operand.vmem [shape: bf16[16,16], index: 12, kind: input, shape index: {}]   ;;  %s3258_s13 = inlined_call_operand.vmem [shape: f32[1,16], index: 13, kind: input, shape index: {}, may-alias: {7,9,11,13}]   ;;  %s3259_s14 = inlined_call_operand.vmem [shape: bf16[2,64,16], index: 14, kind: output, shape index: {}]  }
   0x1 LB: > { %s2222_s30 = sadd.s32 4294967295, %s2539_s29   ;;  %p2226_p0 = scmp.ge.s32.totalorder %s2539_s29, 1  ;;  %s2539_s29 = sphi %s2623_s29, %s24_s29  }
   0x2   : > { %p412_p1 = scmp.lt.s32.totalorder %s2539_s29, 3 }
   0x4   : > { %p413_p2 = pnand %p2226_p0, %p412_p1 }
   0x5   : > { %p458_p3 = scmp.lt.s32.totalorder (!%p413_p2), %s2222_s30, 1  ;;  %vm487_vm0 = vcmask (!%p413_p2), 154624   ;;  %v2424_v32 = vld [vmem:[%s3248_s3] sm:$0xff] (!%p413_p2)   ;;  %v2541_v33 = vmov (!%p413_p2), 0   ;;  %v2425_v34 = vld [vmem:[%s3248_s3 + $0x8] sm:$0xff] (!%p413_p2)   ;;  %v2426_v35 = vld [vmem:[%s3248_s3 + $0x10] sm:$0xff] (!%p413_p2)  }
   0x6   : > { %416 = sbr.rel (%p413_p2) target bundleno = 3019 (0xbcb), region = 76  ;;  %797 = vmatprep.subr.bf16.mxu0 (!%p413_p2), %v2541_v33  ;;  %vm790_vm1 = vcmask (!%p413_p2), 1040384   ;;  %vm791_vm2 = vcmask (!%p413_p2), 1041408   ;;  %vm867_vm3 = vcmask (!%p413_p2), 130048   ;;  %s2543_s19 = smov (!%p413_p2), 112   ;;  %vm1205_vm4 = vcmask (!%p413_p2), 64512  }
   0x7   : > { %798 = vmatpush1.bf16.msra.mxu0 (!%p413_p2), %v2424_v32  ;;  %s2544_s20 = smov (!%p413_p2), 96   ;;  %vm2546_vm5 = vmmov (!%p413_p2), 0   ;;  %vm1291_vm6 = vcmask (!%p413_p2), 523264   ;;  %s2547_s23 = smov (!%p413_p2), 32   ;;  %vm2158_vm7 = vcmask (!%p413_p2), 125952  }
   0x8   : > { %799 = vmatprep.subr.bf16.mxu0 (!%p413_p2), %v2541_v33 }
   0xb   : > { %800 = vmatpush1.bf16.msra.mxu0 (!%p413_p2), %v2425_v34 }
   0xc   : > { %801 = vmatprep.subr.bf16.mxu0 (!%p413_p2), %v2541_v33 }
   0xd   : > { %s3261_s30 = smov (!%p458_p3, %s2222_s30), 1 }
   0xe   : > { %s2289_s15 = sshll.u32 %s3261_s30, 7 }
   0xf   : > { %s2637_s18 = scalar_lea.vmem %s3245_s0, %s2289_s15  ;;  %802 = vmatpush1.bf16.msra.mxu0 %v2426_v35 }
  0x10   : > { %v469_v0 = vld [vmem:[%s2637_s18] sm:$0xff]  ;;  %v470_v1 = vld [vmem:[%s2637_s18 + $0x8] sm:$0xff]  ;;  %v471_v5 = vld [vmem:[%s2637_s18 + $0x10] sm:$0xff]  ;;  %803 = vmatprep.subr.bf16.mxu0 %v2541_v33 }
  0x11   : > { %v473_v2 = vld [vmem:[%s2637_s18 + $0x20] sm:$0xff]  ;;  %v488_v3 = vsel %vm487_vm0, %v470_v1, 0.0  ;;  %v474_v4 = vld [vmem:[%s2637_s18 + $0x28] sm:$0xff]  ;;  %v472_v6 = vld [vmem:[%s2637_s18 + $0x18] sm:$0xff] }
  0x12   : > { %v489_v7 = vadd.f32 %v488_v3, %v469_v0  ;;  %v496_v8 = vsel %vm487_vm0, %v474_v4, 0.0  ;;  %v492_v9 = vsel %vm487_vm0, %v472_v6, 0.0  ;;  %v475_v10 = vld [vmem:[%s2637_s18 + $0x30] sm:$0xff]  ;;  %v476_v11 = vld [vmem:[%s2637_s18 + $0x38] sm:$0xff]  ;;  %v2652_v14 = vld [vmem:[%s2637_s18 + $0x48] sm:$0xff] }
  0x13   : > { %v497_v12 = vadd.f32 %v496_v8, %v473_v2  ;;  %v500_v13 = vsel %vm487_vm0, %v476_v11, 0.0  ;;  %v2655_v15 = vld [vmem:[%s2637_s18 + $0x58] sm:$0xff]  ;;  %v493_v16 = vadd.f32 %v492_v9, %v471_v5  ;;  %v2658_v17 = vld [vmem:[%s2637_s18 + $0x40] sm:$0xff]  ;;  %v2661_v18 = vld [vmem:[%s2637_s18 + $0x50] sm:$0xff]  ;;  %v504_v20 = vsel %vm487_vm0, %v2652_v14, 0.0 }
  0x14   : > { %490 = vadd.xlane.f32.xlu0 %v489_v7  ;;  %v501_v19 = vadd.f32 %v500_v13, %v475_v10  ;;  %v2666_v21 = vld [vmem:[%s2637_s18 + $0x68] sm:$0xff]  ;;  %v508_v22 = vsel %vm487_vm0, %v2655_v15, 0.0  ;;  %v2671_v23 = vld [vmem:[%s2637_s18 + $0x78] sm:$0xff]  ;;  %v505_v24 = vadd.f32 %v504_v20, %v2658_v17  ;;  %v2676_v26 = vld [vmem:[%s2637_s18 + $0x60] sm:$0xff] }
  0x15   : > { %498 = vadd.xlane.f32.xlu1 %v497_v12  ;;  %v509_v25 = vadd.f32 %v508_v22, %v2661_v18  ;;  %v512_v27 = vsel %vm487_vm0, %v2666_v21, 0.0  ;;  %v2681_v28 = vld [vmem:[%s2637_s18 + $0x70] sm:$0xff]  ;;  %v516_v29 = vsel %vm487_vm0, %v2671_v23, 0.0 }
  0x16   : > { %v513_v30 = vadd.f32 %v512_v27, %v2676_v26  ;;  %v517_v31 = vadd.f32 %v516_v29, %v2681_v28 }
  0x18   : > { %494 = vadd.xlane.f32.xlu0 %v493_v16 }
  0x19   : > { %502 = vadd.xlane.f32.xlu1 %v501_v19 }
  0x1c   : > { %506 = vadd.xlane.f32.xlu0 %v505_v24 }
  0x1d   : > { %510 = vadd.xlane.f32.xlu1 %v509_v25 }
  0x20   : > { %514 = vadd.xlane.f32.xlu0 %v513_v30 }
  0x21   : > { %518 = vadd.xlane.f32.xlu1 %v517_v31 }
  0xa1   : > { %v491_v36 = vpop.xlane.xlu0 %490 }
  0xa2   : > { %v521_v37 = vmul.f32 0.006802721, %v491_v36  ;;  %v499_v38 = vpop.xlane.xlu1 %498 }
  0xa3   : > { %v523_v39 = vmul.f32 0.006802721, %v499_v38  ;;  %v2428_v38 = vld [vmem:[%s3248_s3 + $0x20] sm:$0xff]  }
  0xa4   : > { %v2700_v40 = vsub.f32 %v469_v0, %v521_v37  ;;  %v2702_v41 = vsub.f32 %v470_v1, %v521_v37  ;;  %v2427_v37 = vld [vmem:[%s3248_s3 + $0x18] sm:$0xff]  }
  0xa5   : > { %v2704_v42 = vsub.f32 %v473_v2, %v523_v39  ;;  %v2706_v43 = vsub.f32 %v474_v4, %v523_v39  ;;  %v495_v44 = vpop.xlane.xlu0 %494  ;;  %804 = vmatpush1.bf16.msra.mxu0 %v2427_v37  ;;  %v2429_v39 = vld [vmem:[%s3248_s3 + $0x28] sm:$0xff]  }
  0xa6   : > { %v522_v45 = vmul.f32 0.006802721, %v495_v44  ;;  %v503_v46 = vpop.xlane.xlu1 %502  ;;  %v545_v47 = vmul.f32 %v2700_v40, %v2700_v40  ;;  %v546_v48 = vmul.f32 %v2702_v41, %v2702_v41  ;;  %805 = vmatprep.subr.bf16.mxu0 %v2541_v33  ;;  %v2430_v44 = vld [vmem:[%s3248_s3 + $0x30] sm:$0xff]  }
  0xa7   : > { %v524_v49 = vmul.f32 0.006802721, %v503_v46  ;;  %v549_v50 = vmul.f32 %v2704_v42, %v2704_v42  ;;  %v550_v51 = vmul.f32 %v2706_v43, %v2706_v43  ;;  %v2432_v46 = vld [vmem:[%s3248_s3 + $0x40] sm:$0xff]  }
  0xa8   : > { %v2716_v52 = vsub.f32 %v471_v5, %v522_v45  ;;  %v2718_v53 = vsub.f32 %v472_v6, %v522_v45  ;;  %v561_v54 = vsel %vm487_vm0, %v546_v48, 0.0  ;;  %v2431_v45 = vld [vmem:[%s3248_s3 + $0x38] sm:$0xff]   ;;  %v2542_v48 = vmov 65535  }
  0xa9   : > { %v2721_v55 = vsub.f32 %v475_v10, %v524_v49  ;;  %v2723_v56 = vsub.f32 %v476_v11, %v524_v49  ;;  %v507_v57 = vpop.xlane.xlu0 %506  ;;  %v562_v58 = vadd.f32 %v561_v54, %v545_v47  ;;  %v569_v59 = vsel %vm487_vm0, %v550_v51, 0.0  ;;  %806 = vmatpush1.bf16.msra.mxu0 %v2428_v38  ;;  %v2433_v47 = vld [vmem:[%s3248_s3 + $0x48] ss:$0 sps:$4 sm:$0x33]  }
  0xaa   : > { %v525_v60 = vmul.f32 0.006802721, %v507_v57  ;;  %v511_v61 = vpop.xlane.xlu1 %510  ;;  %v547_v62 = vmul.f32 %v2716_v52, %v2716_v52  ;;  %v548_v63 = vmul.f32 %v2718_v53, %v2718_v53  ;;  %v570_v1 = vadd.f32 %v569_v59, %v549_v50  ;;  %807 = vmatprep.subr.bf16.mxu0 %v2541_v33 }
  0xab   : > { %563 = vadd.xlane.f32.xlu0 %v562_v58  ;;  %v526_v0 = vmul.f32 0.006802721, %v511_v61  ;;  %v551_v2 = vmul.f32 %v2721_v55, %v2721_v55  ;;  %v552_v3 = vmul.f32 %v2723_v56, %v2723_v56  ;;  %v792_v49 = vsel %vm790_vm1, 4294967295, %v2542_v48 }
  0xac   : > { %v2735_v4 = vsub.f32 %v2658_v17, %v525_v60  ;;  %v2738_v5 = vsub.f32 %v2652_v14, %v525_v60  ;;  %v565_v6 = vsel %vm487_vm0, %v548_v63, 0.0  ;;  %v793_v50 = vsel %vm791_vm2, %v792_v49, 0 }
  0xad   : > { %v2742_v7 = vsub.f32 %v2661_v18, %v526_v0  ;;  %v2745_v8 = vsub.f32 %v2655_v15, %v526_v0  ;;  %v515_v9 = vpop.xlane.xlu0 %514  ;;  %v566_v10 = vadd.f32 %v565_v6, %v547_v62  ;;  %v573_v11 = vsel %vm487_vm0, %v552_v3, 0.0  ;;  %808 = vmatpush1.bf16.msra.mxu0 %v2429_v39 }
  0xae   : > { %v527_v12 = vmul.f32 0.006802721, %v515_v9  ;;  %v519_v13 = vpop.xlane.xlu1 %518  ;;  %v553_v16 = vmul.f32 %v2735_v4, %v2735_v4  ;;  %v554_v14 = vmul.f32 %v2738_v5, %v2738_v5  ;;  %v574_v18 = vadd.f32 %v573_v11, %v551_v2  ;;  %809 = vmatprep.subr.bf16.mxu0 %v2541_v33 }
  0xaf   : > { %571 = vadd.xlane.f32.xlu0 %v570_v1  ;;  %567 = vadd.xlane.f32.xlu1 %v566_v10  ;;  %v528_v17 = vmul.f32 0.006802721, %v519_v13  ;;  %v555_v15 = vmul.f32 %v2742_v7, %v2742_v7  ;;  %v556_v19 = vmul.f32 %v2745_v8, %v2745_v8  ;;  %v795_v51 = vand.u32 %v2433_v47, %v793_v50 }
  0xb0   : > { %v2757_v20 = vsub.f32 %v2676_v26, %v527_v12  ;;  %v2760_v22 = vsub.f32 %v2666_v21, %v527_v12  ;;  %v577_v24 = vsel %vm487_vm0, %v554_v14, 0.0  ;;  %v634_v59 = vlaneseq }
  0xb1   : > { %v2764_v25 = vsub.f32 %v2681_v28, %v528_v17  ;;  %v2767_v27 = vsub.f32 %v2671_v23, %v528_v17  ;;  %v578_v29 = vadd.f32 %v577_v24, %v553_v16  ;;  %v581_v30 = vsel %vm487_vm0, %v556_v19, 0.0  ;;  %810 = vmatpush1.bf16.msra.mxu0 %v2430_v44  ;;  %v485_v17 = vld [vmem:[%s3246_s1] sm:$0x3] }
  0xb2   : > { %v557_v31 = vmul.f32 %v2757_v20, %v2757_v20  ;;  %v558_v26 = vmul.f32 %v2760_v22, %v2760_v22  ;;  %v582_v21 = vadd.f32 %v581_v30, %v555_v15  ;;  %811 = vmatprep.subr.bf16.mxu0 %v2541_v33  ;;  %v635_v2 = vshrl.u32 %v634_v59, 7 }
  0xb3   : > { %575 = vadd.xlane.f32.xlu1 %v574_v18  ;;  %579 = vadd.xlane.f32.xlu0 %v578_v29  ;;  %v559_v32 = vmul.f32 %v2764_v25, %v2764_v25  ;;  %v560_v28 = vmul.f32 %v2767_v27, %v2767_v27  ;;  %v486_v29 = vld [vmem:[%s3247_s2] sm:$0x3] }
  0xb4   : > { %v585_v23 = vsel %vm487_vm0, %v558_v26, 0.0  ;;  %v636_v12 = vsub.s32 0, %v635_v2  ;;  %v640_v13 = vsub.s32 1, %v635_v2 }
  0xb5   : > { %v586_v34 = vadd.f32 %v585_v23, %v557_v31  ;;  %v589_v35 = vsel %vm487_vm0, %v560_v28, 0.0  ;;  %812 = vmatpush1.bf16.msra.mxu0 %v2431_v45 }
  0xb6   : > { %v590_v36 = vadd.f32 %v589_v35, %v559_v32  ;;  %813 = vmatprep.subr.bf16.mxu0 %v2541_v33  ;;  %v2813_v30 = vrot.slane %v485_v17, %v636_v12  ;;  %v2815_v31 = vrot.slane %v485_v17, %v640_v13  ;;  %v668_v38 = vrot.slane %v486_v29, %v640_v13 }
  0xb7   : > { %583 = vadd.xlane.f32.xlu1 %v582_v21  ;;  %587 = vadd.xlane.f32.xlu0 %v586_v34  ;;  %v2819_v34 = vrot.slane %v486_v29, %v636_v12 }
  0xb9   : > { %814 = vmatpush1.bf16.msra.mxu0 %v2432_v46 }
  0xba   : > { %815 = vmatprep.subr.bf16.mxu0 %v2541_v33 }
  0xbb   : > { %591 = vadd.xlane.f32.xlu1 %v590_v36 }
  0xbd   : > { %816 = vmatpush1.bf16.msra.mxu0 %v795_v51 }
 0x138   : > { %v564_v54 = vpop.xlane.xlu0 %563 }
 0x139   : > { %v593_v57 = vmul.f32 0.006802721, %v564_v54 }
 0x13b   : > { %v601_v58 = vadd.f32 1e-05, %v593_v57 }
 0x13c   : > { %v568_v60 = vpop.xlane.xlu1 %567  ;;  %v572_v61 = vpop.xlane.xlu0 %571 }
 0x13d   : > { %2437 = vrsqrt.f32 %v601_v58  ;;  %v594_v62 = vmul.f32 0.006802721, %v568_v60  ;;  %v595_v63 = vmul.f32 0.006802721, %v572_v61 }
 0x13f   : > { %v602_v0 = vadd.f32 1e-05, %v594_v62  ;;  %v603_v1 = vadd.f32 1e-05, %v595_v63 }
 0x140   : > { %v576_v3 = vpop.xlane.xlu1 %575  ;;  %v580_v6 = vpop.xlane.xlu0 %579 }
 0x141   : > { %2439 = vrsqrt.f32 %v602_v0  ;;  %v596_v9 = vmul.f32 0.006802721, %v576_v3  ;;  %v597_v33 = vmul.f32 0.006802721, %v580_v6 }
 0x142   : > { %2441 = vrsqrt.f32 %v603_v1 }
 0x143   : > { %v604_v10 = vadd.f32 1e-05, %v596_v9  ;;  %v605_v11 = vadd.f32 1e-05, %v597_v33 }
 0x144   : > { %v584_v16 = vpop.xlane.xlu1 %583  ;;  %v588_v14 = vpop.xlane.xlu0 %587 }
 0x145   : > { %2443 = vrsqrt.f32 %v604_v10  ;;  %v598_v18 = vmul.f32 0.006802721, %v584_v16  ;;  %v599_v15 = vmul.f32 0.006802721, %v588_v14 }
 0x146   : > { %2445 = vrsqrt.f32 %v605_v11 }
 0x147   : > { %v2438_v19 = vpop.eup %2437  ;;  %v606_v24 = vadd.f32 1e-05, %v598_v18  ;;  %v607_v26 = vadd.f32 1e-05, %v599_v15 }
 0x148   : > { %v592_v21 = vpop.xlane.xlu1 %591  ;;  %v618_v32 = vmul.f32 %v2438_v19, %v2702_v41  ;;  %v617_v28 = vmul.f32 %v2438_v19, %v2700_v40 }
 0x149   : > { %2447 = vrsqrt.f32 %v606_v24  ;;  %v600_v23 = vmul.f32 0.006802721, %v592_v21 }
 0x14a   : > { %v645_v37 = vmul.f32 %v2815_v31, %v618_v32  ;;  %v644_v39 = vmul.f32 %v2813_v30, %v617_v28  ;;  %2449 = vrsqrt.f32 %v607_v26 }
 0x14b   : > { %v2440_v35 = vpop.eup %2439  ;;  %v608_v36 = vadd.f32 1e-05, %v600_v23 }
 0x14c   : > { %v2442_v44 = vpop.eup %2441  ;;  %v620_v45 = vmul.f32 %v2440_v35, %v2718_v53  ;;  %v619_v46 = vmul.f32 %v2440_v35, %v2716_v52  ;;  %v672_v49 = vadd.f32 %v668_v38, %v645_v37  ;;  %v671_v50 = vadd.f32 %v2819_v34, %v644_v39 }
 0x14d   : > { %2451 = vrsqrt.f32 %v608_v36  ;;  %v622_v40 = vmul.f32 %v2442_v44, %v2706_v43  ;;  %v621_v43 = vmul.f32 %v2442_v44, %v2704_v42 }
 0x14e   : > { %v647_v41 = vmul.f32 %v2815_v31, %v620_v45  ;;  %v646_v47 = vmul.f32 %v2813_v30, %v619_v46 }
 0x14f   : > { %v2444_v48 = vpop.eup %2443  ;;  %v649_v51 = vmul.f32 %v2815_v31, %v622_v40 }
 0x150   : > { %v2446_v54 = vpop.eup %2445  ;;  %v674_v57 = vadd.f32 %v668_v38, %v647_v41  ;;  %v673_v58 = vadd.f32 %v2819_v34, %v646_v47  ;;  %v624_v53 = vmul.f32 %v2444_v48, %v2723_v56  ;;  %v623_v52 = vmul.f32 %v2444_v48, %v2721_v55 }
 0x151   : > { %v626_v62 = vmul.f32 %v2446_v54, %v2738_v5  ;;  %v676_v1 = vadd.f32 %v668_v38, %v649_v51  ;;  %v648_v55 = vmul.f32 %v2813_v30, %v621_v43  ;;  %v625_v13 = vmul.f32 %v2446_v54, %v2735_v4 }
 0x152   : > { %v688_v59 = vpack.c.bf16 %v674_v57, %v672_v49  ;;  %v687_v60 = vpack.c.bf16 %v673_v58, %v671_v50  ;;  %v651_v61 = vmul.f32 %v2815_v31, %v624_v53  ;;  %v650_v0 = vmul.f32 %v2813_v30, %v623_v52 }
 0x153   : > { %v2448_v63 = vpop.eup %2447  ;;  %v653_v6 = vmul.f32 %v2815_v31, %v626_v62 }
 0x154   : > { %2242 = vmatprep.mubr.msk.bf16.mxu0 %vm487_vm0, %v688_v59  ;;  %v678_v2 = vadd.f32 %v668_v38, %v651_v61  ;;  %v628_v3 = vmul.f32 %v2448_v63, %v2745_v8  ;;  %v2450_v56 = vpop.eup %2449  ;;  %v677_v5 = vadd.f32 %v2819_v34, %v650_v0  ;;  %v627_v10 = vmul.f32 %v2448_v63, %v2742_v7 }
 0x155   : > { %830 = vmatmul.mubr.bf16.vlgmr.msra.gmra.mrb[0].mxu0 %v687_v60  ;;  %v675_v8 = vadd.f32 %v2819_v34, %v648_v55  ;;  %v680_v16 = vadd.f32 %v668_v38, %v653_v6  ;;  %v630_v14 = vmul.f32 %v2450_v56, %v2760_v22  ;;  %v652_v7 = vmul.f32 %v2813_v30, %v625_v13 }
 0x156   : > { %v690_v42 = vpack.c.bf16 %v678_v2, %v676_v1  ;;  %v655_v9 = vmul.f32 %v2815_v31, %v628_v3  ;;  %v654_v18 = vmul.f32 %v2813_v30, %v627_v10  ;;  %v629_v26 = vmul.f32 %v2450_v56, %v2757_v20  ;;  %v866_v20 = vld [vmem:[%s3250_s5] sm:$0xf] }
 0x157   : > { %v2452_v33 = vpop.eup %2451  ;;  %v689_v17 = vpack.c.bf16 %v677_v5, %v675_v8  ;;  %v679_v22 = vadd.f32 %v2819_v34, %v652_v7  ;;  %2406 = vmatprep.subr.msk.bf16.mxu1 %vm867_vm3, %v866_v20  ;;  %v881_v37 = vsel %vm867_vm3, %v866_v20, 0 }
 0x158   : > { %2243 = vmatprep.mubr.msk.bf16.mxu0 %vm487_vm0, %v690_v42  ;;  %v682_v11 = vadd.f32 %v668_v38, %v655_v9  ;;  %v632_v12 = vmul.f32 %v2452_v33, %v2767_v27  ;;  %v657_v27 = vmul.f32 %v2815_v31, %v630_v14  ;;  %v681_v24 = vadd.f32 %v2819_v34, %v654_v18 }
 0x159   : > { %v631_v4 = vmul.f32 %v2452_v33, %v2764_v25  ;;  %v656_v35 = vmul.f32 %v2813_v30, %v629_v26  ;;  %2335 = vmatpush3.bf16.xpose.msra.mxu1 %v881_v37 }
 0x15a   : > { %v692_v15 = vpack.c.bf16 %v682_v11, %v680_v16  ;;  %v659_v19 = vmul.f32 %v2815_v31, %v632_v12  ;;  %v684_v21 = vadd.f32 %v668_v38, %v657_v27  ;;  %v691_v32 = vpack.c.bf16 %v681_v24, %v679_v22  ;;  %2407 = vmatprep.subr.msk.bf16.mxu1 %vm867_vm3, %v866_v20 }
 0x15b   : > { %v658_v28 = vmul.f32 %v2813_v30, %v631_v4  ;;  %v683_v36 = vadd.f32 %v2819_v34, %v656_v35  ;;  %v2231_v30 = vld [vmem:[%s3249_s4] ss:$0 sm:$0xff] }
 0x15c   : > { %v686_v29 = vadd.f32 %v668_v38, %v659_v19  ;;  %v2545_v19 = vmov 0.0  }
 0x15d   : > { %838 = vmatmul.mubr.bf16.gmra.mrb[4].mxu0 %v689_v17  ;;  %v685_v31 = vadd.f32 %v2819_v34, %v658_v28 }
 0x15e   : > { %2244 = vmatprep.mubr.msk.bf16.mxu0 %vm487_vm0, %v692_v15  ;;  %v694_v23 = vpack.c.bf16 %v686_v29, %v684_v21 }
 0x15f   : > { %v693_v25 = vpack.c.bf16 %v685_v31, %v683_v36 }
 0x165   : > { %846 = vmatmul.mubr.bf16.gmra.mrb[8].mxu0 %v691_v32 }
 0x166   : > { %2245 = vmatprep.mubr.msk.bf16.mxu0 %vm487_vm0, %v694_v23 }
 0x16d   : > { %854 = vmatmul.mubr.bf16.gmra.mrb[12].mxu0 %v693_v25 }
 0x228   : > { %v831_v38 = vpop.f32.mrb[0].mxu0 }
 0x229   : > { %v2872_v34 = vadd.f32 %v2231_v30, %v831_v38  ;;  %v833_v39 = vpop.f32.mrb[1].mxu0 }
 0x22a   : > { %v834_v44 = vpop.f32.mrb[2].mxu0 }
 0x22b   : > { %v2874_v45 = vadd.f32 %v2231_v30, %v834_v44  ;;  %v836_v46 = vpop.f32.mrb[3].mxu0  ;;  %v2878_v40 = vmul.f32 %v2872_v34, %v2872_v34 }
 0x22d   : > { %v1045_v41 = vsel %vm867_vm3, %v2878_v40, 0.0  ;;  %v862_v47 = vpack.c.bf16 %v2874_v45, %v2872_v34  ;;  %v1038_v42 = vmul.f32 %v2874_v45, %v2874_v45 }
 0x22e   : > { %1046 = vadd.xlane.f32.xlu0 %v1045_v41 }
 0x22f   : > { %952 = vrot.lane.b32.xlu1 %v862_v47, %s2543_s19  ;;  %2336 = vmatprep.mubr.msk.bf16.mxu1 %vm867_vm3, %v862_v47  ;;  %v1048_v6 = vsel %vm867_vm3, %v1038_v42, 0.0 }
 0x230   : > { %v839_v48 = vpop.f32.mrb[4].mxu0 }
 0x231   : > { %v841_v49 = vpop.f32.mrb[5].mxu0  ;;  %v2886_v51 = vadd.f32 %v2231_v30, %v839_v48 }
 0x232   : > { %v842_v50 = vpop.f32.mrb[6].mxu0 }
 0x233   : > { %v2888_v54 = vadd.f32 %v2231_v30, %v842_v50  ;;  %v844_v57 = vpop.f32.mrb[7].mxu0  ;;  %v1039_v9 = vmul.f32 %v2886_v51, %v2886_v51 }
 0x235   : > { %v863_v58 = vpack.c.bf16 %v2888_v54, %v2886_v51  ;;  %v1051_v33 = vsel %vm867_vm3, %v1039_v9, 0.0  ;;  %v1040_v5 = vmul.f32 %v2888_v54, %v2888_v54 }
 0x237   : > { %2337 = vmatmul.mubr.msk.bf16.vlgmr.msra.gmra.mrb[0].mxu1 %vm867_vm3, %v863_v58  ;;  %v1054_v10 = vsel %vm867_vm3, %v1040_v5, 0.0 }
 0x238   : > { %v847_v53 = vpop.f32.mrb[8].mxu0  ;;  %2345 = vmatpush3.bf16.xpose.msra.mxu1 %v881_v37 }
 0x239   : > { %v849_v52 = vpop.f32.mrb[9].mxu0  ;;  %v2893_v59 = vadd.f32 %v2231_v30, %v847_v53  ;;  %2354 = vmatprep.subr.bf16.mxu1 %v2545_v19 }
 0x23a   : > { %v850_v43 = vpop.f32.mrb[10].mxu0 }
 0x23b   : > { %v2895_v60 = vadd.f32 %v2231_v30, %v850_v43  ;;  %v852_v61 = vpop.f32.mrb[11].mxu0  ;;  %v1041_v11 = vmul.f32 %v2893_v59, %v2893_v59 }
 0x23d   : > { %v864_v62 = vpack.c.bf16 %v2895_v60, %v2893_v59  ;;  %v1057_v12 = vsel %vm867_vm3, %v1041_v11, 0.0  ;;  %v1042_v8 = vmul.f32 %v2895_v60, %v2895_v60 }
 0x23f   : > { %2340 = vmatprep.mubr.msk.bf16.mxu1 %vm867_vm3, %v864_v62  ;;  %v1060_v13 = vsel %vm867_vm3, %v1042_v8, 0.0 }
 0x240   : > { %v855_v63 = vpop.f32.mrb[12].mxu0 }
 0x241   : > { %v857_v0 = vpop.f32.mrb[13].mxu0  ;;  %v2900_v2 = vadd.f32 %v2231_v30, %v855_v63 }
 0x242   : > { %v858_v1 = vpop.f32.mrb[14].mxu0 }
 0x243   : > { %v2902_v3 = vadd.f32 %v2231_v30, %v858_v1  ;;  %v860_v55 = vpop.f32.mrb[15].mxu0  ;;  %v1043_v16 = vmul.f32 %v2900_v2, %v2900_v2 }
 0x244   : > { %1263 = vrot.lane.b32.xlu0 %v862_v47, %s2544_s20 }
 0x245   : > { %v865_v56 = vpack.c.bf16 %v2902_v3, %v2900_v2  ;;  %v1063_v14 = vsel %vm867_vm3, %v1043_v16, 0.0  ;;  %v1044_v17 = vmul.f32 %v2902_v3, %v2902_v3 }
 0x247   : > { %2341 = vmatmul.mubr.msk.bf16.gmra.mrb[4].mxu1 %vm867_vm3, %v865_v56  ;;  %v1066_v18 = vsel %vm867_vm3, %v1044_v17, 0.0 }
 0x253   : > { %1049 = vadd.xlane.f32.xlu1 %v1048_v6 }
 0x263   : > { %1052 = vadd.xlane.f32.xlu0 %v1051_v33 }
 0x264   : > { %1265 = vrot.lane.b32.xlu1 %v863_v58, %s2544_s20 }
 0x268   : > { %954 = vrot.lane.b32.xlu1 %v863_v58, %s2543_s19 }
 0x279   : > { %1267 = vrot.lane.b32.xlu0 %v864_v62, %s2544_s20 }
 0x27d   : > { %1269 = vrot.lane.b32.xlu0 %v865_v56, %s2544_s20 }
 0x28c   : > { %1055 = vadd.xlane.f32.xlu1 %v1054_v10 }
 0x290   : > { %1058 = vadd.xlane.f32.xlu1 %v1057_v12 }
 0x294   : > { %1061 = vadd.xlane.f32.xlu1 %v1060_v13 }
 0x298   : > { %1064 = vadd.xlane.f32.xlu1 %v1063_v14 }
 0x29c   : > { %1067 = vadd.xlane.f32.xlu0 %v1066_v18 }
 0x2a1   : > { %v953_v15 = vpop.permute.xlu1 %952 }
 0x2a2   : > { %2346 = vmatprep.mubr.msk.bf16.mxu1 %vm867_vm3, %v953_v15 }
 0x2a9   : > { %958 = vrot.lane.b32.xlu1 %v865_v56, %s2543_s19 }
 0x2ad   : > { %1117 = vrot.lane.b32.xlu1 %v2878_v40, %s2543_s19 }
 0x2b1   : > { %1119 = vrot.lane.b32.xlu1 %v1038_v42, %s2543_s19 }
 0x2b2   : > { %956 = vrot.lane.b32.xlu0 %v864_v62, %s2543_s19 }
 0x2b5   : > { %1121 = vrot.lane.b32.xlu1 %v1039_v9, %s2543_s19 }
 0x2b9   : > { %1123 = vrot.lane.b32.xlu1 %v1040_v5, %s2543_s19 }
 0x2bb   : > { %v1047_v7 = vpop.xlane.xlu0 %1046 }
 0x2bc   : > { %v1069_v28 = vmul.f32 0.5, %v1047_v7 }
 0x2bd   : > { %1125 = vrot.lane.b32.xlu1 %v1041_v11, %s2543_s19 }
 0x2bf   : > { %v1264_v27 = vpop.permute.xlu0 %1263 }
 0x2c1   : > { %1127 = vrot.lane.b32.xlu1 %v1042_v8, %s2543_s19 }
 0x2c5   : > { %1129 = vrot.lane.b32.xlu1 %v1043_v16, %s2543_s19 }
 0x2c9   : > { %1131 = vrot.lane.b32.xlu1 %v1044_v17, %s2543_s19 }
 0x2d0   : > { %1275 = vxpose.xlu0.c.b16.start [1/4] (short) (narrow) %v1264_v27, 16 }
 0x2e0   : > { %v1050_v24 = vpop.xlane.xlu1 %1049 }
 0x2e1   : > { %v1070_v36 = vmul.f32 0.5, %v1050_v24 }
 0x2e4   : > { %v1266_v4 = vpop.permute.xlu1 %1265 }
 0x2e5   : > { %1276 = vxpose.xlu0.c.b16.cont [2/4] (short) (narrow) %v1266_v4, 16 }
 0x2e8   : > { %v955_v29 = vpop.permute.xlu1 %954 }
 0x2e9   : > { %2347 = vmatmul.mubr.msk.bf16.vlgmr.msra.gmra.mrb[8].mxu1 %vm867_vm3, %v955_v29 }
 0x2f0   : > { %v1053_v22 = vpop.xlane.xlu0 %1052 }
 0x2f1   : > { %v1071_v32 = vmul.f32 0.5, %v1053_v22 }
 0x2f4   : > { %v1268_v26 = vpop.permute.xlu0 %1267 }
 0x2f5   : > { %1277 = vxpose.xlu0.c.b16.cont [3/4] (short) (narrow) %v1268_v26, 16 }
 0x2f8   : > { %v1270_v21 = vpop.permute.xlu0 %1269 }
 0x2f9   : > { %1278 = vxpose.xlu0.c.b16.end [4/4] (short) (narrow) %v1270_v21, 16 }
 0x30a   : > { %v2338_v23 = vpop.f32.mrb[0].mxu1 }
 0x30b   : > { %v1079_v35 = vsub.f32 %v2338_v23, %v1071_v32  ;;  %v917_v31 = vpop.f32.mrb[1].mxu1 }
 0x30c   : > { %v1077_v25 = vsub.f32 %v917_v31, %v1069_v28  ;;  %v2339_v20 = vpop.f32.mrb[2].mxu1 }
 0x30d   : > { %v1089_v37 = vmul.f32 1.442695, %v1079_v35  ;;  %v920_v30 = vpop.f32.mrb[3].mxu1 }
 0x30e   : > { %v1085_v38 = vmul.f32 1.442695, %v1077_v25  ;;  %v1078_v39 = vsub.f32 %v920_v30, %v1070_v36 }
 0x30f   : > { %2453 = vpow2.f32 %v1089_v37 }
 0x310   : > { %2455 = vpow2.f32 %v1085_v38  ;;  %v1087_v44 = vmul.f32 1.442695, %v1078_v39 }
 0x312   : > { %2457 = vpow2.f32 %v1087_v44 }
 0x319   : > { %v2454_v46 = vpop.eup %2453  ;;  %v1056_v40 = vpop.xlane.xlu1 %1055 }
 0x31a   : > { %v2456_v41 = vpop.eup %2455  ;;  %v1072_v47 = vmul.f32 0.5, %v1056_v40  ;;  %v2342_v48 = vpop.f32.mrb[4].mxu1  ;;  %v1103_v52 = vmul.f32 0.35355338, %v2454_v46 }
 0x31b   : > { %v1101_v49 = vmul.f32 0.35355338, %v2456_v41  ;;  %v933_v50 = vpop.f32.mrb[5].mxu1 }
 0x31c   : > { %v2458_v57 = vpop.eup %2457  ;;  %v1080_v58 = vsub.f32 %v2339_v20, %v1072_v47  ;;  %v2343_v53 = vpop.f32.mrb[6].mxu1  ;;  %v1209_v9 = vsel %vm1205_vm4, %v1103_v52, 0.0 }
 0x31d   : > { %v1102_v43 = vmul.f32 0.35355338, %v2458_v57  ;;  %v1059_v61 = vpop.xlane.xlu1 %1058  ;;  %v936_v62 = vpop.f32.mrb[7].mxu1  ;;  %v1206_v1 = vsel %vm1205_vm4, %v1101_v49, 0.0 }
 0x31e   : > { %v1091_v63 = vmul.f32 1.442695, %v1080_v58  ;;  %v1073_v0 = vmul.f32 0.5, %v1059_v61 }
 0x31f   : > { %v1207_v55 = vsel %vm1205_vm4, %v1102_v43, 0.0  ;;  %v1259_v56 = vpack.c.bf16 %v1102_v43, %v1101_v49 }
 0x320   : > { %v1208_v42 = vadd.f32 %v1207_v55, %v1206_v1  ;;  %2459 = vpow2.f32 %v1091_v63  ;;  %v1081_v6 = vsub.f32 %v933_v50, %v1073_v0 }
 0x321   : > { %v1062_v33 = vpop.xlane.xlu1 %1061  ;;  %2355 = vmatpush3.bf16.msra.mxu1 %v1259_v56 }
 0x322   : > { %v1210_v5 = vadd.f32 %v1209_v9, %v1208_v42  ;;  %v1093_v10 = vmul.f32 1.442695, %v1081_v6  ;;  %v1074_v11 = vmul.f32 0.5, %v1062_v33  ;;  %2356 = vmatprep.subr.bf16.mxu1 %v2545_v19 }
 0x324   : > { %2461 = vpow2.f32 %v1093_v10  ;;  %v1082_v12 = vsub.f32 %v936_v62, %v1074_v11 }
 0x325   : > { %v1065_v8 = vpop.xlane.xlu1 %1064 }
 0x326   : > { %v1095_v13 = vmul.f32 1.442695, %v1082_v12  ;;  %v1075_v16 = vmul.f32 0.5, %v1065_v8 }
 0x328   : > { %2463 = vpow2.f32 %v1095_v13  ;;  %v1083_v14 = vsub.f32 %v2342_v48, %v1075_v16 }
 0x329   : > { %v959_v17 = vpop.permute.xlu1 %958  ;;  %v1068_v18 = vpop.xlane.xlu0 %1067 }
 0x32a   : > { %v2460_v15 = vpop.eup %2459  ;;  %v1097_v7 = vmul.f32 1.442695, %v1083_v14  ;;  %v1076_v27 = vmul.f32 0.5, %v1068_v18 }
 0x32b   : > { %v1104_v24 = vmul.f32 0.35355338, %v2460_v15 }
 0x32c   : > { %2465 = vpow2.f32 %v1097_v7  ;;  %v1084_v4 = vsub.f32 %v2343_v53, %v1076_v27 }
 0x32d   : > { %v1211_v29 = vsel %vm1205_vm4, %v1104_v24, 0.0  ;;  %v1118_v22 = vpop.permute.xlu1 %1117  ;;  %v957_v26 = vpop.permute.xlu0 %956  ;;  %v1260_v21 = vpack.c.bf16 %v1104_v24, %v1103_v52 }
 0x32e   : > { %v2462_v32 = vpop.eup %2461  ;;  %v1212_v28 = vadd.f32 %v1211_v29, %v1210_v5  ;;  %v1099_v23 = vmul.f32 1.442695, %v1084_v4  ;;  %2350 = vmatprep.mubr.msk.bf16.mxu1 %vm867_vm3, %v957_v26  ;;  %v1141_v35 = vsel %vm867_vm3, %v1118_v22, 0.0 }
 0x32f   : > { %v1105_v31 = vmul.f32 0.35355338, %v2462_v32  ;;  %1142 = vadd.xlane.f32.xlu1 %v1141_v35  ;;  %2351 = vmatmul.mubr.msk.bf16.gmra.mrb[12].mxu1 %vm867_vm3, %v959_v17 }
 0x330   : > { %2467 = vpow2.f32 %v1099_v23  ;;  %2357 = vmatpush3.bf16.msra.mxu1 %v1260_v21  ;;  %2362 = vmatprep.mubr.msk.bf16.mxu1 %vm2546_vm5, %v2545_v19 }
 0x331   : > { %v1213_v36 = vsel %vm1205_vm4, %v1105_v31, 0.0  ;;  %v1120_v25 = vpop.permute.xlu1 %1119  ;;  %2358 = vmatprep.subr.bf16.mxu1 %v2545_v19 }
 0x332   : > { %v2464_v20 = vpop.eup %2463  ;;  %v1214_v37 = vadd.f32 %v1213_v36, %v1212_v28  ;;  %v1144_v30 = vsel %vm867_vm3, %v1120_v25, 0.0 }
 0x333   : > { %v1106_v38 = vmul.f32 0.35355338, %v2464_v20  ;;  %1145 = vadd.xlane.f32.xlu0 %v1144_v30 }
 0x335   : > { %v1215_v39 = vsel %vm1205_vm4, %v1106_v38, 0.0  ;;  %v1122_v44 = vpop.permute.xlu1 %1121  ;;  %v1261_v46 = vpack.c.bf16 %v1106_v38, %v1105_v31 }
 0x336   : > { %v2466_v40 = vpop.eup %2465  ;;  %v1216_v41 = vadd.f32 %v1215_v39, %v1214_v37  ;;  %v1147_v47 = vsel %vm867_vm3, %v1122_v44, 0.0 }
 0x337   : > { %v1107_v48 = vmul.f32 0.35355338, %v2466_v40  ;;  %2359 = vmatpush3.bf16.msra.mxu1 %v1261_v46  ;;  %1148 = vadd.xlane.f32.xlu0 %v1147_v47 }
 0x338   : > { %2360 = vmatprep.subr.bf16.mxu1 %v2545_v19 }
 0x339   : > { %v1217_v49 = vsel %vm1205_vm4, %v1107_v48, 0.0  ;;  %v1124_v50 = vpop.permute.xlu1 %1123 }
 0x33a   : > { %v2468_v57 = vpop.eup %2467  ;;  %v1218_v58 = vadd.f32 %v1217_v49, %v1216_v41  ;;  %v1150_v53 = vsel %vm867_vm3, %v1124_v50, 0.0 }
 0x33b   : > { %v1108_v52 = vmul.f32 0.35355338, %v2468_v57  ;;  %1151 = vadd.xlane.f32.xlu0 %v1150_v53 }
 0x33d   : > { %v1219_v43 = vsel %vm1205_vm4, %v1108_v52, 0.0  ;;  %v1126_v61 = vpop.permute.xlu1 %1125  ;;  %v1262_v62 = vpack.c.bf16 %v1108_v52, %v1107_v48 }
 0x33e   : > { %v1220_v63 = vadd.f32 %v1219_v43, %v1218_v58  ;;  %v1153_v0 = vsel %vm867_vm3, %v1126_v61, 0.0 }
 0x33f   : > { %1154 = vadd.xlane.f32.xlu0 %v1153_v0  ;;  %2361 = vmatpush3.bf16.msra.mxu1 %v1262_v62 }
 0x340   : > { %v1221_v33 = vrot.slane %v1220_v63, 4 }
 0x341   : > { %v1128_v1 = vpop.permute.xlu1 %1127 }
 0x342   : > { %v1156_v19 = vsel %vm867_vm3, %v1128_v1, 0.0  ;;  %v1222_v8 = vadd.f32 %v1221_v33, %v1220_v63 }
 0x343   : > { %1157 = vadd.xlane.f32.xlu0 %v1156_v19 }
 0x344   : > { %v1223_v7 = vrot.slane %v1222_v8, 2 }
 0x345   : > { %v1130_v55 = vpop.permute.xlu1 %1129 }
 0x346   : > { %v1159_v56 = vsel %vm867_vm3, %v1130_v55, 0.0  ;;  %v1224_v22 = vadd.f32 %v1223_v7, %v1222_v8 }
 0x347   : > { %1160 = vadd.xlane.f32.xlu0 %v1159_v56 }
 0x348   : > { %v1225_v23 = vrot.slane %v1224_v22, 1 }
 0x349   : > { %v1132_v42 = vpop.permute.xlu1 %1131 }
 0x34a   : > { %v1162_v6 = vsel %vm867_vm3, %v1132_v42, 0.0  ;;  %v2969_v25 = vadd.f32 %v1225_v23, %v1224_v22 }
 0x34b   : > { %1163 = vadd.xlane.f32.xlu1 %v1162_v6 }
 0x353   : > { %v1283_v9 = vpop.trf.xlu0 }
 0x354   : > { %2363 = vmatmul.mubr.msk.bf16.vlgmr.msra.gmra.mrb[16].mxu1 %vm1291_vm6, %v1283_v9 }
 0x3bc   : > { %v1143_v5 = vpop.xlane.xlu1 %1142  ;;  %v2348_v10 = vpop.f32.mrb[8].mxu1 }
 0x3bd   : > { %v1165_v11 = vmul.f32 0.5, %v1143_v5  ;;  %v1006_v12 = vpop.f32.mrb[9].mxu1 }
 0x3be   : > { %v2349_v13 = vpop.f32.mrb[10].mxu1 }
 0x3bf   : > { %v1173_v16 = vsub.f32 %v1006_v12, %v1165_v11  ;;  %v1009_v14 = vpop.f32.mrb[11].mxu1 }
 0x3c0   : > { %v1146_v17 = vpop.xlane.xlu0 %1145 }
 0x3c1   : > { %v1181_v18 = vmul.f32 1.442695, %v1173_v16  ;;  %v1166_v15 = vmul.f32 0.5, %v1146_v17 }
 0x3c3   : > { %2469 = vpow2.f32 %v1181_v18  ;;  %v1174_v27 = vsub.f32 %v1009_v14, %v1166_v15 }
 0x3c4   : > { %v1149_v24 = vpop.xlane.xlu0 %1148 }
 0x3c5   : > { %v1183_v4 = vmul.f32 1.442695, %v1174_v27  ;;  %v1167_v29 = vmul.f32 0.5, %v1149_v24 }
 0x3c7   : > { %2471 = vpow2.f32 %v1183_v4  ;;  %v1175_v26 = vsub.f32 %v2348_v10, %v1167_v29 }
 0x3c8   : > { %v1152_v21 = vpop.xlane.xlu0 %1151 }
 0x3c9   : > { %v1185_v32 = vmul.f32 1.442695, %v1175_v26  ;;  %v1168_v28 = vmul.f32 0.5, %v1152_v21 }
 0x3cb   : > { %2473 = vpow2.f32 %v1185_v32  ;;  %v1176_v35 = vsub.f32 %v2349_v13, %v1168_v28 }
 0x3cc   : > { %v1155_v43 = vpop.xlane.xlu0 %1154 }
 0x3cd   : > { %v2470_v31 = vpop.eup %2469  ;;  %v1187_v36 = vmul.f32 1.442695, %v1176_v35  ;;  %v1169_v1 = vmul.f32 0.5, %v1155_v43 }
 0x3ce   : > { %v1197_v20 = vmul.f32 0.35355338, %v2470_v31 }
 0x3cf   : > { %2475 = vpow2.f32 %v1187_v36 }
 0x3d0   : > { %v1227_v37 = vmul.f32 %v2969_v25, %v1197_v20  ;;  %v1158_v61 = vpop.xlane.xlu0 %1157 }
 0x3d1   : > { %v2472_v30 = vpop.eup %2471  ;;  %v1170_v6 = vmul.f32 0.5, %v1158_v61 }
 0x3d2   : > { %v1198_v38 = vmul.f32 0.35355338, %v2472_v30  ;;  %v1235_v39 = vsel %vm1205_vm4, %v1227_v37, 0.0 }
 0x3d3   : > { %1236 = vadd.xlane.f32.xlu0 %v1235_v39 }
 0x3d4   : > { %v1336_v44 = vpack.c.bf16 %v1198_v38, %v1197_v20  ;;  %v1228_v46 = vmul.f32 %v2969_v25, %v1198_v38  ;;  %v1161_v62 = vpop.xlane.xlu0 %1160 }
 0x3d5   : > { %v2474_v40 = vpop.eup %2473  ;;  %v1171_v0 = vmul.f32 0.5, %v1161_v62 }
 0x3d6   : > { %2368 = vmatprep.mubr.msk.bf16.mxu1 %vm1205_vm4, %v1336_v44  ;;  %v1238_v41 = vsel %vm1205_vm4, %v1228_v46, 0.0  ;;  %v2976_v47 = vmul.f32 0.35355338, %v2474_v40 }
 0x3d7   : > { %1239 = vadd.xlane.f32.xlu1 %v1238_v41 }
 0x3d8   : > { %v1229_v48 = vmul.f32 %v2969_v25, %v2976_v47  ;;  %v1164_v63 = vpop.xlane.xlu1 %1163 }
 0x3d9   : > { %v2476_v49 = vpop.eup %2475  ;;  %v1172_v55 = vmul.f32 0.5, %v1164_v63 }
 0x3da   : > { %v1241_v50 = vsel %vm1205_vm4, %v1229_v48, 0.0  ;;  %v2981_v57 = vmul.f32 0.35355338, %v2476_v49 }
 0x3db   : > { %1242 = vadd.xlane.f32.xlu0 %v1241_v50 }
 0x3dc   : > { %v1230_v58 = vmul.f32 %v2969_v25, %v2981_v57  ;;  %v1337_v53 = vpack.c.bf16 %v2981_v57, %v2976_v47 }
 0x3de   : > { %v1244_v52 = vsel %vm1205_vm4, %v1230_v58, 0.0 }
 0x3df   : > { %1245 = vadd.xlane.f32.xlu1 %v1244_v52 }
 0x402   : > { %v2352_v19 = vpop.f32.mrb[12].mxu1 }
 0x403   : > { %v1179_v56 = vsub.f32 %v2352_v19, %v1171_v0  ;;  %v1022_v42 = vpop.f32.mrb[13].mxu1 }
 0x404   : > { %v1177_v9 = vsub.f32 %v1022_v42, %v1169_v1  ;;  %v2353_v33 = vpop.f32.mrb[14].mxu1 }
 0x405   : > { %v1193_v5 = vmul.f32 1.442695, %v1179_v56  ;;  %v1180_v10 = vsub.f32 %v2353_v33, %v1172_v55  ;;  %v1025_v11 = vpop.f32.mrb[15].mxu1 }
 0x406   : > { %v1189_v12 = vmul.f32 1.442695, %v1177_v9  ;;  %v1178_v8 = vsub.f32 %v1025_v11, %v1170_v6 }
 0x407   : > { %2477 = vpow2.f32 %v1193_v5  ;;  %v1195_v13 = vmul.f32 1.442695, %v1180_v10 }
 0x408   : > { %2479 = vpow2.f32 %v1189_v12  ;;  %v1191_v16 = vmul.f32 1.442695, %v1178_v8 }
 0x409   : > { %2481 = vpow2.f32 %v1195_v13 }
 0x40a   : > { %2483 = vpow2.f32 %v1191_v16 }
 0x411   : > { %v2478_v14 = vpop.eup %2477 }
 0x412   : > { %v2480_v17 = vpop.eup %2479  ;;  %v1203_v15 = vmul.f32 0.35355338, %v2478_v14 }
 0x413   : > { %v2482_v18 = vpop.eup %2481  ;;  %v1201_v7 = vmul.f32 0.35355338, %v2480_v17 }
 0x414   : > { %v2484_v27 = vpop.eup %2483  ;;  %v1204_v24 = vmul.f32 0.35355338, %v2482_v18  ;;  %v1233_v28 = vmul.f32 %v2969_v25, %v1203_v15 }
 0x415   : > { %v1202_v4 = vmul.f32 0.35355338, %v2484_v27  ;;  %v1231_v29 = vmul.f32 %v2969_v25, %v1201_v7 }
 0x416   : > { %v1339_v22 = vpack.c.bf16 %v1204_v24, %v1203_v15  ;;  %v1234_v35 = vmul.f32 %v2969_v25, %v1204_v24  ;;  %v1253_v31 = vsel %vm1205_vm4, %v1233_v28, 0.0 }
 0x417   : > { %v1338_v26 = vpack.c.bf16 %v1202_v4, %v1201_v7  ;;  %v1247_v21 = vsel %vm1205_vm4, %v1231_v29, 0.0  ;;  %v1232_v32 = vmul.f32 %v2969_v25, %v1202_v4  ;;  %v2434_v25 = vld [vmem:[%s3251_s6] sm:$0xff]  }
 0x418   : > { %1248 = vadd.xlane.f32.xlu0 %v1247_v21  ;;  %v1256_v36 = vsel %vm1205_vm4, %v1234_v35, 0.0 }
 0x419   : > { %v1250_v23 = vsel %vm1205_vm4, %v1232_v32, 0.0 }
 0x41a   : > { %1251 = vadd.xlane.f32.xlu1 %v1250_v23 }
 0x41c   : > { %1254 = vadd.xlane.f32.xlu0 %v1253_v31 }
 0x41e   : > { %1257 = vadd.xlane.f32.xlu1 %v1256_v36  ;;  %v2264_v36 = vld [vmem:[%s3252_s7] ss:$0 sm:$0xff] }
 0x427   : > { %v1329_v20 = vpop.f32.mrb[16].mxu1 }
 0x428   : > { %v2364_v37 = vpop.f32.mrb[17].mxu1 }
 0x429   : > { %v1332_v30 = vpop.f32.mrb[18].mxu1 }
 0x42a   : > { %v1340_v38 = vpack.c.bf16 %v1332_v30, %v1329_v20  ;;  %v2365_v39 = vpop.f32.mrb[19].mxu1 }
 0x42c   : > { %v1354_v44 = vsel %vm1205_vm4, %v1340_v38, 0  ;;  %2408 = vmatprep.subr.msk.bf16.mxu1 %vm1205_vm4, %v1340_v38 }
 0x42d   : > { %2367 = vmatpush3.bf16.xpose.msra.mxu1 %v1354_v44 }
 0x42e   : > { %2376 = vmatprep.subr.bf16.mxu1 %v2434_v25 }
 0x434   : > { %2369 = vmatmul.mubr.msk.bf16.vlgmr.msra.gmra.mrb[20].mxu1 %vm1205_vm4, %v1337_v53 }
 0x435   : > { %2372 = vmatprep.mubr.msk.bf16.mxu1 %vm1205_vm4, %v1338_v26  ;;  %2377 = vmatpush3.bf16.msra.mxu1 %v2434_v25 }
 0x43c   : > { %2373 = vmatmul.mubr.msk.bf16.gmra.mrb[24].mxu1 %vm1205_vm4, %v1339_v22 }
 0x460   : > { %v1237_v46 = vpop.xlane.xlu0 %1236 }
 0x461   : > { %v1421_v48 = vadd.f32 1e-08, %v1237_v46 }
 0x463   : > { %2485 = vrcp.f32 %v1421_v48 }
 0x464   : > { %v1240_v40 = vpop.xlane.xlu1 %1239 }
 0x465   : > { %v1422_v52 = vadd.f32 1e-08, %v1240_v40 }
 0x468   : > { %v1243_v41 = vpop.xlane.xlu0 %1242 }
 0x469   : > { %v1423_v50 = vadd.f32 1e-08, %v1243_v41 }
 0x46b   : > { %2487 = vrcp.f32 %v1423_v50 }
 0x46c   : > { %v1246_v47 = vpop.xlane.xlu1 %1245 }
 0x46d   : > { %v1424_v58 = vadd.f32 1e-08, %v1246_v47  ;;  %v2486_v1 = vpop.eup %2485 }
 0x46f   : > { %2489 = vrcp.f32 %v1424_v58 }
 0x470   : > { %2491 = vrcp.f32 %v1422_v52 }
 0x475   : > { %v2488_v55 = vpop.eup %2487 }
 0x479   : > { %v2490_v42 = vpop.eup %2489 }
 0x47a   : > { %v2492_v9 = vpop.eup %2491 }
 0x4a5   : > { %v1249_v49 = vpop.xlane.xlu0 %1248 }
 0x4a6   : > { %v1425_v61 = vadd.f32 1e-08, %v1249_v49 }
 0x4a7   : > { %v1252_v57 = vpop.xlane.xlu1 %1251 }
 0x4a8   : > { %v1426_v0 = vadd.f32 1e-08, %v1252_v57  ;;  %2493 = vrcp.f32 %v1425_v61 }
 0x4a9   : > { %v1255_v43 = vpop.xlane.xlu0 %1254 }
 0x4aa   : > { %v1427_v62 = vadd.f32 1e-08, %v1255_v43 }
 0x4ab   : > { %v1258_v53 = vpop.xlane.xlu1 %1257 }
 0x4ac   : > { %v1428_v63 = vadd.f32 1e-08, %v1258_v53  ;;  %2495 = vrcp.f32 %v1427_v62 }
 0x4ae   : > { %2497 = vrcp.f32 %v1428_v63 }
 0x4af   : > { %2499 = vrcp.f32 %v1426_v0 }
 0x4b2   : > { %v2494_v16 = vpop.eup %2493 }
 0x4b6   : > { %v2496_v17 = vpop.eup %2495 }
 0x4b8   : > { %v2498_v15 = vpop.eup %2497 }
 0x4b9   : > { %v2500_v27 = vpop.eup %2499 }
 0x507   : > { %v2370_v19 = vpop.f32.mrb[20].mxu1 }
 0x508   : > { %v1390_v56 = vpop.f32.mrb[21].mxu1  ;;  %v1439_v33 = vmul.f32 %v2488_v55, %v2370_v19 }
 0x509   : > { %v2371_v6 = vpop.f32.mrb[22].mxu1  ;;  %v1437_v11 = vmul.f32 %v2486_v1, %v1390_v56 }
 0x50a   : > { %v1440_v5 = vmul.f32 %v2490_v42, %v2371_v6  ;;  %v1393_v10 = vpop.f32.mrb[23].mxu1 }
 0x50b   : > { %v1438_v12 = vmul.f32 %v2492_v9, %v1393_v10 }
 0x50c   : > { %v1446_v8 = vpack.c.bf16 %v1440_v5, %v1439_v33 }
 0x50d   : > { %v1445_v13 = vpack.c.bf16 %v1438_v12, %v1437_v11 }
 0x50f   : > { %v2374_v14 = vpop.f32.mrb[24].mxu1  ;;  %2378 = vmatprep.mubr.msk.bf16.mxu1 %vm867_vm3, %v1445_v13 }
 0x510   : > { %v1406_v18 = vpop.f32.mrb[25].mxu1  ;;  %2379 = vmatmul.mubr.msk.bf16.vlgmr.msra.gmra.mrb[28].mxu1 %vm867_vm3, %v1446_v8  ;;  %v1443_v24 = vmul.f32 %v2496_v17, %v2374_v14 }
 0x511   : > { %v2375_v7 = vpop.f32.mrb[26].mxu1  ;;  %v1441_v22 = vmul.f32 %v2494_v16, %v1406_v18 }
 0x512   : > { %v1444_v4 = vmul.f32 %v2498_v15, %v2375_v7  ;;  %v1409_v29 = vpop.f32.mrb[27].mxu1 }
 0x513   : > { %v1442_v26 = vmul.f32 %v2500_v27, %v1409_v29 }
 0x514   : > { %v1448_v21 = vpack.c.bf16 %v1444_v4, %v1443_v24 }
 0x515   : > { %v1447_v32 = vpack.c.bf16 %v1442_v26, %v1441_v22 }
 0x517   : > { %2382 = vmatprep.mubr.msk.bf16.mxu1 %vm867_vm3, %v1447_v32 }
 0x518   : > { %2383 = vmatmul.mubr.msk.bf16.gmra.mrb[32].mxu1 %vm867_vm3, %v1448_v21 }
 0x5e3   : > { %v2380_v28 = vpop.f32.mrb[28].mxu1 }
 0x5e4   : > { %1546 = vrot.lane.b32.xlu1 %v2380_v28, %s2547_s23  ;;  %v1503_v23 = vpop.f32.mrb[29].mxu1 }
 0x5e5   : > { %1542 = vrot.lane.b32.xlu0 %v1503_v23, %s2547_s23  ;;  %v2381_v35 = vpop.f32.mrb[30].mxu1 }
 0x5e6   : > { %v1506_v31 = vpop.f32.mrb[31].mxu1 }
 0x5e8   : > { %1544 = vrot.lane.b32.xlu1 %v1506_v31, %s2547_s23 }
 0x5e9   : > { %1580 = vrot.lane.b32.xlu0 %v2264_v36, %s2547_s23 }
 0x5eb   : > { %v2384_v20 = vpop.f32.mrb[32].mxu1 }
 0x5ec   : > { %1548 = vrot.lane.b32.xlu1 %v2381_v35, %s2547_s23  ;;  %v1519_v37 = vpop.f32.mrb[33].mxu1 }
 0x5ed   : > { %v2385_v30 = vpop.f32.mrb[34].mxu1 }
 0x5ee   : > { %v1522_v38 = vpop.f32.mrb[35].mxu1 }
 0x5ef   : > { %1552 = vrot.lane.b32.xlu0 %v1522_v38, %s2547_s23 }
 0x5f0   : > { %1550 = vrot.lane.b32.xlu1 %v1519_v37, %s2547_s23 }
 0x5f3   : > { %1556 = vrot.lane.b32.xlu0 %v2385_v30, %s2547_s23 }
 0x5f4   : > { %1554 = vrot.lane.b32.xlu1 %v2384_v20, %s2547_s23 }
 0x656   : > { %v1547_v39 = vpop.permute.xlu1 %1546 }
 0x657   : > { %v1543_v44 = vpop.permute.xlu0 %1542  ;;  %v1568_v49 = vadd.f32 %v1547_v39, %v2886_v51 }
 0x658   : > { %v1566_v25 = vadd.f32 %v1543_v44, %v2872_v34 }
 0x65a   : > { %v1545_v46 = vpop.permute.xlu1 %1544 }
 0x65b   : > { %v1567_v40 = vadd.f32 %v1545_v46, %v2874_v45  ;;  %v1581_v41 = vpop.permute.xlu0 %1580 }
 0x65c   : > { %v3022_v47 = vadd.f32 %v1581_v41, %v1566_v25  ;;  %v3032_v34 = vadd.f32 %v1581_v41, %v1568_v49 }
 0x65d   : > { %v3024_v48 = vadd.f32 %v1581_v41, %v1567_v40 }
 0x65e   : > { %v1549_v50 = vpop.permute.xlu1 %1548  ;;  %1601 = vrot.lane.b32.xlu1 %v3022_v47, %s2544_s20 }
 0x65f   : > { %v1569_v57 = vadd.f32 %v1549_v50, %v2888_v54  ;;  %1603 = vrot.lane.b32.xlu0 %v3024_v48, %s2544_s20 }
 0x661   : > { %v3034_v58 = vadd.f32 %v1581_v41, %v1569_v57  ;;  %v1553_v45 = vpop.permute.xlu0 %1552 }
 0x662   : > { %v1571_v52 = vadd.f32 %v1553_v45, %v2895_v60  ;;  %v1551_v43 = vpop.permute.xlu1 %1550  ;;  %1605 = vrot.lane.b32.xlu1 %v3032_v34, %s2544_s20 }
 0x663   : > { %v1570_v51 = vadd.f32 %v1551_v43, %v2893_v59  ;;  %1607 = vrot.lane.b32.xlu0 %v3034_v58, %s2544_s20 }
 0x664   : > { %v3042_v54 = vadd.f32 %v1581_v41, %v1571_v52 }
 0x665   : > { %v3044_v53 = vadd.f32 %v1581_v41, %v1570_v51  ;;  %v1557_v61 = vpop.permute.xlu0 %1556 }
 0x666   : > { %v1573_v62 = vadd.f32 %v1557_v61, %v2902_v3  ;;  %v1555_v63 = vpop.permute.xlu1 %1554 }
 0x667   : > { %v1572_v0 = vadd.f32 %v1555_v63, %v2900_v2  ;;  %1609 = vrot.lane.b32.xlu1 %v3044_v53, %s2544_s20  ;;  %1611 = vrot.lane.b32.xlu0 %v3042_v54, %s2544_s20 }
 0x668   : > { %v3052_v59 = vadd.f32 %v1581_v41, %v1573_v62 }
 0x669   : > { %v3054_v60 = vadd.f32 %v1581_v41, %v1572_v0 }
 0x66b   : > { %1613 = vrot.lane.b32.xlu1 %v3054_v60, %s2544_s20  ;;  %1615 = vrot.lane.b32.xlu0 %v3052_v59, %s2544_s20 }
 0x6d0   : > { %v1602_v3 = vpop.permute.xlu1 %1601 }
 0x6d1   : > { %v1604_v1 = vpop.permute.xlu0 %1603  ;;  %v1625_v2 = vsel %vm867_vm3, %v1602_v3, 0.0 }
 0x6d2   : > { %1626 = vadd.xlane.f32.xlu1 %v1625_v2  ;;  %v1628_v6 = vsel %vm867_vm3, %v1604_v1, 0.0 }
 0x6d4   : > { %v1606_v19 = vpop.permute.xlu1 %1605 }
 0x6d5   : > { %v1631_v55 = vsel %vm867_vm3, %v1606_v19, 0.0  ;;  %v1608_v56 = vpop.permute.xlu0 %1607 }
 0x6d6   : > { %1632 = vadd.xlane.f32.xlu0 %v1631_v55  ;;  %v1634_v10 = vsel %vm867_vm3, %v1608_v56, 0.0 }
 0x6d9   : > { %v1610_v42 = vpop.permute.xlu1 %1609  ;;  %v1612_v33 = vpop.permute.xlu0 %1611 }
 0x6da   : > { %1629 = vadd.xlane.f32.xlu0 %v1628_v6  ;;  %v1637_v9 = vsel %vm867_vm3, %v1610_v42, 0.0  ;;  %v1640_v12 = vsel %vm867_vm3, %v1612_v33, 0.0  ;;  %v2266_v33 = vld [vmem:[%s3254_s9] ss:$0 sm:$0xff] }
 0x6db   : > { %1638 = vadd.xlane.f32.xlu1 %v1637_v9  ;;  %v2265_v9 = vld [vmem:[%s3253_s8] ss:$0 sm:$0xff] }
 0x6dd   : > { %v1614_v5 = vpop.permute.xlu1 %1613  ;;  %v1616_v8 = vpop.permute.xlu0 %1615 }
 0x6de   : > { %1635 = vadd.xlane.f32.xlu0 %v1634_v10  ;;  %v1643_v11 = vsel %vm867_vm3, %v1614_v5, 0.0  ;;  %v1646_v13 = vsel %vm867_vm3, %v1616_v8, 0.0  ;;  %v2435_v5 = vld [vmem:[%s3255_s10] sm:$0xff]  }
 0x6df   : > { %1644 = vadd.xlane.f32.xlu1 %v1643_v11  ;;  %2386 = vmatprep.subr.bf16.mxu0 %v2435_v5 }
 0x6e0   : > { %2387 = vmatpush3.bf16.msra.mxu0 %v2435_v5 }
 0x6e2   : > { %1641 = vadd.xlane.f32.xlu0 %v1640_v12 }
 0x6e6   : > { %1647 = vadd.xlane.f32.xlu0 %v1646_v13 }
 0x75f   : > { %v1627_v16 = vpop.xlane.xlu1 %1626 }
 0x760   : > { %v1650_v14 = vmul.f32 0.0625, %v1627_v16 }
 0x762   : > { %v3069_v17 = vsub.f32 %v3022_v47, %v1650_v14 }
 0x763   : > { %v1633_v18 = vpop.xlane.xlu0 %1632 }
 0x764   : > { %v1652_v15 = vmul.f32 0.0625, %v1633_v18  ;;  %v1666_v7 = vmul.f32 %v3069_v17, %v3069_v17 }
 0x766   : > { %v3074_v27 = vsub.f32 %v3032_v34, %v1652_v15  ;;  %1682 = vrot.lane.b32.xlu1 %v1666_v7, %s2544_s20 }
 0x767   : > { %v1630_v24 = vpop.xlane.xlu0 %1629 }
 0x768   : > { %v1651_v4 = vmul.f32 0.0625, %v1630_v24  ;;  %v1639_v29 = vpop.xlane.xlu1 %1638  ;;  %v1668_v22 = vmul.f32 %v3074_v27, %v3074_v27 }
 0x769   : > { %v1654_v32 = vmul.f32 0.0625, %v1639_v29 }
 0x76a   : > { %v3080_v26 = vsub.f32 %v3024_v48, %v1651_v4  ;;  %1686 = vrot.lane.b32.xlu1 %v1668_v22, %s2544_s20 }
 0x76b   : > { %v1636_v21 = vpop.xlane.xlu0 %1635  ;;  %v3090_v20 = vsub.f32 %v3044_v53, %v1654_v32 }
 0x76c   : > { %v1653_v28 = vmul.f32 0.0625, %v1636_v21  ;;  %v1667_v23 = vmul.f32 %v3080_v26, %v3080_v26  ;;  %v1645_v35 = vpop.xlane.xlu1 %1644 }
 0x76d   : > { %v1656_v37 = vmul.f32 0.0625, %v1645_v35  ;;  %v1670_v40 = vmul.f32 %v3090_v20, %v3090_v20 }
 0x76e   : > { %v3086_v31 = vsub.f32 %v3034_v58, %v1653_v28  ;;  %1684 = vrot.lane.b32.xlu0 %v1667_v23, %s2544_s20 }
 0x76f   : > { %v1642_v36 = vpop.xlane.xlu0 %1641  ;;  %v3099_v25 = vsub.f32 %v3054_v60, %v1656_v37 }
 0x770   : > { %v1655_v30 = vmul.f32 0.0625, %v1642_v36  ;;  %v1669_v38 = vmul.f32 %v3086_v31, %v3086_v31 }
 0x771   : > { %v1672_v50 = vmul.f32 %v3099_v25, %v3099_v25 }
 0x772   : > { %v3095_v39 = vsub.f32 %v3042_v54, %v1655_v30  ;;  %1688 = vrot.lane.b32.xlu1 %v1669_v38, %s2544_s20 }
 0x773   : > { %v1648_v44 = vpop.xlane.xlu0 %1647 }
 0x774   : > { %v1657_v46 = vmul.f32 0.0625, %v1648_v44  ;;  %v1671_v41 = vmul.f32 %v3095_v39, %v3095_v39 }
 0x776   : > { %v3106_v49 = vsub.f32 %v3052_v59, %v1657_v46  ;;  %1690 = vrot.lane.b32.xlu1 %v1670_v40, %s2544_s20  ;;  %1692 = vrot.lane.b32.xlu0 %v1671_v41, %s2544_s20 }
 0x778   : > { %v1673_v57 = vmul.f32 %v3106_v49, %v3106_v49 }
 0x77a   : > { %1694 = vrot.lane.b32.xlu1 %v1672_v50, %s2544_s20  ;;  %1696 = vrot.lane.b32.xlu0 %v1673_v57, %s2544_s20 }
 0x7d8   : > { %v1683_v45 = vpop.permute.xlu1 %1682 }
 0x7d9   : > { %v1706_v52 = vsel %vm867_vm3, %v1683_v45, 0.0 }
 0x7da   : > { %1707 = vadd.xlane.f32.xlu1 %v1706_v52 }
 0x7dc   : > { %v1687_v43 = vpop.permute.xlu1 %1686 }
 0x7dd   : > { %v1712_v51 = vsel %vm867_vm3, %v1687_v43, 0.0 }
 0x7de   : > { %1713 = vadd.xlane.f32.xlu0 %v1712_v51 }
 0x7e0   : > { %v1685_v61 = vpop.permute.xlu0 %1684 }
 0x7e1   : > { %v1709_v1 = vsel %vm867_vm3, %v1685_v61, 0.0 }
 0x7e4   : > { %v1689_v62 = vpop.permute.xlu1 %1688 }
 0x7e5   : > { %v1715_v63 = vsel %vm867_vm3, %v1689_v62, 0.0 }
 0x7e6   : > { %1716 = vadd.xlane.f32.xlu0 %v1715_v63 }
 0x7e8   : > { %v1691_v0 = vpop.permute.xlu1 %1690  ;;  %v1693_v3 = vpop.permute.xlu0 %1692 }
 0x7e9   : > { %v1718_v42 = vsel %vm867_vm3, %v1691_v0, 0.0  ;;  %v1721_v6 = vsel %vm867_vm3, %v1693_v3, 0.0 }
 0x7ea   : > { %1710 = vadd.xlane.f32.xlu0 %v1709_v1 }
 0x7ec   : > { %v1695_v2 = vpop.permute.xlu1 %1694  ;;  %v1697_v19 = vpop.permute.xlu0 %1696 }
 0x7ed   : > { %v1724_v55 = vsel %vm867_vm3, %v1695_v2, 0.0  ;;  %v1727_v56 = vsel %vm867_vm3, %v1697_v19, 0.0 }
 0x7ee   : > { %1725 = vadd.xlane.f32.xlu1 %v1724_v55  ;;  %1728 = vadd.xlane.f32.xlu0 %v1727_v56 }
 0x7f2   : > { %1719 = vadd.xlane.f32.xlu1 %v1718_v42  ;;  %1722 = vadd.xlane.f32.xlu0 %v1721_v6 }
 0x803   : > { %1767 = vrot.lane.b32.xlu1 %v2265_v9, %s2547_s23 }
 0x808   : > { %1783 = vrot.lane.b32.xlu0 %v2266_v33, %s2547_s23 }
 0x867   : > { %v1708_v10 = vpop.xlane.xlu1 %1707 }
 0x868   : > { %v1730_v11 = vmul.f32 0.0625, %v1708_v10 }
 0x86a   : > { %v1738_v13 = vadd.f32 1e-05, %v1730_v11 }
 0x86b   : > { %v1714_v12 = vpop.xlane.xlu0 %1713 }
 0x86c   : > { %v1732_v8 = vmul.f32 0.0625, %v1714_v12  ;;  %2501 = vrsqrt.f32 %v1738_v13 }
 0x86e   : > { %v1740_v18 = vadd.f32 1e-05, %v1732_v8 }
 0x873   : > { %v1717_v16 = vpop.xlane.xlu0 %1716 }
 0x874   : > { %v1733_v14 = vmul.f32 0.0625, %v1717_v16 }
 0x876   : > { %v1741_v15 = vadd.f32 1e-05, %v1733_v14  ;;  %v2502_v38 = vpop.eup %2501 }
 0x877   : > { %v1711_v7 = vpop.xlane.xlu0 %1710  ;;  %v1754_v57 = vmul.f32 %v2502_v38, %v3069_v17 }
 0x878   : > { %2503 = vrsqrt.f32 %v1741_v15  ;;  %v1731_v24 = vmul.f32 0.0625, %v1711_v7 }
 0x879   : > { %2505 = vrsqrt.f32 %v1740_v18 }
 0x87a   : > { %v1739_v4 = vadd.f32 1e-05, %v1731_v24  ;;  %v2436_v24 = vld [vmem:[%s3257_s12] sm:$0xff]  }
 0x87b   : > { %v1726_v29 = vpop.xlane.xlu1 %1725  ;;  %v1729_v22 = vpop.xlane.xlu0 %1728  ;;  %2396 = vmatprep.subr.bf16.mxu1 %v2436_v24 }
 0x87c   : > { %2507 = vrsqrt.f32 %v1739_v4  ;;  %v1736_v21 = vmul.f32 0.0625, %v1726_v29  ;;  %v1737_v32 = vmul.f32 0.0625, %v1729_v22  ;;  %2397 = vmatpush3.bf16.msra.mxu1 %v2436_v24  ;;  %v2267_v4 = vld [vmem:[%s3256_s11] ss:$0 sm:$0xff] }
 0x87e   : > { %v1744_v28 = vadd.f32 1e-05, %v1736_v21  ;;  %v1745_v23 = vadd.f32 1e-05, %v1737_v32 }
 0x87f   : > { %v1720_v35 = vpop.xlane.xlu1 %1719  ;;  %v1723_v36 = vpop.xlane.xlu0 %1722 }
 0x880   : > { %2509 = vrsqrt.f32 %v1744_v28  ;;  %v1734_v37 = vmul.f32 0.0625, %v1720_v35  ;;  %v1735_v30 = vmul.f32 0.0625, %v1723_v36 }
 0x881   : > { %2511 = vrsqrt.f32 %v1745_v23 }
 0x882   : > { %v2504_v44 = vpop.eup %2503  ;;  %v1742_v46 = vadd.f32 1e-05, %v1734_v37  ;;  %v1743_v40 = vadd.f32 1e-05, %v1735_v30 }
 0x883   : > { %v2506_v41 = vpop.eup %2505  ;;  %v1768_v50 = vpop.permute.xlu1 %1767  ;;  %v1757_v45 = vmul.f32 %v2504_v44, %v3086_v31 }
 0x884   : > { %2513 = vrsqrt.f32 %v1742_v46  ;;  %v1756_v43 = vmul.f32 %v2506_v41, %v3074_v27  ;;  %v1770_v61 = vmul.f32 %v1768_v50, %v1754_v57  ;;  %v1784_v62 = vpop.permute.xlu0 %1783 }
 0x885   : > { %2515 = vrsqrt.f32 %v1743_v40  ;;  %v1773_v3 = vmul.f32 %v1768_v50, %v1757_v45 }
 0x886   : > { %v2508_v52 = vpop.eup %2507  ;;  %v1772_v0 = vmul.f32 %v1768_v50, %v1756_v43  ;;  %v1786_v19 = vadd.f32 %v1784_v62, %v1770_v61 }
 0x887   : > { %v1755_v51 = vmul.f32 %v2508_v52, %v3080_v26  ;;  %v1789_v9 = vadd.f32 %v1784_v62, %v1773_v3 }
 0x888   : > { %v1788_v6 = vadd.f32 %v1784_v62, %v1772_v0 }
 0x889   : > { %v1771_v63 = vmul.f32 %v1768_v50, %v1755_v51 }
 0x88a   : > { %v2510_v1 = vpop.eup %2509  ;;  %v1795_v8 = vpack.c.bf16 %v1789_v9, %v1788_v6 }
 0x88b   : > { %v2512_v2 = vpop.eup %2511  ;;  %v1787_v55 = vadd.f32 %v1784_v62, %v1771_v63  ;;  %v1760_v56 = vmul.f32 %v2510_v1, %v3099_v25 }
 0x88c   : > { %v1761_v17 = vmul.f32 %v2512_v2, %v3106_v49 }
 0x88d   : > { %v1794_v31 = vpack.c.bf16 %v1787_v55, %v1786_v19  ;;  %v1776_v42 = vmul.f32 %v1768_v50, %v1760_v56 }
 0x88e   : > { %v2514_v27 = vpop.eup %2513  ;;  %v1777_v33 = vmul.f32 %v1768_v50, %v1761_v17 }
 0x88f   : > { %v2516_v26 = vpop.eup %2515  ;;  %v1758_v5 = vmul.f32 %v2514_v27, %v3090_v20  ;;  %1811 = vrot.lane.b32.xlu1 %v1794_v31, %s2544_s20  ;;  %v1792_v10 = vadd.f32 %v1784_v62, %v1776_v42 }
 0x890   : > { %v1759_v11 = vmul.f32 %v2516_v26, %v3095_v39  ;;  %v1793_v12 = vadd.f32 %v1784_v62, %v1777_v33 }
 0x891   : > { %v1774_v13 = vmul.f32 %v1768_v50, %v1758_v5 }
 0x892   : > { %v1797_v25 = vpack.c.bf16 %v1793_v12, %v1792_v10  ;;  %v1775_v16 = vmul.f32 %v1768_v50, %v1759_v11 }
 0x893   : > { %1813 = vrot.lane.b32.xlu1 %v1795_v8, %s2544_s20  ;;  %v1790_v49 = vadd.f32 %v1784_v62, %v1774_v13 }
 0x894   : > { %1817 = vrot.lane.b32.xlu0 %v1797_v25, %s2544_s20  ;;  %v1791_v14 = vadd.f32 %v1784_v62, %v1775_v16 }
 0x896   : > { %v1796_v18 = vpack.c.bf16 %v1791_v14, %v1790_v49 }
 0x898   : > { %1815 = vrot.lane.b32.xlu1 %v1796_v18, %s2544_s20 }
 0x901   : > { %v1812_v20 = vpop.permute.xlu1 %1811 }
 0x902   : > { %2388 = vmatprep.mubr.msk.bf16.mxu0 %vm867_vm3, %v1812_v20 }
 0x905   : > { %v1814_v15 = vpop.permute.xlu1 %1813 }
 0x906   : > { %2389 = vmatmul.mubr.msk.bf16.vlgmr.msra.gmra.mrb[16].mxu0 %vm867_vm3, %v1814_v15  ;;  %v1818_v7 = vpop.permute.xlu0 %1817 }
 0x90a   : > { %v1816_v39 = vpop.permute.xlu1 %1815 }
 0x90b   : > { %2392 = vmatprep.mubr.msk.bf16.mxu0 %vm867_vm3, %v1816_v39 }
 0x90e   : > { %2393 = vmatmul.mubr.msk.bf16.gmra.mrb[20].mxu0 %vm867_vm3, %v1818_v7 }
 0x9d9   : > { %v2390_v29 = vpop.f32.mrb[16].mxu0 }
 0x9da   : > { %v3157_v22 = vadd.f32 %v2390_v29, %v2267_v4  ;;  %v1871_v21 = vpop.f32.mrb[17].mxu0 }
 0x9db   : > { %v3159_v32 = vadd.f32 %v2267_v4, %v1871_v21  ;;  %v2391_v28 = vpop.f32.mrb[18].mxu0 }
 0x9dc   : > { %v1912_v23 = vmul.f32 0.044715, %v3157_v22  ;;  %v3162_v35 = vadd.f32 %v2391_v28, %v2267_v4  ;;  %v1874_v36 = vpop.f32.mrb[19].mxu0 }
 0x9dd   : > { %v1910_v37 = vmul.f32 0.044715, %v3159_v32  ;;  %v3165_v30 = vadd.f32 %v2267_v4, %v1874_v36 }
 0x9de   : > { %v1920_v38 = vmul.f32 %v1912_v23, %v3157_v22  ;;  %v1913_v44 = vmul.f32 0.044715, %v3162_v35 }
 0x9df   : > { %v1918_v46 = vmul.f32 %v1910_v37, %v3159_v32  ;;  %v1911_v40 = vmul.f32 0.044715, %v3165_v30 }
 0x9e0   : > { %v1928_v41 = vmul.f32 %v1920_v38, %v3157_v22  ;;  %v1921_v50 = vmul.f32 %v1913_v44, %v3162_v35  ;;  %v1904_v38 = vmul.f32 0.5, %v3157_v22  ;;  %v1905_v44 = vmul.f32 0.5, %v3162_v35 }
 0x9e1   : > { %v1926_v57 = vmul.f32 %v1918_v46, %v3159_v32  ;;  %v1919_v45 = vmul.f32 %v1911_v40, %v3165_v30  ;;  %v2394_v52 = vpop.f32.mrb[20].mxu0  ;;  %v1902_v40 = vmul.f32 0.5, %v3159_v32 }
 0x9e2   : > { %v1936_v43 = vadd.f32 %v1928_v41, %v3157_v22  ;;  %v1929_v51 = vmul.f32 %v1921_v50, %v3162_v35  ;;  %v3177_v61 = vadd.f32 %v2394_v52, %v2267_v4  ;;  %v1887_v62 = vpop.f32.mrb[21].mxu0  ;;  %v1903_v41 = vmul.f32 0.5, %v3165_v30 }
 0x9e3   : > { %v1934_v63 = vadd.f32 %v1926_v57, %v3159_v32  ;;  %v1927_v0 = vmul.f32 %v1919_v45, %v3165_v30  ;;  %v3181_v3 = vadd.f32 %v2267_v4, %v1887_v62  ;;  %v2395_v1 = vpop.f32.mrb[22].mxu0 }
 0x9e4   : > { %v1944_v2 = vmul.f32 0.7978846, %v1936_v43  ;;  %v1937_v19 = vadd.f32 %v1929_v51, %v3162_v35  ;;  %v1916_v55 = vmul.f32 0.044715, %v3177_v61  ;;  %v1899_v56 = vadd.f32 %v2395_v1, %v2267_v4  ;;  %v1890_v17 = vpop.f32.mrb[23].mxu0 }
 0x9e5   : > { %v1942_v31 = vmul.f32 0.7978846, %v1934_v63  ;;  %v1935_v42 = vadd.f32 %v1927_v0, %v3165_v30  ;;  %v1914_v6 = vmul.f32 0.044715, %v3181_v3  ;;  %v1891_v9 = vadd.f32 %v2267_v4, %v1890_v17 }
 0x9e6   : > { %2517 = vtanh.f32 %v1944_v2  ;;  %v1945_v27 = vmul.f32 0.7978846, %v1937_v19  ;;  %v1924_v33 = vmul.f32 %v1916_v55, %v3177_v61  ;;  %v1917_v26 = vmul.f32 0.044715, %v1899_v56 }
 0x9e7   : > { %2519 = vtanh.f32 %v1942_v31  ;;  %v1943_v5 = vmul.f32 0.7978846, %v1935_v42  ;;  %v1922_v10 = vmul.f32 %v1914_v6, %v3181_v3  ;;  %v1915_v11 = vmul.f32 0.044715, %v1891_v9 }
 0x9e8   : > { %2521 = vtanh.f32 %v1945_v27  ;;  %v1932_v12 = vmul.f32 %v1924_v33, %v3177_v61  ;;  %v1925_v8 = vmul.f32 %v1917_v26, %v1899_v56  ;;  %v1908_v32 = vmul.f32 0.5, %v3177_v61 }
 0x9e9   : > { %2523 = vtanh.f32 %v1943_v5  ;;  %v1930_v13 = vmul.f32 %v1922_v10, %v3181_v3  ;;  %v1923_v25 = vmul.f32 %v1915_v11, %v1891_v9  ;;  %v1909_v30 = vmul.f32 0.5, %v1899_v56 }
 0x9ea   : > { %v1940_v16 = vadd.f32 %v1932_v12, %v3177_v61  ;;  %v1933_v49 = vmul.f32 %v1925_v8, %v1899_v56  ;;  %v1906_v55 = vmul.f32 0.5, %v3181_v3  ;;  %v1907_v17 = vmul.f32 0.5, %v1891_v9  ;;  %v2273_v61 = vld [vmem:[%s3258_s13] ss:$0 sm:$0xff] }
 0x9eb   : > { %v1938_v14 = vadd.f32 %v1930_v13, %v3181_v3  ;;  %v1931_v18 = vmul.f32 %v1923_v25, %v1891_v9 }
 0x9ec   : > { %v1948_v20 = vmul.f32 0.7978846, %v1940_v16  ;;  %v1941_v15 = vadd.f32 %v1933_v49, %v1899_v56 }
 0x9ed   : > { %v1946_v39 = vmul.f32 0.7978846, %v1938_v14  ;;  %v1939_v7 = vadd.f32 %v1931_v18, %v1891_v9 }
 0x9ee   : > { %2525 = vtanh.f32 %v1948_v20  ;;  %v1949_v24 = vmul.f32 0.7978846, %v1941_v15 }
 0x9ef   : > { %2527 = vtanh.f32 %v1946_v39  ;;  %v1947_v4 = vmul.f32 0.7978846, %v1939_v7 }
 0x9f0   : > { %v2518_v29 = vpop.eup %2517  ;;  %2529 = vtanh.f32 %v1949_v24 }
 0x9f1   : > { %v2520_v21 = vpop.eup %2519  ;;  %v1960_v28 = vadd.f32 1.0, %v2518_v29  ;;  %2531 = vtanh.f32 %v1947_v4 }
 0x9f2   : > { %v2522_v23 = vpop.eup %2521  ;;  %v1958_v36 = vadd.f32 1.0, %v2520_v21 }
 0x9f3   : > { %v2524_v37 = vpop.eup %2523  ;;  %v1961_v46 = vadd.f32 1.0, %v2522_v23  ;;  %v1968_v57 = vmul.f32 %v1960_v28, %v1904_v38 }
 0x9f4   : > { %v1959_v50 = vadd.f32 1.0, %v2524_v37  ;;  %v1966_v52 = vmul.f32 %v1958_v36, %v1902_v40 }
 0x9f5   : > { %v1969_v45 = vmul.f32 %v1961_v46, %v1905_v44 }
 0x9f6   : > { %v1967_v43 = vmul.f32 %v1959_v50, %v1903_v41 }
 0x9f7   : > { %v1975_v51 = vpack.c.bf16 %v1969_v45, %v1968_v57 }
 0x9f8   : > { %v2526_v62 = vpop.eup %2525  ;;  %v1974_v63 = vpack.c.bf16 %v1967_v43, %v1966_v52 }
 0x9f9   : > { %v2528_v0 = vpop.eup %2527  ;;  %v1964_v1 = vadd.f32 1.0, %v2526_v62 }
 0x9fa   : > { %v2530_v2 = vpop.eup %2529  ;;  %2398 = vmatprep.mubr.msk.bf16.mxu1 %vm867_vm3, %v1974_v63  ;;  %v1962_v22 = vadd.f32 1.0, %v2528_v0 }
 0x9fb   : > { %v2532_v35 = vpop.eup %2531  ;;  %2399 = vmatmul.mubr.msk.bf16.vlgmr.msra.gmra.mrb[36].mxu1 %vm867_vm3, %v1975_v51  ;;  %v1965_v19 = vadd.f32 1.0, %v2530_v2  ;;  %v1972_v42 = vmul.f32 %v1964_v1, %v1908_v32 }
 0x9fc   : > { %v1963_v31 = vadd.f32 1.0, %v2532_v35  ;;  %v1970_v27 = vmul.f32 %v1962_v22, %v1906_v55 }
 0x9fd   : > { %v1973_v6 = vmul.f32 %v1965_v19, %v1909_v30 }
 0x9fe   : > { %v1971_v33 = vmul.f32 %v1963_v31, %v1907_v17 }
 0x9ff   : > { %v1977_v26 = vpack.c.bf16 %v1973_v6, %v1972_v42 }
 0xa00   : > { %v1976_v5 = vpack.c.bf16 %v1971_v33, %v1970_v27 }
 0xa02   : > { %2402 = vmatprep.mubr.msk.bf16.mxu1 %vm867_vm3, %v1976_v5 }
 0xa03   : > { %2403 = vmatmul.mubr.msk.bf16.gmra.mrb[40].mxu1 %vm867_vm3, %v1977_v26 }
 0xace   : > { %v2400_v56 = vpop.f32.mrb[36].mxu1 }
 0xacf   : > { %v2048_v10 = vadd.f32 %v2400_v56, %v2273_v61  ;;  %v2039_v11 = vpop.f32.mrb[37].mxu1 }
 0xad0   : > { %v2401_v3 = vpop.f32.mrb[38].mxu1  ;;  %v2040_v8 = vadd.f32 %v2273_v61, %v2039_v11 }
 0xad1   : > { %v2051_v9 = vadd.f32 %v2401_v3, %v2273_v61  ;;  %2082 = vrot.lane.b32.xlu1 %v2048_v10, %s2547_s23  ;;  %v2042_v12 = vpop.f32.mrb[39].mxu1 }
 0xad2   : > { %v2043_v13 = vadd.f32 %v2273_v61, %v2042_v12 }
 0xad3   : > { %2084 = vrot.lane.b32.xlu0 %v2051_v9, %s2547_s23 }
 0xad5   : > { %2078 = vrot.lane.b32.xlu1 %v2040_v8, %s2547_s23 }
 0xad6   : > { %v2404_v25 = vpop.f32.mrb[40].mxu1 }
 0xad7   : > { %2080 = vrot.lane.b32.xlu0 %v2043_v13, %s2547_s23  ;;  %v2055_v16 = vpop.f32.mrb[41].mxu1  ;;  %v2064_v15 = vadd.f32 %v2404_v25, %v2273_v61 }
 0xad8   : > { %v2056_v49 = vadd.f32 %v2273_v61, %v2055_v16  ;;  %v2405_v14 = vpop.f32.mrb[42].mxu1 }
 0xad9   : > { %v2058_v18 = vpop.f32.mrb[43].mxu1  ;;  %v2067_v39 = vadd.f32 %v2405_v14, %v2273_v61 }
 0xada   : > { %v2059_v20 = vadd.f32 %v2273_v61, %v2058_v18  ;;  %2086 = vrot.lane.b32.xlu1 %v2056_v49, %s2547_s23 }
 0xadc   : > { %2088 = vrot.lane.b32.xlu0 %v2059_v20, %s2547_s23 }
 0xade   : > { %2090 = vrot.lane.b32.xlu1 %v2064_v15, %s2547_s23 }
 0xae0   : > { %2092 = vrot.lane.b32.xlu0 %v2067_v39, %s2547_s23  ;;  %s2290_s23 = sshll.u32 %s3261_s30, 5 }
 0xae1   : > { %s467_s28 = scalar_lea.vmem %s3259_s14, %s2290_s23 }
 0xb43   : > { %v2083_v7 = vpop.permute.xlu1 %2082 }
 0xb44   : > { %v2104_v24 = vadd.f32 %v2083_v7, %v3032_v34 }
 0xb45   : > { %v2085_v4 = vpop.permute.xlu0 %2084 }
 0xb46   : > { %v2293_v29 = vpack.c.bf16 %v2104_v24, %v2104_v24  ;;  %v2105_v21 = vadd.f32 %v2085_v4, %v3034_v58 }
 0xb47   : > { %v2079_v28 = vpop.permute.xlu1 %2078 }
 0xb48   : > { %v2294_v23 = vpack.c.bf16 %v2105_v21, %v2105_v21  ;;  %v2102_v36 = vadd.f32 %v2079_v28, %v3022_v47  ;;  %2138 = vrot.lane.b32.xlu1 %v2293_v29, %s2544_s20 }
 0xb49   : > { %v2081_v37 = vpop.permute.xlu0 %2080 }
 0xb4a   : > { %v2291_v38 = vpack.c.bf16 %v2102_v36, %v2102_v36  ;;  %v2103_v44 = vadd.f32 %v2081_v37, %v3024_v48  ;;  %2140 = vrot.lane.b32.xlu0 %v2294_v23, %s2544_s20 }
 0xb4c   : > { %v2292_v46 = vpack.c.bf16 %v2103_v44, %v2103_v44  ;;  %2134 = vrot.lane.b32.xlu1 %v2291_v38, %s2544_s20  ;;  %v2087_v34 = vpop.permute.xlu1 %2086 }
 0xb4d   : > { %v2106_v40 = vadd.f32 %v2087_v34, %v3044_v53 }
 0xb4e   : > { %2136 = vrot.lane.b32.xlu0 %v2292_v46, %s2544_s20  ;;  %v2089_v58 = vpop.permute.xlu0 %2088 }
 0xb4f   : > { %v2295_v41 = vpack.c.bf16 %v2106_v40, %v2106_v40  ;;  %v2107_v47 = vadd.f32 %v2089_v58, %v3042_v54 }
 0xb50   : > { %v2091_v50 = vpop.permute.xlu1 %2090 }
 0xb51   : > { %v2296_v57 = vpack.c.bf16 %v2107_v47, %v2107_v47  ;;  %v2108_v45 = vadd.f32 %v2091_v50, %v3054_v60  ;;  %2142 = vrot.lane.b32.xlu1 %v2295_v41, %s2544_s20 }
 0xb52   : > { %v2093_v48 = vpop.permute.xlu0 %2092 }
 0xb53   : > { %v2297_v52 = vpack.c.bf16 %v2108_v45, %v2108_v45  ;;  %v2109_v43 = vadd.f32 %v2093_v48, %v3052_v59  ;;  %2144 = vrot.lane.b32.xlu0 %v2296_v57, %s2544_s20 }
 0xb55   : > { %v2298_v53 = vpack.c.bf16 %v2109_v43, %v2109_v43  ;;  %2146 = vrot.lane.b32.xlu1 %v2297_v52, %s2544_s20 }
 0xb57   : > { %2148 = vrot.lane.b32.xlu0 %v2298_v53, %s2544_s20 }
 0xbba   : > { %v2139_v54 = vpop.permute.xlu1 %2138 }
 0xbbb   : > { %2161 = vst.msk [vmem:[%s467_s28 + $0x8] sm:$0xf] %vm2158_vm7, %v2139_v54 }
 0xbbc   : > { %v2141_v60 = vpop.permute.xlu0 %2140 }
 0xbbd   : > { %2162 = vst.msk [vmem:[%s467_s28 + $0xc] sm:$0xf] %vm2158_vm7, %v2141_v60 }
 0xbbe   : > { %v2135_v59 = vpop.permute.xlu1 %2134 }
 0xbbf   : > { %2159 = vst.msk [vmem:[%s467_s28] sm:$0xf] %vm2158_vm7, %v2135_v59 }
 0xbc0   : > { %v2137_v51 = vpop.permute.xlu0 %2136 }
 0xbc1   : > { %2160 = vst.msk [vmem:[%s467_s28 + $0x4] sm:$0xf] %vm2158_vm7, %v2137_v51 }
 0xbc3   : > { %v2143_v62 = vpop.permute.xlu1 %2142 }
 0xbc4   : > { %2163 = vst.msk [vmem:[%s467_s28 + $0x10] sm:$0xf] %vm2158_vm7, %v2143_v62 }
 0xbc5   : > { %v2145_v63 = vpop.permute.xlu0 %2144 }
 0xbc6   : > { %2164 = vst.msk [vmem:[%s467_s28 + $0x14] sm:$0xf] %vm2158_vm7, %v2145_v63 }
 0xbc7   : > { %v2147_v0 = vpop.permute.xlu1 %2146 }
 0xbc8   : > { %2165 = vst.msk [vmem:[%s467_s28 + $0x18] sm:$0xf] %vm2158_vm7, %v2147_v0 }
 0xbc9   : > { %v2149_v1 = vpop.permute.xlu0 %2148 }
 0xbca   : > { %2166 = vst.msk [vmem:[%s467_s28 + $0x1c] sm:$0xf] %vm2158_vm7, %v2149_v1 }
 0xbcb PF: > { %s24_s29 = sadd.s32 1, %s2539_s29  }
 0xbcc   : > { %p21_p4 = scmp.ge.s32.totalorder %s24_s29, 4  }
 0xbce   :  { %23 = sbr.rel (!%p21_p4) target bundleno = 1 (0x1), region = 106 }

// kernel: _lambda_.7
= control target key start
LH: loop header
LB: loop body
LE: loop exit
PB: predicated region body
PF: predicated region fallthrough
CT: control target
= control target key end

     0   :  { %s1543_s29 = smov 0   ;;  %s1711_s0 = inlined_call_operand.vmem [shape: bf16[2,16,144], index: 0, kind: input, shape index: {}]   ;;  %s1712_s1 = inlined_call_operand.vmem [shape: f32[1,144], index: 1, kind: input, shape index: {}]   ;;  %s1713_s2 = inlined_call_operand.vmem [shape: f32[1,144], index: 2, kind: input, shape index: {}]   ;;  %s1714_s3 = inlined_call_operand.vmem [shape: bf16[144,48], index: 3, kind: input, shape index: {}]   ;;  %s1715_s4 = inlined_call_operand.vmem [shape: f32[1,48], index: 4, kind: input, shape index: {}]   ;;  %s1716_s5 = inlined_call_operand.vmem [shape: bf16[8,16], index: 5, kind: input, shape index: {}]   ;;  %s1717_s6 = inlined_call_operand.vmem [shape: bf16[16,16], index: 6, kind: input, shape index: {}]   ;;  %s1718_s7 = inlined_call_operand.vmem [shape: f32[1,16], index: 7, kind: input, shape index: {}, may-alias: {7,9,11,13}]   ;;  %s1719_s8 = inlined_call_operand.vmem [shape: f32[1,16], index: 8, kind: input, shape index: {}]   ;;  %s1720_s9 = inlined_call_operand.vmem [shape: f32[1,16], index: 9, kind: input, shape index: {}, may-alias: {7,9,11,13}]   ;;  %s1721_s10 = inlined_call_operand.vmem [shape: bf16[16,16], index: 10, kind: input, shape index: {}]   ;;  %s1722_s11 = inlined_call_operand.vmem [shape: f32[1,16], index: 11, kind: input, shape index: {}, may-alias: {7,9,11,13}]   ;;  %s1723_s12 = inlined_call_operand.vmem [shape: bf16[16,16], index: 12, kind: input, shape index: {}]   ;;  %s1724_s13 = inlined_call_operand.vmem [shape: f32[1,16], index: 13, kind: input, shape index: {}, may-alias: {7,9,11,13}]   ;;  %s1725_s14 = inlined_call_operand.vmem [shape: bf16[2,16,16], index: 14, kind: output, shape index: {}]  }
   0x1 LB: > { %s1305_s30 = sadd.s32 4294967295, %s1460_s29   ;;  %p1309_p0 = scmp.ge.s32.totalorder %s1460_s29, 1  ;;  %s1460_s29 = sphi %s1543_s29, %s24_s29  }
   0x2   : > { %p412_p1 = scmp.lt.s32.totalorder %s1460_s29, 3 }
   0x4   : > { %p413_p2 = pnand %p1309_p0, %p412_p1 }
   0x5   : > { %p458_p3 = scmp.lt.s32.totalorder (!%p413_p2), %s1305_s30, 1  ;;  %vm477_vm0 = vcmask (!%p413_p2), 130048   ;;  %v1418_v10 = vld [vmem:[%s1714_s3] sm:$0xff] (!%p413_p2)   ;;  %v1462_v11 = vmov (!%p413_p2), 0   ;;  %v1419_v12 = vld [vmem:[%s1714_s3 + $0x8] sm:$0xff] (!%p413_p2)   ;;  %v1420_v29 = vld [vmem:[%s1714_s3 + $0x10] sm:$0xff] (!%p413_p2)   ;;  %v516_v41 = vlaneseq (!%p413_p2) }
   0x6   : > { %416 = sbr.rel (%p413_p2) target bundleno = 2942 (0xb7e), region = 76  ;;  %629 = vmatprep.subr.bf16.mxu0 (!%p413_p2), %v1462_v11  ;;  %v1421_v30 = vld [vmem:[%s1714_s3 + $0x18] sm:$0xff] (!%p413_p2)   ;;  %v1422_v31 = vld [vmem:[%s1714_s3 + $0x20] sm:$0xff] (!%p413_p2)   ;;  %v1423_v32 = vld [vmem:[%s1714_s3 + $0x28] sm:$0xff] (!%p413_p2)   ;;  %v1463_v36 = vmov (!%p413_p2), 0.0   ;;  %vm1464_vm1 = vmmov (!%p413_p2), 0  }
   0x7   : > { %630 = vmatpush1.bf16.msra.mxu0 (!%p413_p2), %v1418_v10  ;;  %v1424_v33 = vld [vmem:[%s1714_s3 + $0x30] sm:$0xff] (!%p413_p2)   ;;  %v1425_v34 = vld [vmem:[%s1714_s3 + $0x38] sm:$0xff] (!%p413_p2)   ;;  %v1426_v35 = vld [vmem:[%s1714_s3 + $0x40] sm:$0xff] (!%p413_p2)   ;;  %1362 = vmatprep.subr.bf16.mxu1 (!%p413_p2), %v1463_v36  ;;  %v517_v44 = vshrl.u32 (!%p413_p2), %v516_v41, 7  ;;  %s1465_s17 = smov (!%p413_p2), 112   ;;  %vm808_vm2 = vcmask (!%p413_p2), 64512  }
   0x8   : > { %631 = vmatprep.subr.bf16.mxu0 (!%p413_p2), %v1462_v11  ;;  %v475_v47 = vld [vmem:[%s1712_s1] sm:$0x3] (!%p413_p2)  ;;  %1364 = vmatprep.mubr.msk.bf16.mxu1 (!%p413_p2), %vm1464_vm1, %v1463_v36  ;;  %s1467_s21 = smov (!%p413_p2), 32   ;;  %vm1247_vm3 = vcmask (!%p413_p2), 125952  }
   0x9   : > { %v518_v45 = vsub.s32 (!%p413_p2), 0, %v517_v44  ;;  %v522_v46 = vsub.s32 (!%p413_p2), 1, %v517_v44  ;;  %v476_v49 = vld [vmem:[%s1713_s2] sm:$0x3] (!%p413_p2) }
   0xb   : > { %632 = vmatpush1.bf16.msra.mxu0 (!%p413_p2), %v1419_v12  ;;  %v519_v51 = vrot.slane (!%p413_p2), %v475_v47, %v518_v45  ;;  %v523_v52 = vrot.slane (!%p413_p2), %v475_v47, %v522_v46  ;;  %v534_v55 = vrot.slane (!%p413_p2), %v476_v49, %v518_v45  ;;  %v538_v56 = vrot.slane (!%p413_p2), %v476_v49, %v522_v46 }
   0xc   : > { %633 = vmatprep.subr.bf16.mxu0 (!%p413_p2), %v1462_v11 }
   0xd   : > { %s1727_s30 = smov (!%p458_p3, %s1305_s30), 1 }
   0xe   : > { %s1344_s15 = sshll.u32 %s1727_s30, 4  ;;  %s1345_s24 = sshll.u32 %s1727_s30, 3 }
   0xf   : > { %s462_s18 = scalar_lea.vmem %s1711_s0, %s1344_s15  ;;  %634 = vmatpush1.bf16.msra.mxu0 %v1420_v29  ;;  %s467_s27 = scalar_lea.vmem %s1725_s14, %s1345_s24 }
  0x10   : > { %v469_v0 = vld [vmem:[%s462_s18] sm:$0xff]  ;;  %v470_v1 = vld [vmem:[%s462_s18 + $0x8] sm:$0xff]  ;;  %635 = vmatprep.subr.bf16.mxu0 %v1462_v11  ;;  %s1466_s18 = smov 96  }
  0x11   : > { %v471_v2 = vunpack.c.l.bf16 %v469_v0  ;;  %v472_v3 = vunpack.c.h.bf16 %v469_v0  ;;  %v474_v4 = vunpack.c.h.bf16 %v470_v1  ;;  %v473_v5 = vunpack.c.l.bf16 %v470_v1 }
  0x13   : > { %v478_v6 = vsel %vm477_vm0, %v472_v3, 0.0  ;;  %v482_v7 = vsel %vm477_vm0, %v474_v4, 0.0  ;;  %636 = vmatpush1.bf16.msra.mxu0 %v1421_v30 }
  0x14   : > { %v479_v8 = vadd.f32 %v478_v6, %v471_v2  ;;  %v483_v9 = vadd.f32 %v482_v7, %v473_v5  ;;  %637 = vmatprep.subr.bf16.mxu0 %v1462_v11  ;;  %v1314_v7 = vld [vmem:[%s1715_s4] ss:$0 sm:$0xff] }
  0x16   : > { %480 = vadd.xlane.f32.xlu0 %v479_v8 }
  0x17   : > { %638 = vmatpush1.bf16.msra.mxu0 %v1422_v31 }
  0x18   : > { %639 = vmatprep.subr.bf16.mxu0 %v1462_v11 }
  0x1a   : > { %484 = vadd.xlane.f32.xlu0 %v483_v9 }
  0x1b   : > { %640 = vmatpush1.bf16.msra.mxu0 %v1423_v32 }
  0x1c   : > { %641 = vmatprep.subr.bf16.mxu0 %v1462_v11 }
  0x1f   : > { %642 = vmatpush1.bf16.msra.mxu0 %v1424_v33 }
  0x20   : > { %643 = vmatprep.subr.bf16.mxu0 %v1462_v11 }
  0x23   : > { %644 = vmatpush1.bf16.msra.mxu0 %v1425_v34 }
  0x24   : > { %645 = vmatprep.subr.bf16.mxu0 %v1462_v11 }
  0x27   : > { %646 = vmatpush1.bf16.msra.mxu0 %v1426_v35 }
  0x28   : > { %1392 = vmatprep.subr.bf16.mxu0 %v1463_v36 }
  0xa3   : > { %v481_v13 = vpop.xlane.xlu0 %480 }
  0xa4   : > { %v487_v14 = vmul.f32 0.0069444445, %v481_v13 }
  0xa6   : > { %v489_v15 = vsub.f32 %v471_v2, %v487_v14  ;;  %v490_v16 = vsub.f32 %v472_v3, %v487_v14 }
  0xa7   : > { %v485_v17 = vpop.xlane.xlu0 %484 }
  0xa8   : > { %v488_v18 = vmul.f32 0.0069444445, %v485_v17  ;;  %v493_v19 = vmul.f32 %v489_v15, %v489_v15  ;;  %v494_v20 = vmul.f32 %v490_v16, %v490_v16 }
  0xaa   : > { %v491_v21 = vsub.f32 %v473_v5, %v488_v18  ;;  %v492_v22 = vsub.f32 %v474_v4, %v488_v18  ;;  %v497_v23 = vsel %vm477_vm0, %v494_v20, 0.0  ;;  %v671_v5 = vld [vmem:[%s1716_s5] sm:$0xf] }
  0xab   : > { %v498_v24 = vadd.f32 %v497_v23, %v493_v19  ;;  %v676_v6 = vsel %vm477_vm0, %v671_v5, 0 }
  0xac   : > { %v495_v25 = vmul.f32 %v491_v21, %v491_v21  ;;  %v496_v26 = vmul.f32 %v492_v22, %v492_v22  ;;  %1363 = vmatpush3.bf16.xpose.msra.mxu1 %v676_v6 }
  0xad   : > { %499 = vadd.xlane.f32.xlu1 %v498_v24  ;;  %1368 = vmatprep.subr.bf16.mxu1 %v1463_v36 }
  0xae   : > { %v501_v27 = vsel %vm477_vm0, %v496_v26, 0.0 }
  0xaf   : > { %v502_v28 = vadd.f32 %v501_v27, %v495_v25 }
  0xb1   : > { %503 = vadd.xlane.f32.xlu1 %v502_v28 }
 0x13a   : > { %v500_v37 = vpop.xlane.xlu1 %499 }
 0x13b   : > { %v505_v38 = vmul.f32 0.0069444445, %v500_v37 }
 0x13d   : > { %v507_v39 = vadd.f32 1e-05, %v505_v38 }
 0x13e   : > { %v504_v40 = vpop.xlane.xlu1 %503 }
 0x13f   : > { %1430 = vrsqrt.f32 %v507_v39  ;;  %v506_v42 = vmul.f32 0.0069444445, %v504_v40 }
 0x141   : > { %v508_v43 = vadd.f32 1e-05, %v506_v42 }
 0x143   : > { %1432 = vrsqrt.f32 %v508_v43 }
 0x149   : > { %v1431_v48 = vpop.eup %1430 }
 0x14a   : > { %v512_v50 = vmul.f32 %v1431_v48, %v490_v16  ;;  %v511_v53 = vmul.f32 %v1431_v48, %v489_v15 }
 0x14c   : > { %v527_v58 = vmul.f32 %v523_v52, %v512_v50  ;;  %v526_v60 = vmul.f32 %v519_v51, %v511_v53 }
 0x14d   : > { %v1433_v54 = vpop.eup %1432 }
 0x14e   : > { %v514_v57 = vmul.f32 %v1433_v54, %v492_v22  ;;  %v513_v59 = vmul.f32 %v1433_v54, %v491_v21  ;;  %v542_v63 = vadd.f32 %v538_v56, %v527_v58  ;;  %v541_v1 = vadd.f32 %v534_v55, %v526_v60 }
 0x150   : > { %v529_v61 = vmul.f32 %v523_v52, %v514_v57  ;;  %v528_v62 = vmul.f32 %v519_v51, %v513_v59 }
 0x152   : > { %v544_v0 = vadd.f32 %v538_v56, %v529_v61  ;;  %v543_v2 = vadd.f32 %v534_v55, %v528_v62 }
 0x154   : > { %v546_v3 = vpack.c.bf16 %v544_v0, %v542_v63  ;;  %v545_v4 = vpack.c.bf16 %v543_v2, %v541_v1 }
 0x156   : > { %1324 = vmatprep.mubr.msk.bf16.mxu0 %vm477_vm0, %v546_v3 }
 0x157   : > { %662 = vmatmul.mubr.bf16.vlgmr.msra.gmra.mrb[0].mxu0 %v545_v4 }
 0x158   : > { %1394 = vmatprep.mubr.msk.bf16.mxu0 %vm1464_vm1, %v1463_v36 }
 0x22a   : > { %v663_v8 = vpop.f32.mrb[0].mxu0 }
 0x22b   : > { %v1609_v9 = vadd.f32 %v1314_v7, %v663_v8  ;;  %v665_v10 = vpop.f32.mrb[1].mxu0 }
 0x22c   : > { %v666_v11 = vpop.f32.mrb[2].mxu0 }
 0x22d   : > { %v1611_v12 = vadd.f32 %v1314_v7, %v666_v11  ;;  %v668_v13 = vpop.f32.mrb[3].mxu0  ;;  %v766_v14 = vmul.f32 %v1609_v9, %v1609_v9 }
 0x22f   : > { %v670_v15 = vpack.c.bf16 %v1611_v12, %v1609_v9  ;;  %v768_v16 = vsel %vm477_vm0, %v766_v14, 0.0  ;;  %v767_v17 = vmul.f32 %v1611_v12, %v1611_v12 }
 0x230   : > { %769 = vadd.xlane.f32.xlu0 %v768_v16 }
 0x231   : > { %1365 = vmatmul.mubr.msk.bf16.vlgmr.msra.gmra.mrb[0].mxu1 %vm477_vm0, %v670_v15  ;;  %v771_v18 = vsel %vm477_vm0, %v767_v17, 0.0 }
 0x232   : > { %772 = vadd.xlane.f32.xlu1 %v771_v18  ;;  %1369 = vmatpush3.bf16.xpose.msra.mxu1 %v676_v6  ;;  %v1427_v18 = vld [vmem:[%s1717_s6] sm:$0xff]  }
 0x233   : > { %1370 = vmatprep.mubr.msk.bf16.mxu1 %vm1464_vm1, %v1463_v36  ;;  %1374 = vmatprep.subr.bf16.mxu1 %v1463_v36 }
 0x243   : > { %720 = vrot.lane.b32.xlu1 %v670_v15, %s1465_s17 }
 0x246   : > { %827 = vrot.lane.b32.xlu0 %v670_v15, %s1466_s18 }
 0x24a   : > { %786 = vrot.lane.b32.xlu0 %v766_v14, %s1465_s17 }
 0x24e   : > { %788 = vrot.lane.b32.xlu0 %v767_v17, %s1465_s17 }
 0x2bd   : > { %v770_v19 = vpop.xlane.xlu0 %769 }
 0x2be   : > { %v774_v27 = vmul.f32 0.5, %v770_v19 }
 0x2bf   : > { %v773_v20 = vpop.xlane.xlu1 %772 }
 0x2c0   : > { %v775_v29 = vmul.f32 0.5, %v773_v20 }
 0x2c1   : > { %v828_v21 = vpop.permute.xlu0 %827 }
 0x2c2   : > { %830 = vxpose.xlu1.c.b16.start.end [1/1] (short) (narrow) %v828_v21, 16 }
 0x2c3   : > { %v721_v22 = vpop.permute.xlu1 %720 }
 0x2c4   : > { %1371 = vmatmul.mubr.msk.bf16.vlgmr.msra.gmra.mrb[4].mxu1 %vm477_vm0, %v721_v22 }
 0x2c5   : > { %v787_v23 = vpop.permute.xlu0 %786  ;;  %1376 = vmatprep.mubr.msk.bf16.mxu1 %vm1464_vm1, %v1463_v36 }
 0x2c6   : > { %v792_v24 = vsel %vm477_vm0, %v787_v23, 0.0 }
 0x2c7   : > { %793 = vadd.xlane.f32.xlu0 %v792_v24 }
 0x2c9   : > { %v789_v25 = vpop.permute.xlu0 %788 }
 0x2ca   : > { %v795_v26 = vsel %vm477_vm0, %v789_v25, 0.0 }
 0x2cf   : > { %796 = vadd.xlane.f32.xlu1 %v795_v26 }
 0x304   : > { %v712_v28 = vpop.f32.mrb[0].mxu1 }
 0x305   : > { %v776_v30 = vsub.f32 %v712_v28, %v774_v27  ;;  %v1366_v31 = vpop.f32.mrb[1].mxu1 }
 0x306   : > { %v715_v32 = vpop.f32.mrb[2].mxu1 }
 0x307   : > { %v778_v33 = vmul.f32 1.442695, %v776_v30  ;;  %v777_v34 = vsub.f32 %v715_v32, %v775_v29  ;;  %v1367_v35 = vpop.f32.mrb[3].mxu1 }
 0x308   : > { %v1331_v35 = vld [vmem:[%s1718_s7] ss:$0 sm:$0xff] }
 0x309   : > { %1434 = vpow2.f32 %v778_v33  ;;  %v780_v37 = vmul.f32 1.442695, %v777_v34 }
 0x30b   : > { %1436 = vpow2.f32 %v780_v37 }
 0x313   : > { %v1435_v38 = vpop.eup %1434 }
 0x314   : > { %v782_v39 = vmul.f32 0.35355338, %v1435_v38 }
 0x315   : > { %v1437_v40 = vpop.eup %1436 }
 0x316   : > { %v783_v41 = vmul.f32 0.35355338, %v1437_v40  ;;  %v809_v42 = vsel %vm808_vm2, %v782_v39, 0.0 }
 0x318   : > { %v810_v43 = vsel %vm808_vm2, %v783_v41, 0.0  ;;  %v826_v44 = vpack.c.bf16 %v783_v41, %v782_v39 }
 0x319   : > { %v811_v45 = vadd.f32 %v810_v43, %v809_v42 }
 0x31a   : > { %1375 = vmatpush3.bf16.msra.mxu1 %v826_v44 }
 0x31b   : > { %1380 = vmatprep.subr.bf16.mxu1 %v1463_v36  ;;  %v812_v47 = vrot.slane %v811_v45, 4 }
 0x31d   : > { %v813_v52 = vadd.f32 %v812_v47, %v811_v45 }
 0x31f   : > { %v814_v60 = vrot.slane %v813_v52, 2 }
 0x321   : > { %v815_v62 = vadd.f32 %v814_v60, %v813_v52  ;;  %v1428_v60 = vld [vmem:[%s1721_s10] sm:$0xff]  }
 0x322   : > { %1393 = vmatpush3.bf16.msra.mxu0 %v1428_v60 }
 0x323   : > { %v816_v63 = vrot.slane %v815_v62, 1 }
 0x325   : > { %v817_v2 = vadd.f32 %v816_v63, %v815_v62 }
 0x328   : > { %v838_v46 = vpop.trf.xlu1 }
 0x329   : > { %1377 = vmatmul.mubr.msk.bf16.vlgmr.msra.gmra.mrb[8].mxu1 %vm477_vm0, %v838_v46 }
 0x32a   : > { %1382 = vmatprep.mubr.msk.bf16.mxu1 %vm1464_vm1, %v1463_v36 }
 0x354   : > { %v794_v48 = vpop.xlane.xlu0 %793 }
 0x355   : > { %v798_v50 = vmul.f32 0.5, %v794_v48 }
 0x35c   : > { %v797_v49 = vpop.xlane.xlu1 %796 }
 0x35d   : > { %v799_v53 = vmul.f32 0.5, %v797_v49 }
 0x397   : > { %v759_v51 = vpop.f32.mrb[4].mxu1 }
 0x398   : > { %v800_v54 = vsub.f32 %v759_v51, %v798_v50  ;;  %v1372_v55 = vpop.f32.mrb[5].mxu1 }
 0x399   : > { %v762_v56 = vpop.f32.mrb[6].mxu1 }
 0x39a   : > { %v802_v57 = vmul.f32 1.442695, %v800_v54  ;;  %v801_v58 = vsub.f32 %v762_v56, %v799_v53  ;;  %v1373_v59 = vpop.f32.mrb[7].mxu1 }
 0x39b   : > { %v1332_v59 = vld [vmem:[%s1719_s8] ss:$0 sm:$0xff] }
 0x39c   : > { %1438 = vpow2.f32 %v802_v57  ;;  %v804_v61 = vmul.f32 1.442695, %v801_v58  ;;  %v1333_v58 = vld [vmem:[%s1720_s9] ss:$0 sm:$0xff] }
 0x39e   : > { %1440 = vpow2.f32 %v804_v61 }
 0x3a6   : > { %v1439_v0 = vpop.eup %1438 }
 0x3a7   : > { %v806_v1 = vmul.f32 0.35355338, %v1439_v0 }
 0x3a8   : > { %v1441_v3 = vpop.eup %1440 }
 0x3a9   : > { %v807_v4 = vmul.f32 0.35355338, %v1441_v3  ;;  %v818_v5 = vmul.f32 %v817_v2, %v806_v1 }
 0x3ab   : > { %v890_v6 = vpack.c.bf16 %v807_v4, %v806_v1  ;;  %v820_v7 = vsel %vm808_vm2, %v818_v5, 0.0  ;;  %v819_v8 = vmul.f32 %v817_v2, %v807_v4 }
 0x3ac   : > { %821 = vadd.xlane.f32.xlu0 %v820_v7 }
 0x3ad   : > { %v823_v10 = vsel %vm808_vm2, %v819_v8, 0.0 }
 0x3b0   : > { %824 = vadd.xlane.f32.xlu0 %v823_v10 }
 0x3fc   : > { %v883_v11 = vpop.f32.mrb[8].mxu1 }
 0x3fd   : > { %v1378_v13 = vpop.f32.mrb[9].mxu1 }
 0x3fe   : > { %v886_v14 = vpop.f32.mrb[10].mxu1 }
 0x3ff   : > { %v891_v15 = vpack.c.bf16 %v886_v14, %v883_v11  ;;  %v1379_v16 = vpop.f32.mrb[11].mxu1 }
 0x401   : > { %v896_v17 = vsel %vm808_vm2, %v891_v15, 0 }
 0x402   : > { %1381 = vmatpush3.bf16.xpose.msra.mxu1 %v896_v17  ;;  %v1429_v17 = vld [vmem:[%s1723_s12] sm:$0xff]  }
 0x403   : > { %1386 = vmatprep.subr.bf16.mxu1 %v1463_v36 }
 0x409   : > { %1383 = vmatmul.mubr.msk.bf16.vlgmr.msra.gmra.mrb[12].mxu1 %vm808_vm2, %v890_v6 }
 0x40a   : > { %1388 = vmatprep.mubr.msk.bf16.mxu1 %vm1464_vm1, %v1463_v36  ;;  %1387 = vmatpush3.bf16.msra.mxu1 %v1427_v18  ;;  %v1334_v18 = vld [vmem:[%s1722_s11] ss:$0 sm:$0xff] }
 0x40b   : > { %1398 = vmatprep.subr.bf16.mxu1 %v1463_v36 }
 0x439   : > { %v822_v19 = vpop.xlane.xlu0 %821 }
 0x43a   : > { %v939_v21 = vadd.f32 1e-08, %v822_v19 }
 0x43c   : > { %1442 = vrcp.f32 %v939_v21 }
 0x43d   : > { %v825_v20 = vpop.xlane.xlu0 %824 }
 0x43e   : > { %v940_v22 = vadd.f32 1e-08, %v825_v20 }
 0x440   : > { %1444 = vrcp.f32 %v940_v22 }
 0x446   : > { %v1443_v24 = vpop.eup %1442 }
 0x44a   : > { %v1445_v26 = vpop.eup %1444 }
 0x4dc   : > { %v932_v23 = vpop.f32.mrb[12].mxu1 }
 0x4dd   : > { %v1384_v25 = vpop.f32.mrb[13].mxu1  ;;  %v943_v28 = vmul.f32 %v1443_v24, %v932_v23 }
 0x4de   : > { %v935_v27 = vpop.f32.mrb[14].mxu1 }
 0x4df   : > { %v944_v29 = vmul.f32 %v1445_v26, %v935_v27  ;;  %v1385_v30 = vpop.f32.mrb[15].mxu1 }
 0x4e1   : > { %v945_v31 = vpack.c.bf16 %v944_v29, %v943_v28 }
 0x4e3   : > { %1389 = vmatmul.mubr.msk.bf16.vlgmr.msra.gmra.mrb[16].mxu1 %vm477_vm0, %v945_v31 }
 0x4e4   : > { %1400 = vmatprep.mubr.msk.bf16.mxu1 %vm1464_vm1, %v1463_v36  ;;  %1399 = vmatpush3.bf16.msra.mxu1 %v1429_v17 }
 0x5b6   : > { %v991_v32 = vpop.f32.mrb[16].mxu1 }
 0x5b7   : > { %1000 = vrot.lane.b32.xlu1 %v991_v32, %s1467_s21  ;;  %v1390_v33 = vpop.f32.mrb[17].mxu1 }
 0x5b8   : > { %v994_v34 = vpop.f32.mrb[18].mxu1 }
 0x5b9   : > { %1002 = vrot.lane.b32.xlu0 %v994_v34, %s1467_s21  ;;  %v1391_v37 = vpop.f32.mrb[19].mxu1 }
 0x5bb   : > { %1014 = vrot.lane.b32.xlu1 %v1331_v35, %s1467_s21 }
 0x629   : > { %v1001_v38 = vpop.permute.xlu1 %1000 }
 0x62a   : > { %v1006_v40 = vadd.f32 %v1001_v38, %v1609_v9 }
 0x62b   : > { %v1003_v39 = vpop.permute.xlu0 %1002 }
 0x62c   : > { %v1007_v41 = vadd.f32 %v1003_v39, %v1611_v12 }
 0x62d   : > { %v1015_v36 = vpop.permute.xlu1 %1014 }
 0x62e   : > { %v1659_v42 = vadd.f32 %v1015_v36, %v1006_v40  ;;  %v1663_v43 = vadd.f32 %v1015_v36, %v1007_v41 }
 0x630   : > { %1023 = vrot.lane.b32.xlu1 %v1659_v42, %s1466_s18 }
 0x634   : > { %1025 = vrot.lane.b32.xlu1 %v1663_v43, %s1466_s18 }
 0x6a2   : > { %v1024_v44 = vpop.permute.xlu1 %1023 }
 0x6a3   : > { %v1029_v45 = vsel %vm477_vm0, %v1024_v44, 0.0 }
 0x6a4   : > { %1030 = vadd.xlane.f32.xlu0 %v1029_v45 }
 0x6a6   : > { %v1026_v46 = vpop.permute.xlu1 %1025 }
 0x6a7   : > { %v1032_v9 = vsel %vm477_vm0, %v1026_v46, 0.0  ;;  %v1337_v46 = vld [vmem:[%s1724_s13] ss:$0 sm:$0xff] }
 0x6a8   : > { %1033 = vadd.xlane.f32.xlu1 %v1032_v9 }
 0x731   : > { %v1031_v47 = vpop.xlane.xlu0 %1030 }
 0x732   : > { %v1036_v12 = vmul.f32 0.0625, %v1031_v47 }
 0x734   : > { %v1038_v48 = vsub.f32 %v1659_v42, %v1036_v12 }
 0x735   : > { %v1034_v49 = vpop.xlane.xlu1 %1033 }
 0x736   : > { %v1037_v50 = vmul.f32 0.0625, %v1034_v49  ;;  %v1040_v51 = vmul.f32 %v1038_v48, %v1038_v48 }
 0x738   : > { %v1039_v52 = vsub.f32 %v1663_v43, %v1037_v50  ;;  %1044 = vrot.lane.b32.xlu0 %v1040_v51, %s1466_s18 }
 0x73a   : > { %v1041_v53 = vmul.f32 %v1039_v52, %v1039_v52 }
 0x73c   : > { %1046 = vrot.lane.b32.xlu1 %v1041_v53, %s1466_s18 }
 0x7aa   : > { %v1045_v54 = vpop.permute.xlu0 %1044 }
 0x7ab   : > { %v1050_v55 = vsel %vm477_vm0, %v1045_v54, 0.0 }
 0x7ac   : > { %1051 = vadd.xlane.f32.xlu0 %v1050_v55 }
 0x7ae   : > { %v1047_v56 = vpop.permute.xlu1 %1046 }
 0x7af   : > { %v1053_v57 = vsel %vm477_vm0, %v1047_v56, 0.0 }
 0x7b0   : > { %1054 = vadd.xlane.f32.xlu1 %v1053_v57 }
 0x7c1   : > { %1079 = vrot.lane.b32.xlu1 %v1333_v58, %s1467_s21 }
 0x7c2   : > { %1069 = vrot.lane.b32.xlu0 %v1332_v59, %s1467_s21 }
 0x839   : > { %v1052_v61 = vpop.xlane.xlu0 %1051 }
 0x83a   : > { %v1056_v62 = vmul.f32 0.0625, %v1052_v61 }
 0x83c   : > { %v1058_v63 = vadd.f32 1e-05, %v1056_v62 }
 0x83d   : > { %v1055_v0 = vpop.xlane.xlu1 %1054  ;;  %v1070_v5 = vpop.permute.xlu0 %1069 }
 0x83e   : > { %1446 = vrsqrt.f32 %v1058_v63  ;;  %v1057_v1 = vmul.f32 0.0625, %v1055_v0 }
 0x840   : > { %v1059_v2 = vadd.f32 1e-05, %v1057_v1 }
 0x841   : > { %v1080_v10 = vpop.permute.xlu1 %1079 }
 0x842   : > { %1448 = vrsqrt.f32 %v1059_v2 }
 0x848   : > { %v1447_v3 = vpop.eup %1446 }
 0x849   : > { %v1062_v4 = vmul.f32 %v1447_v3, %v1038_v48 }
 0x84b   : > { %v1072_v8 = vmul.f32 %v1070_v5, %v1062_v4 }
 0x84c   : > { %v1449_v6 = vpop.eup %1448 }
 0x84d   : > { %v1063_v7 = vmul.f32 %v1449_v6, %v1039_v52  ;;  %v1082_v13 = vadd.f32 %v1080_v10, %v1072_v8 }
 0x84f   : > { %v1073_v11 = vmul.f32 %v1070_v5, %v1063_v7 }
 0x851   : > { %v1083_v14 = vadd.f32 %v1080_v10, %v1073_v11 }
 0x853   : > { %v1084_v15 = vpack.c.bf16 %v1083_v14, %v1082_v13 }
 0x855   : > { %1095 = vrot.lane.b32.xlu0 %v1084_v15, %s1466_s18 }
 0x8c7   : > { %v1096_v16 = vpop.permute.xlu0 %1095 }
 0x8c8   : > { %1395 = vmatmul.mubr.msk.bf16.vlgmr.msra.gmra.mrb[4].mxu0 %vm477_vm0, %v1096_v16 }
 0x99b   : > { %v1140_v19 = vpop.f32.mrb[4].mxu0 }
 0x99c   : > { %v1141_v20 = vadd.f32 %v1334_v18, %v1140_v19  ;;  %v1396_v21 = vpop.f32.mrb[5].mxu0 }
 0x99d   : > { %v1143_v22 = vpop.f32.mrb[6].mxu0 }
 0x99e   : > { %v1149_v23 = vmul.f32 0.044715, %v1141_v20  ;;  %v1144_v24 = vadd.f32 %v1334_v18, %v1143_v22  ;;  %v1397_v25 = vpop.f32.mrb[7].mxu0  ;;  %v1147_v39 = vmul.f32 0.5, %v1141_v20 }
 0x9a0   : > { %v1151_v26 = vmul.f32 %v1149_v23, %v1141_v20  ;;  %v1150_v27 = vmul.f32 0.044715, %v1144_v24  ;;  %v1148_v40 = vmul.f32 0.5, %v1144_v24 }
 0x9a2   : > { %v1153_v28 = vmul.f32 %v1151_v26, %v1141_v20  ;;  %v1152_v29 = vmul.f32 %v1150_v27, %v1144_v24 }
 0x9a4   : > { %v1155_v30 = vadd.f32 %v1153_v28, %v1141_v20  ;;  %v1154_v31 = vmul.f32 %v1152_v29, %v1144_v24 }
 0x9a6   : > { %v1157_v32 = vmul.f32 0.7978846, %v1155_v30  ;;  %v1156_v33 = vadd.f32 %v1154_v31, %v1144_v24 }
 0x9a8   : > { %1450 = vtanh.f32 %v1157_v32  ;;  %v1158_v34 = vmul.f32 0.7978846, %v1156_v33 }
 0x9aa   : > { %1452 = vtanh.f32 %v1158_v34 }
 0x9b2   : > { %v1451_v35 = vpop.eup %1450 }
 0x9b3   : > { %v1161_v37 = vadd.f32 1.0, %v1451_v35 }
 0x9b4   : > { %v1453_v38 = vpop.eup %1452 }
 0x9b5   : > { %v1162_v36 = vadd.f32 1.0, %v1453_v38  ;;  %v1163_v41 = vmul.f32 %v1161_v37, %v1147_v39 }
 0x9b7   : > { %v1164_v44 = vmul.f32 %v1162_v36, %v1148_v40 }
 0x9b9   : > { %v1165_v45 = vpack.c.bf16 %v1164_v44, %v1163_v41 }
 0x9bb   : > { %1401 = vmatmul.mubr.msk.bf16.vlgmr.msra.gmra.mrb[20].mxu1 %vm477_vm0, %v1165_v45 }
 0xa8e   : > { %v1218_v9 = vpop.f32.mrb[20].mxu1 }
 0xa8f   : > { %v1219_v47 = vadd.f32 %v1337_v46, %v1218_v9  ;;  %v1402_v12 = vpop.f32.mrb[21].mxu1 }
 0xa90   : > { %v1221_v48 = vpop.f32.mrb[22].mxu1 }
 0xa91   : > { %v1222_v49 = vadd.f32 %v1337_v46, %v1221_v48  ;;  %1227 = vrot.lane.b32.xlu1 %v1219_v47, %s1467_s21  ;;  %v1403_v50 = vpop.f32.mrb[23].mxu1 }
 0xa93   : > { %1229 = vrot.lane.b32.xlu0 %v1222_v49, %s1467_s21 }
 0xb03   : > { %v1228_v51 = vpop.permute.xlu1 %1227 }
 0xb04   : > { %v1233_v52 = vadd.f32 %v1228_v51, %v1659_v42 }
 0xb05   : > { %v1230_v53 = vpop.permute.xlu0 %1229 }
 0xb06   : > { %v1346_v54 = vpack.c.bf16 %v1233_v52, %v1233_v52  ;;  %v1234_v55 = vadd.f32 %v1230_v53, %v1663_v43 }
 0xb08   : > { %v1347_v56 = vpack.c.bf16 %v1234_v55, %v1234_v55  ;;  %1241 = vrot.lane.b32.xlu1 %v1346_v54, %s1466_s18 }
 0xb0a   : > { %1243 = vrot.lane.b32.xlu0 %v1347_v56, %s1466_s18 }
 0xb7a   : > { %v1242_v57 = vpop.permute.xlu1 %1241 }
 0xb7b   : > { %1248 = vst.msk [vmem:[%s467_s27] sm:$0xf] %vm1247_vm3, %v1242_v57 }
 0xb7c   : > { %v1244_v58 = vpop.permute.xlu0 %1243 }
 0xb7d   : > { %1249 = vst.msk [vmem:[%s467_s27 + $0x4] sm:$0xf] %vm1247_vm3, %v1244_v58 }
 0xb7e PF: > { %s24_s29 = sadd.s32 1, %s1460_s29  }
 0xb7f   : > { %p21_p4 = scmp.ge.s32.totalorder %s24_s29, 4  }
 0xb81   :  { %23 = sbr.rel (!%p21_p4) target bundleno = 1 (0x1), region = 106 }

// kernel: _lambda_.8
= control target key start
LH: loop header
LB: loop body
LE: loop exit
PB: predicated region body
PF: predicated region fallthrough
CT: control target
= control target key end

     0   :  { %v177_v0 = vmov 0   ;;  %vm101_vm0 = vcmask 130048   ;;  %vm146_vm1 = vcmask 257024   ;;  %s234_s1 = inlined_call_operand.vmem [shape: bf16[144,32], index: 1, kind: input, shape index: {}]   ;;  %s235_s0 = inlined_call_operand.vmem [shape: bf16[8,144], index: 0, kind: input, shape index: {}]   ;;  %s236_s2 = inlined_call_operand.vmem [shape: f32[1,32], index: 2, kind: input, shape index: {}]   ;;  %s237_s3 = inlined_call_operand.vmem [shape: bf16[8,32], index: 3, kind: output, shape index: {}]  }
   0x1   :  { %105 = vmatprep.subr.bf16.mxu0 %v177_v0  ;;  %v166_v1 = vld [vmem:[%s234_s1] sm:$0xff]   ;;  %v167_v2 = vld [vmem:[%s234_s1 + $0x8] sm:$0xff]   ;;  %v168_v3 = vld [vmem:[%s234_s1 + $0x10] sm:$0xff]  }
   0x2   :  { %106 = vmatpush1.bf16.msra.mxu0 %v166_v1  ;;  %v15_v4 = vld [vmem:[%s235_s0] sm:$0xff]  ;;  %v169_v5 = vld [vmem:[%s234_s1 + $0x18] sm:$0xff]   ;;  %v171_v8 = vld [vmem:[%s234_s1 + $0x28] sm:$0xff]  }
   0x3   :  { %107 = vmatprep.subr.bf16.mxu0 %v177_v0  ;;  %v154_v6 = vcombine.high %v15_v4, %v15_v4  ;;  %v170_v7 = vld [vmem:[%s234_s1 + $0x20] sm:$0xff]   ;;  %v172_v9 = vld [vmem:[%s234_s1 + $0x30] sm:$0xff]   ;;  %v173_v10 = vld [vmem:[%s234_s1 + $0x38] sm:$0xff]   ;;  %v153_v12 = vcombine.low %v15_v4, %v15_v4 }
   0x4   :  { %v174_v11 = vld [vmem:[%s234_s1 + $0x40] sm:$0xff]  }
   0x5   :  { %164 = vmatprep.mubr.msk.bf16.mxu0 %vm101_vm0, %v154_v6  ;;  %v152_v13 = vld [vmem:[%s236_s2] ss:$0 sm:$0xff] }
   0x6   :  { %108 = vmatpush1.bf16.msra.mxu0 %v167_v2 }
   0x7   :  { %109 = vmatprep.subr.bf16.mxu0 %v177_v0 }
   0xa   :  { %110 = vmatpush1.bf16.msra.mxu0 %v168_v3 }
   0xb   :  { %111 = vmatprep.subr.bf16.mxu0 %v177_v0 }
   0xe   :  { %112 = vmatpush1.bf16.msra.mxu0 %v169_v5 }
   0xf   :  { %113 = vmatprep.subr.bf16.mxu0 %v177_v0 }
  0x12   :  { %114 = vmatpush1.bf16.msra.mxu0 %v170_v7 }
  0x13   :  { %115 = vmatprep.subr.bf16.mxu0 %v177_v0 }
  0x16   :  { %116 = vmatpush1.bf16.msra.mxu0 %v171_v8 }
  0x17   :  { %117 = vmatprep.subr.bf16.mxu0 %v177_v0 }
  0x1a   :  { %118 = vmatpush1.bf16.msra.mxu0 %v172_v9 }
  0x1b   :  { %119 = vmatprep.subr.bf16.mxu0 %v177_v0 }
  0x1e   :  { %120 = vmatpush1.bf16.msra.mxu0 %v173_v10 }
  0x1f   :  { %121 = vmatprep.subr.bf16.mxu0 %v177_v0 }
  0x22   :  { %122 = vmatpush1.bf16.msra.mxu0 %v174_v11 }
  0x25   :  { %138 = vmatmul.mubr.bf16.vlgmr.msra.gmra.mrb[0].mxu0 %v153_v12 }
  0xf8   :  { %v139_v14 = vpop.f32.mrb[0].mxu0 }
  0xf9   :  { %v140_v15 = vadd.f32 %v152_v13, %v139_v14  ;;  %v141_v16 = vpop.f32.mrb[1].mxu0 }
  0xfa   :  { %v142_v17 = vpop.f32.mrb[2].mxu0 }
  0xfb   :  { %v145_v18 = vpack.c.bf16 %v140_v15, %v140_v15  ;;  %v143_v19 = vpop.f32.mrb[3].mxu0 }
  0xfd   :  { %147 = vst.msk [vmem:[%s237_s3] sm:$0xf] %vm146_vm1, %v145_v18 }

// kernel: _lambda_.11
= control target key start
LH: loop header
LB: loop body
LE: loop exit
PB: predicated region body
PF: predicated region fallthrough
CT: control target
= control target key end

     0   :  { %vm26_vm0 = vcmask 254976   ;;  %s250_s0 = inlined_call_operand.vmem [shape: bf16[2,32], index: 0, kind: input, shape index: {}]   ;;  %s251_s1 = inlined_call_operand.vmem [shape: f32[1,32], index: 1, kind: input, shape index: {}]   ;;  %s252_s2 = inlined_call_operand.vmem [shape: f32[1,32], index: 2, kind: input, shape index: {}]   ;;  %s253_s3 = inlined_call_operand.vmem [shape: bf16[32,10], index: 3, kind: input, shape index: {}]   ;;  %s254_s4 = inlined_call_operand.vmem [shape: f32[1,10], index: 4, kind: input, shape index: {}]   ;;  %s255_s5 = inlined_call_operand.hbm [shape: f32[2,10], index: 5, kind: output, shape index: {}]  }
   0x1   :  { %v22_v0 = vld [vmem:[%s250_s0] sm:$0x1] }
   0x2   :  { %v23_v1 = vunpack.c.l.bf16 %v22_v0 }
   0x3   :  { %10 = vsyncpa [#allocation3], 0  ;;  %v159_v8 = vld [vmem:[%s253_s3] sm:$0xff]   ;;  %v187_v9 = vmov 0.0   ;;  %v160_v10 = vld [vmem:[%s253_s3 + $0x8] sm:$0xff]   ;;  %vm188_vm1 = vmmov 0  }
   0x4   :  { %v27_v2 = vsel %vm26_vm0, %v23_v1, 0.0  ;;  %148 = vmatprep.subr.bf16.mxu0 %v187_v9  ;;  %152 = vmatprep.mubr.msk.bf16.mxu0 %vm188_vm1, %v187_v9  ;;  %v139_v15 = vld [vmem:[%s251_s1] ss:$0 sm:$0xff]  ;;  %vm79_vm2 = vcmask 261120   ;;  %s189_s28 = smov [#allocation2]   ;;  %vm123_vm3 = vcmask 74752  }
   0x5   :  { %28 = vadd.xlane.f32.xlu0 %v27_v2  ;;  %149 = vmatpush3.bf16.msra.mxu0 %v159_v8  ;;  %v140_v17 = vld [vmem:[%s252_s2] ss:$0 sm:$0xff]  ;;  %s131_s29 = sshll.u32 %s189_s28, 4  ;;  %s132_s29 = int_to_ptr.vmem [resolvable:$true] %s131_s29 }
   0x6   :  { %150 = vmatprep.subr.bf16.mxu0 %v187_v9  ;;  %v141_v21 = vld [vmem:[%s254_s4] ss:$0 sm:$0xff]  ;;  %s163_s1 = scalar_lea.vmem %s132_s29, 32  ;;  %p168_p1 = scmp.lt.s32.totalorder %s132_s29, %s132_s29 }
   0x7   :  { %p164_p0 = scmp.ne.s32.totalorder %s132_s29, %s163_s1  ;;  %p169_p2 = scmp.lt.s32.totalorder %s163_s1, %s163_s1 }
   0x9   :  { %151 = vmatpush3.bf16.msra.mxu0 %v160_v10  ;;  %p170_p3 = por %p169_p2, %p168_p1 }
   0xb   :  { %p171_p4 = pnand %p170_p3, %p164_p0 }
  0x92   :  { %v29_v3 = vpop.xlane.xlu0 %28 }
  0x93   :  { %v31_v4 = vmul.f32 0.03125, %v29_v3 }
  0x95   :  { %v32_v5 = vsub.f32 %v23_v1, %v31_v4 }
  0x97   :  { %v33_v6 = vmul.f32 %v32_v5, %v32_v5 }
  0x99   :  { %v34_v7 = vsel %vm26_vm0, %v33_v6, 0.0 }
  0x9a   :  { %35 = vadd.xlane.f32.xlu0 %v34_v7 }
 0x127   :  { %v36_v11 = vpop.xlane.xlu0 %35 }
 0x128   :  { %v37_v12 = vmul.f32 0.03125, %v36_v11 }
 0x12a   :  { %v38_v13 = vadd.f32 1e-05, %v37_v12 }
 0x12c   :  { %161 = vrsqrt.f32 %v38_v13 }
 0x136   :  { %v162_v14 = vpop.eup %161 }
 0x137   :  { %v40_v16 = vmul.f32 %v162_v14, %v32_v5 }
 0x139   :  { %v47_v18 = vmul.f32 %v139_v15, %v40_v16 }
 0x13b   :  { %v54_v19 = vadd.f32 %v140_v17, %v47_v18 }
 0x13d   :  { %v55_v20 = vpack.c.bf16 %v54_v19, %v54_v19 }
 0x13f   :  { %153 = vmatmul.mubr.msk.bf16.vlgmr.msra.gmra.mrb[0].mxu0 %vm79_vm2, %v55_v20 }
 0x212   :  { %v117_v22 = vpop.f32.mrb[0].mxu0 }
 0x213   :  { %v118_v23 = vadd.f32 %v141_v21, %v117_v22  ;;  %v154_v24 = vpop.f32.mrb[1].mxu0 }
 0x214   :  { %v120_v25 = vpop.f32.mrb[2].mxu0 }
 0x215   :  { %v155_v26 = vpop.f32.mrb[3].mxu0  ;;  %124 = vst.msk [vmem:[#allocation2] sm:$0x3] %vm123_vm3, %v118_v23 }
 0x216   :  { %174 = shalt.err (!%p171_p4)
}
 0x217   :  { %s175_s4 = scalar_lea.hbm %s255_s5, 32 }
 0x218   :  { %p176_p5 = scmp.ne.s32.totalorder %s255_s5, %s175_s4  ;;  %p179_p6 = scmp.lt.u32.totalorder %s175_s4, %s255_s5 }
 0x21a   :  { %p181_p7 = pnand %p179_p6, %p176_p5 }
 0x21c   :  { %184 = shalt.err (!%p181_p7)
}
 0x21d   :  { %134 = dma.vmem_to_hbm [thread:$0]  %s132_s29, 32, %s255_s5, [#allocation3]  }
 0x21e   :  { %185 = dma.done.wait [#allocation3], 32  }
 0x21f   :  { %186 = vsyncadd [#allocation3], 4294967264 }
 0x220   :  { %138 = vsyncpa [#allocation3], 1 }

// kernel: _lambda_.9
= control target key start
LH: loop header
LB: loop body
LE: loop exit
PB: predicated region body
PF: predicated region fallthrough
CT: control target
= control target key end

     0   :  { %s1633_s21 = smov 0   ;;  %s1818_s0 = inlined_call_operand.vmem [shape: bf16[2,5,32], index: 0, kind: input, shape index: {}]   ;;  %s1819_s1 = inlined_call_operand.vmem [shape: f32[1,32], index: 1, kind: input, shape index: {}, may-alias: {1,6}]   ;;  %s1820_s2 = inlined_call_operand.vmem [shape: f32[1,32], index: 2, kind: input, shape index: {}, may-alias: {2,5,7,11}]   ;;  %s1821_s3 = inlined_call_operand.vmem [shape: bf16[32,96], index: 3, kind: input, shape index: {}]   ;;  %s1822_s4 = inlined_call_operand.vmem [shape: bf16[32,32], index: 4, kind: input, shape index: {}]   ;;  %s1823_s5 = inlined_call_operand.vmem [shape: f32[1,32], index: 5, kind: input, shape index: {}, may-alias: {2,5,7,11}]   ;;  %s1824_s6 = inlined_call_operand.vmem [shape: f32[1,32], index: 6, kind: input, shape index: {}, may-alias: {1,6}]   ;;  %s1825_s7 = inlined_call_operand.vmem [shape: f32[1,32], index: 7, kind: input, shape index: {}, may-alias: {2,5,7,11}]   ;;  %s1826_s8 = inlined_call_operand.vmem [shape: bf16[32,128], index: 8, kind: input, shape index: {}]   ;;  %s1827_s9 = inlined_call_operand.vmem [shape: f32[1,128], index: 9, kind: input, shape index: {}]   ;;  %s1828_s10 = inlined_call_operand.vmem [shape: bf16[128,32], index: 10, kind: input, shape index: {}]   ;;  %s1829_s11 = inlined_call_operand.vmem [shape: f32[1,32], index: 11, kind: input, shape index: {}, may-alias: {2,5,7,11}]   ;;  %s1830_s12 = inlined_call_operand.vmem [shape: bf16[2,5,32], index: 12, kind: output, shape index: {}]  }
   0x1 LB: > { %s1315_s22 = sadd.s32 4294967295, %s1549_s21   ;;  %p1319_p0 = scmp.ge.s32.totalorder %s1549_s21, 1  ;;  %s1549_s21 = sphi %s1633_s21, %s22_s21  }
   0x2   : > { %p361_p1 = scmp.lt.s32.totalorder %s1549_s21, 3 }
   0x4   : > { %p362_p2 = pnand %p1319_p0, %p361_p1 }
   0x5   : > { %p401_p3 = scmp.lt.s32.totalorder (!%p362_p2), %s1315_s22, 1  ;;  %vm414_vm0 = vcmask (!%p362_p2), 258048   ;;  %v1507_v8 = vld [vmem:[%s1821_s3] sm:$0xff] (!%p362_p2)   ;;  %v1551_v9 = vmov (!%p362_p2), 0.0   ;;  %vm1552_vm1 = vmmov (!%p362_p2), 0   ;;  %v1508_v10 = vld [vmem:[%s1821_s3 + $0x8] sm:$0xff] (!%p362_p2)  }
   0x6   : > { %365 = sbr.rel (%p362_p2) target bundleno = 2582 (0xa16), region = 68  ;;  %1390 = vmatprep.subr.bf16.mxu0 (!%p362_p2), %v1551_v9  ;;  %1394 = vmatprep.mubr.msk.bf16.mxu0 (!%p362_p2), %vm1552_vm1, %v1551_v9  ;;  %v1322_v15 = vld [vmem:[%s1819_s1] ss:$0 sm:$0xff] (!%p362_p2)  ;;  %vm460_vm2 = vcmask (!%p362_p2), 261120   ;;  %s1553_s17 = smov (!%p362_p2), 120   ;;  %vm508_vm3 = vcmask (!%p362_p2), 64512  }
   0x7   : > { %1391 = vmatpush3.bf16.msra.mxu0 (!%p362_p2), %v1507_v8  ;;  %1410 = vmatprep.subr.bf16.mxu1 (!%p362_p2), %v1551_v9  ;;  %v1323_v17 = vld [vmem:[%s1820_s2] ss:$0 sm:$0xff] (!%p362_p2)  ;;  %s1554_s18 = smov (!%p362_p2), 96   ;;  %s1555_s19 = smov (!%p362_p2), 88   ;;  %vm555_vm4 = vcmask (!%p362_p2), 36864   ;;  %vm574_vm5 = vcmask (!%p362_p2), 1041408  }
   0x8   : > { %1392 = vmatprep.subr.bf16.mxu0 (!%p362_p2), %v1551_v9  ;;  %1412 = vmatprep.mubr.msk.bf16.mxu1 (!%p362_p2), %vm1552_vm1, %v1551_v9  ;;  %s1556_s20 = smov (!%p362_p2), 80   ;;  %s1557_s24 = smov (!%p362_p2), 112   ;;  %vm575_vm6 = vcmask (!%p362_p2), 1042432   ;;  %vm570_vm7 = vcmask (!%p362_p2), 39936   ;;  %vm964_vm8 = vcmask (!%p362_p2), 130048   ;;  %vm966_vm9 = vcmask (!%p362_p2), 195584  }
   0x9   : > { %s1558_s25 = smov (!%p362_p2), 72   ;;  %s1560_s27 = smov (!%p362_p2), 56   ;;  %vm1256_vm10 = vcmask (!%p362_p2), 256000   ;;  %vm1257_vm11 = vsmask.f32 (!%p362_p2), 2304 }
   0xa   : > { %s1561_s28 = smov (!%p362_p2), 64   ;;  %s1562_s29 = smov (!%p362_p2), 48   ;;  %vm1258_vm12 = vmand (!%p362_p2), %vm1256_vm10, %vm1257_vm11 }
   0xb   : > { %1393 = vmatpush3.bf16.msra.mxu0 (!%p362_p2), %v1508_v10  ;;  %s1563_s30 = smov (!%p362_p2), 40   ;;  %s1565_s13 = smov (!%p362_p2), 8  }
   0xc   : > { %1398 = vmatprep.subr.bf16.mxu0 (!%p362_p2), %v1551_v9 }
   0xd   : > { %s1832_s22 = smov (!%p401_p3, %s1315_s22), 1 }
   0xe   : > { %s1320_s23 = sshll.u32 %s1832_s22, 2 }
   0xf   : > { %s404_s26 = scalar_lea.vmem %s1818_s0, %s1320_s23 }
  0x10   : > { %v410_v0 = vld [vmem:[%s404_s26] sm:$0x7]  ;;  %s1559_s26 = smov 104  }
  0x11   : > { %v1649_v1 = vunpack.c.l.bf16 %v410_v0 }
  0x13   : > { %v415_v2 = vsel %vm414_vm0, %v1649_v1, 0.0 }
  0x14   : > { %416 = vadd.xlane.f32.xlu0 %v415_v2 }
  0xa1   : > { %v417_v3 = vpop.xlane.xlu0 %416 }
  0xa2   : > { %v419_v4 = vmul.f32 0.03125, %v417_v3 }
  0xa4   : > { %v420_v5 = vsub.f32 %v1649_v1, %v419_v4 }
  0xa6   : > { %v421_v6 = vmul.f32 %v420_v5, %v420_v5 }
  0xa8   : > { %v422_v7 = vsel %vm414_vm0, %v421_v6, 0.0 }
  0xa9   : > { %423 = vadd.xlane.f32.xlu0 %v422_v7 }
 0x136   : > { %v424_v11 = vpop.xlane.xlu0 %423 }
 0x137   : > { %v425_v12 = vmul.f32 0.03125, %v424_v11 }
 0x139   : > { %v426_v13 = vadd.f32 1e-05, %v425_v12 }
 0x13b   : > { %1521 = vrsqrt.f32 %v426_v13 }
 0x145   : > { %v1522_v14 = vpop.eup %1521 }
 0x146   : > { %v428_v16 = vmul.f32 %v1522_v14, %v420_v5 }
 0x148   : > { %v435_v18 = vmul.f32 %v1322_v15, %v428_v16 }
 0x14a   : > { %v442_v19 = vadd.f32 %v1323_v17, %v435_v18  ;;  %v1564_v17 = vmov 65535  }
 0x14b   : > { %v576_v18 = vsel %vm574_vm5, 4294967295, %v1564_v17 }
 0x14c   : > { %v443_v20 = vpack.c.bf16 %v442_v19, %v442_v19  ;;  %v577_v19 = vsel %vm575_vm6, %v576_v18, 0  ;;  %v1512_v18 = vld [vmem:[%s1826_s8 + $0x8] sm:$0xff]  }
 0x14e   : > { %1395 = vmatmul.mubr.msk.bf16.vlgmr.msra.gmra.mrb[0].mxu0 %vm460_vm2, %v443_v20 }
 0x14f   : > { %1400 = vmatprep.mubr.msk.bf16.mxu0 %vm1552_vm1, %v1551_v9 }
 0x221   : > { %v498_v21 = vpop.f32.mrb[0].mxu0 }
 0x222   : > { %v1678_v22 = vpack.c.bf16 %v498_v21, %v498_v21  ;;  %v1396_v23 = vpop.f32.mrb[1].mxu0 }
 0x223   : > { %v501_v24 = vpop.f32.mrb[2].mxu0 }
 0x224   : > { %621 = vrot.lane.b32.xlu0 %v1678_v22, %s1553_s17  ;;  %506 = vrot.lane.b32.xlu1 %v1678_v22, %s1554_s18  ;;  %v1397_v25 = vpop.f32.mrb[3].mxu0  ;;  %s1566_s18 = smov 16  }
 0x228   : > { %623 = vrot.lane.b32.xlu1 %v1678_v22, %s1555_s19  ;;  %s1567_s19 = smov 24  }
 0x22c   : > { %733 = vrot.lane.b32.xlu1 %v1678_v22, %s1556_s20 }
 0x230   : > { %731 = vrot.lane.b32.xlu1 %v1678_v22, %s1557_s24 }
 0x234   : > { %843 = vrot.lane.b32.xlu1 %v1678_v22, %s1558_s25  ;;  %s408_s25 = scalar_lea.vmem %s1830_s12, %s1320_s23 }
 0x238   : > { %841 = vrot.lane.b32.xlu1 %v1678_v22, %s1559_s26 }
 0x296   : > { %v507_v26 = vpop.permute.xlu1 %506  ;;  %v622_v31 = vpop.permute.xlu0 %621 }
 0x297   : > { %v513_v27 = vsel %vm508_vm3, %v507_v26, 0 }
 0x298   : > { %1399 = vmatpush3.bf16.xpose.msra.mxu0 %v513_v27 }
 0x299   : > { %1404 = vmatprep.subr.bf16.mxu0 %v1551_v9 }
 0x29a   : > { %v624_v28 = vpop.permute.xlu1 %623 }
 0x29b   : > { %v629_v29 = vsel %vm508_vm3, %v624_v28, 0 }
 0x29c   : > { %1411 = vmatpush3.bf16.xpose.msra.mxu1 %v629_v29 }
 0x29d   : > { %1422 = vmatprep.subr.bf16.mxu1 %v1551_v9 }
 0x29e   : > { %v734_v30 = vpop.permute.xlu1 %733 }
 0x29f   : > { %1401 = vmatmul.mubr.msk.bf16.vlgmr.msra.gmra.mrb[4].mxu0 %vm508_vm3, %v1678_v22  ;;  %v739_v33 = vsel %vm508_vm3, %v734_v30, 0 }
 0x2a0   : > { %1406 = vmatprep.mubr.msk.bf16.mxu0 %vm1552_vm1, %v1551_v9 }
 0x2a2   : > { %v732_v32 = vpop.permute.xlu1 %731 }
 0x2a3   : > { %1413 = vmatmul.mubr.msk.bf16.vlgmr.msra.gmra.mrb[0].mxu1 %vm508_vm3, %v622_v31 }
 0x2a4   : > { %1423 = vmatpush3.bf16.xpose.msra.mxu1 %v739_v33  ;;  %1424 = vmatprep.mubr.msk.bf16.mxu1 %vm1552_vm1, %v1551_v9 }
 0x2a5   : > { %1434 = vmatprep.subr.bf16.mxu1 %v1551_v9 }
 0x2a6   : > { %v844_v34 = vpop.permute.xlu1 %843 }
 0x2a7   : > { %v849_v35 = vsel %vm508_vm3, %v844_v34, 0 }
 0x2aa   : > { %v842_v36 = vpop.permute.xlu1 %841 }
 0x2ab   : > { %1425 = vmatmul.mubr.msk.bf16.vlgmr.msra.gmra.mrb[4].mxu1 %vm508_vm3, %v732_v32 }
 0x2ac   : > { %1435 = vmatpush3.bf16.xpose.msra.mxu1 %v849_v35  ;;  %1436 = vmatprep.mubr.msk.bf16.mxu1 %vm1552_vm1, %v1551_v9 }
 0x2ad   : > { %1446 = vmatprep.subr.bf16.mxu1 %v1551_v9 }
 0x2b3   : > { %1437 = vmatmul.mubr.msk.bf16.vlgmr.msra.gmra.mrb[8].mxu1 %vm508_vm3, %v842_v36 }
 0x2b4   : > { %1450 = vmatprep.mubr.msk.bf16.mxu1 %vm1552_vm1, %v1551_v9 }
 0x372   : > { %v549_v37 = vpop.f32.mrb[4].mxu0 }
 0x373   : > { %v1402_v38 = vpop.f32.mrb[5].mxu0  ;;  %v556_v39 = vsel %vm555_vm4, %v549_v37, -inf }
 0x374   : > { %557 = vmax.xlane.f32.xlu1 %v556_v39  ;;  %v552_v40 = vpop.f32.mrb[6].mxu0 }
 0x375   : > { %v1403_v41 = vpop.f32.mrb[7].mxu0 }
 0x376   : > { %v665_v42 = vpop.f32.mrb[0].mxu1 }
 0x377   : > { %v1414_v43 = vpop.f32.mrb[1].mxu1  ;;  %v671_v44 = vsel %vm555_vm4, %v665_v42, -inf }
 0x378   : > { %672 = vmax.xlane.f32.xlu0 %v671_v44  ;;  %v668_v45 = vpop.f32.mrb[2].mxu1 }
 0x379   : > { %v1415_v46 = vpop.f32.mrb[3].mxu1 }
 0x37e   : > { %v775_v47 = vpop.f32.mrb[4].mxu1 }
 0x37f   : > { %v1426_v48 = vpop.f32.mrb[5].mxu1  ;;  %v781_v49 = vsel %vm555_vm4, %v775_v47, -inf }
 0x380   : > { %v778_v50 = vpop.f32.mrb[6].mxu1  ;;  %782 = vmax.xlane.f32.xlu1 %v781_v49 }
 0x381   : > { %v1427_v51 = vpop.f32.mrb[7].mxu1  ;;  %v1509_v50 = vld [vmem:[%s1822_s4] sm:$0xff]  }
 0x382   : > { %1447 = vmatpush3.bf16.msra.mxu1 %v1509_v50  ;;  %v1510_v51 = vld [vmem:[%s1822_s4 + $0x8] sm:$0xff]  }
 0x383   : > { %1448 = vmatprep.subr.bf16.mxu1 %v1551_v9 }
 0x386   : > { %v885_v52 = vpop.f32.mrb[8].mxu1  ;;  %1449 = vmatpush3.bf16.msra.mxu1 %v1510_v51 }
 0x387   : > { %v1438_v53 = vpop.f32.mrb[9].mxu1  ;;  %v891_v54 = vsel %vm555_vm4, %v885_v52, -inf  ;;  %1462 = vmatprep.subr.bf16.mxu1 %v1551_v9 }
 0x388   : > { %892 = vmax.xlane.f32.xlu0 %v891_v54  ;;  %v888_v55 = vpop.f32.mrb[10].mxu1 }
 0x389   : > { %v1439_v56 = vpop.f32.mrb[11].mxu1 }
 0x401   : > { %v558_v57 = vpop.xlane.xlu1 %557 }
 0x402   : > { %v559_v58 = vsub.f32 %v549_v37, %v558_v57 }
 0x404   : > { %v560_v59 = vmul.f32 1.442695, %v559_v58 }
 0x405   : > { %v673_v60 = vpop.xlane.xlu0 %672 }
 0x406   : > { %1523 = vpow2.f32 %v560_v59  ;;  %v674_v61 = vsub.f32 %v665_v42, %v673_v60 }
 0x408   : > { %v675_v62 = vmul.f32 1.442695, %v674_v61 }
 0x40a   : > { %1525 = vpow2.f32 %v675_v62 }
 0x40d   : > { %v783_v4 = vpop.xlane.xlu1 %782 }
 0x40e   : > { %v784_v5 = vsub.f32 %v775_v47, %v783_v4 }
 0x410   : > { %v1524_v63 = vpop.eup %1523  ;;  %v785_v7 = vmul.f32 1.442695, %v784_v5  ;;  %v1338_v5 = vld [vmem:[%s1823_s5] ss:$0 sm:$0xff] }
 0x411   : > { %v562_v0 = vsel %vm555_vm4, %v1524_v63, 0.0 }
 0x412   : > { %563 = vadd.xlane.f32.xlu1 %v562_v0  ;;  %1527 = vpow2.f32 %v785_v7 }
 0x414   : > { %v1526_v2 = vpop.eup %1525 }
 0x415   : > { %v677_v3 = vsel %vm555_vm4, %v1526_v2, 0.0  ;;  %v893_v6 = vpop.xlane.xlu0 %892 }
 0x416   : > { %678 = vadd.xlane.f32.xlu0 %v677_v3  ;;  %v894_v8 = vsub.f32 %v885_v52, %v893_v6 }
 0x418   : > { %v895_v10 = vmul.f32 1.442695, %v894_v8 }
 0x41a   : > { %1529 = vpow2.f32 %v895_v10 }
 0x41c   : > { %v1528_v11 = vpop.eup %1527 }
 0x41d   : > { %v787_v12 = vsel %vm555_vm4, %v1528_v11, 0.0 }
 0x423   : > { %683 = vrot.lane.b32.xlu1 %v1678_v22, %s1560_s27 }
 0x424   : > { %v1530_v13 = vpop.eup %1529 }
 0x425   : > { %v897_v14 = vsel %vm555_vm4, %v1530_v13, 0.0 }
 0x42c   : > { %568 = vrot.lane.b32.xlu0 %v1678_v22, %s1561_s28 }
 0x430   : > { %793 = vrot.lane.b32.xlu0 %v1678_v22, %s1562_s29 }
 0x447   : > { %788 = vadd.xlane.f32.xlu1 %v787_v12 }
 0x44b   : > { %898 = vadd.xlane.f32.xlu1 %v897_v14 }
 0x45c   : > { %903 = vrot.lane.b32.xlu1 %v1678_v22, %s1563_s30 }
 0x49f   : > { %v564_v15 = vpop.xlane.xlu1 %563 }
 0x4a0   : > { %1531 = vrcp.f32 %v564_v15 }
 0x4a3   : > { %v679_v16 = vpop.xlane.xlu0 %678  ;;  %v684_v25 = vpop.permute.xlu1 %683 }
 0x4a4   : > { %1533 = vrcp.f32 %v679_v16  ;;  %v689_v27 = vand.u32 %v684_v25, %v577_v19  ;;  %v1339_v25 = vld [vmem:[%s1824_s6] ss:$0 sm:$0xff] }
 0x4a7   : > { %v569_v20 = vpop.permute.xlu0 %568 }
 0x4a8   : > { %v579_v21 = vand.u32 %v577_v19, %v569_v20 }
 0x4aa   : > { %v1532_v23 = vpop.eup %1531  ;;  %1405 = vmatpush3.bf16.msra.mxu0 %v579_v21 }
 0x4ab   : > { %v566_v24 = vmul.f32 %v1532_v23, %v1524_v63  ;;  %1416 = vmatprep.subr.bf16.mxu0 %v1551_v9  ;;  %v794_v29 = vpop.permute.xlu0 %793 }
 0x4ac   : > { %v799_v31 = vand.u32 %v794_v29, %v577_v19 }
 0x4ad   : > { %v567_v26 = vpack.c.bf16 %v566_v24, %v566_v24 }
 0x4ae   : > { %v1534_v22 = vpop.eup %1533 }
 0x4af   : > { %1407 = vmatmul.mubr.msk.bf16.vlgmr.msra.gmra.mrb[8].mxu0 %vm570_vm7, %v567_v26  ;;  %v681_v28 = vmul.f32 %v1534_v22, %v1526_v2  ;;  %v1340_v22 = vld [vmem:[%s1825_s7] ss:$0 sm:$0xff] }
 0x4b0   : > { %1417 = vmatpush3.bf16.msra.mxu0 %v689_v27  ;;  %1418 = vmatprep.mubr.msk.bf16.mxu0 %vm1552_vm1, %v1551_v9 }
 0x4b1   : > { %1428 = vmatprep.subr.bf16.mxu0 %v1551_v9  ;;  %v682_v30 = vpack.c.bf16 %v681_v28, %v681_v28 }
 0x4b7   : > { %1419 = vmatmul.mubr.msk.bf16.vlgmr.msra.gmra.mrb[12].mxu0 %vm570_vm7, %v682_v30  ;;  %v1514_v30 = vld [vmem:[%s1828_s10 + $0x8] sm:$0xff]  }
 0x4b8   : > { %1429 = vmatpush3.bf16.msra.mxu0 %v799_v31  ;;  %1430 = vmatprep.mubr.msk.bf16.mxu0 %vm1552_vm1, %v1551_v9  ;;  %v1515_v31 = vld [vmem:[%s1828_s10 + $0x10] sm:$0xff]  }
 0x4b9   : > { %1440 = vmatprep.subr.bf16.mxu0 %v1551_v9 }
 0x4d4   : > { %v789_v32 = vpop.xlane.xlu1 %788 }
 0x4d5   : > { %1535 = vrcp.f32 %v789_v32  ;;  %v1516_v32 = vld [vmem:[%s1828_s10 + $0x18] sm:$0xff]  }
 0x4d8   : > { %v899_v33 = vpop.xlane.xlu1 %898 }
 0x4d9   : > { %1537 = vrcp.f32 %v899_v33  ;;  %v1517_v33 = vld [vmem:[%s1828_s10 + $0x20] sm:$0xff]  }
 0x4dc   : > { %v904_v36 = vpop.permute.xlu1 %903 }
 0x4dd   : > { %v909_v39 = vand.u32 %v904_v36, %v577_v19  ;;  %v1513_v19 = vld [vmem:[%s1828_s10] sm:$0xff]   ;;  %v1520_v36 = vld [vmem:[%s1828_s10 + $0x38] sm:$0xff]  }
 0x4df   : > { %v1536_v34 = vpop.eup %1535 }
 0x4e0   : > { %v791_v35 = vmul.f32 %v1536_v34, %v1528_v11  ;;  %v1518_v34 = vld [vmem:[%s1828_s10 + $0x28] sm:$0xff]  }
 0x4e2   : > { %v792_v37 = vpack.c.bf16 %v791_v35, %v791_v35  ;;  %v1519_v35 = vld [vmem:[%s1828_s10 + $0x30] sm:$0xff]  }
 0x4e3   : > { %v1538_v38 = vpop.eup %1537 }
 0x4e4   : > { %1431 = vmatmul.mubr.msk.bf16.vlgmr.msra.gmra.mrb[16].mxu0 %vm570_vm7, %v792_v37  ;;  %v901_v40 = vmul.f32 %v1538_v38, %v1530_v13  ;;  %v1341_v37 = vld [vmem:[%s1827_s9] ss:$0 sm:$0xff] }
 0x4e5   : > { %1441 = vmatpush3.bf16.msra.mxu0 %v909_v39  ;;  %1442 = vmatprep.mubr.msk.bf16.mxu0 %vm1552_vm1, %v1551_v9 }
 0x4e6   : > { %1454 = vmatprep.subr.bf16.mxu0 %v1551_v9  ;;  %v902_v41 = vpack.c.bf16 %v901_v40, %v901_v40 }
 0x4ec   : > { %1443 = vmatmul.mubr.msk.bf16.vlgmr.msra.gmra.mrb[20].mxu0 %vm570_vm7, %v902_v41 }
 0x4ed   : > { %1458 = vmatprep.mubr.msk.bf16.mxu0 %vm1552_vm1, %v1551_v9 }
 0x582   : > { %v615_v42 = vpop.f32.mrb[8].mxu0 }
 0x583   : > { %v1408_v43 = vpop.f32.mrb[9].mxu0 }
 0x584   : > { %v618_v44 = vpop.f32.mrb[10].mxu0 }
 0x585   : > { %v1409_v45 = vpop.f32.mrb[11].mxu0 }
 0x58a   : > { %v725_v46 = vpop.f32.mrb[12].mxu0 }
 0x58b   : > { %952 = vrot.lane.b32.xlu0 %v725_v46, %s1565_s13  ;;  %v1420_v47 = vpop.f32.mrb[13].mxu0 }
 0x58c   : > { %v728_v48 = vpop.f32.mrb[14].mxu0 }
 0x58d   : > { %v1421_v49 = vpop.f32.mrb[15].mxu0 }
 0x5b7   : > { %v835_v52 = vpop.f32.mrb[16].mxu0 }
 0x5b8   : > { %956 = vrot.lane.b32.xlu1 %v835_v52, %s1566_s18  ;;  %v1432_v53 = vpop.f32.mrb[17].mxu0  ;;  %v1345_v52 = vld [vmem:[%s1829_s11] ss:$0 sm:$0xff] }
 0x5b9   : > { %v838_v54 = vpop.f32.mrb[18].mxu0 }
 0x5ba   : > { %v1433_v55 = vpop.f32.mrb[19].mxu0 }
 0x5bf   : > { %v945_v56 = vpop.f32.mrb[20].mxu0 }
 0x5c0   : > { %960 = vrot.lane.b32.xlu0 %v945_v56, %s1567_s19  ;;  %v1444_v57 = vpop.f32.mrb[21].mxu0 }
 0x5c1   : > { %v948_v58 = vpop.f32.mrb[22].mxu0 }
 0x5c2   : > { %v1445_v59 = vpop.f32.mrb[23].mxu0 }
 0x5c3   : > { %v1259_v59 = vld [vmem:[%s408_s25] sm:$0x7] }
 0x5fd   : > { %v953_v60 = vpop.permute.xlu0 %952 }
 0x5fe   : > { %v963_v62 = vsel %vm508_vm3, %v615_v42, %v953_v60 }
 0x62a   : > { %v957_v61 = vpop.permute.xlu1 %956 }
 0x62b   : > { %v965_v63 = vsel %vm964_vm8, %v963_v62, %v957_v61 }
 0x632   : > { %v961_v0 = vpop.permute.xlu0 %960 }
 0x633   : > { %v967_v2 = vsel %vm966_vm9, %v965_v63, %v961_v0 }
 0x634   : > { %v968_v3 = vpack.c.bf16 %v967_v2, %v967_v2 }
 0x636   : > { %1451 = vmatmul.mubr.msk.bf16.vlgmr.msra.gmra.mrb[12].mxu1 %vm460_vm2, %v968_v3 }
 0x637   : > { %1478 = vmatprep.mubr.msk.bf16.mxu1 %vm1552_vm1, %v1551_v9  ;;  %1463 = vmatpush3.bf16.msra.mxu1 %v1513_v19 }
 0x638   : > { %1464 = vmatprep.subr.bf16.mxu1 %v1551_v9 }
 0x63b   : > { %1465 = vmatpush3.bf16.msra.mxu1 %v1514_v30 }
 0x63c   : > { %1466 = vmatprep.subr.bf16.mxu1 %v1551_v9 }
 0x63f   : > { %1467 = vmatpush3.bf16.msra.mxu1 %v1515_v31 }
 0x640   : > { %1468 = vmatprep.subr.bf16.mxu1 %v1551_v9 }
 0x643   : > { %1469 = vmatpush3.bf16.msra.mxu1 %v1516_v32 }
 0x644   : > { %1470 = vmatprep.subr.bf16.mxu1 %v1551_v9 }
 0x647   : > { %1471 = vmatpush3.bf16.msra.mxu1 %v1517_v33 }
 0x648   : > { %1472 = vmatprep.subr.bf16.mxu1 %v1551_v9 }
 0x64b   : > { %1473 = vmatpush3.bf16.msra.mxu1 %v1518_v34 }
 0x64c   : > { %1474 = vmatprep.subr.bf16.mxu1 %v1551_v9 }
 0x64f   : > { %1475 = vmatpush3.bf16.msra.mxu1 %v1519_v35 }
 0x650   : > { %1476 = vmatprep.subr.bf16.mxu1 %v1551_v9 }
 0x653   : > { %1477 = vmatpush3.bf16.msra.mxu1 %v1520_v36 }
 0x709   : > { %v1022_v4 = vpop.f32.mrb[12].mxu1 }
 0x70a   : > { %v1028_v6 = vadd.f32 %v1022_v4, %v1649_v1  ;;  %v1452_v7 = vpop.f32.mrb[13].mxu1  ;;  %v1511_v1 = vld [vmem:[%s1826_s8] sm:$0xff]  }
 0x70b   : > { %v1025_v8 = vpop.f32.mrb[14].mxu1  ;;  %1455 = vmatpush3.bf16.msra.mxu0 %v1511_v1 }
 0x70c   : > { %v1752_v10 = vadd.f32 %v1338_v5, %v1028_v6  ;;  %v1453_v11 = vpop.f32.mrb[15].mxu1  ;;  %1456 = vmatprep.subr.bf16.mxu0 %v1551_v9 }
 0x70e   : > { %v1039_v12 = vsel %vm414_vm0, %v1752_v10, 0.0 }
 0x70f   : > { %1040 = vadd.xlane.f32.xlu1 %v1039_v12  ;;  %1457 = vmatpush3.bf16.msra.mxu0 %v1512_v18 }
 0x79c   : > { %v1041_v13 = vpop.xlane.xlu1 %1040 }
 0x79d   : > { %v1042_v14 = vmul.f32 0.03125, %v1041_v13 }
 0x79f   : > { %v1043_v15 = vsub.f32 %v1752_v10, %v1042_v14 }
 0x7a1   : > { %v1044_v16 = vmul.f32 %v1043_v15, %v1043_v15 }
 0x7a3   : > { %v1045_v17 = vsel %vm414_vm0, %v1044_v16, 0.0 }
 0x7a4   : > { %1046 = vadd.xlane.f32.xlu0 %v1045_v17 }
 0x831   : > { %v1047_v20 = vpop.xlane.xlu0 %1046 }
 0x832   : > { %v1048_v21 = vmul.f32 0.03125, %v1047_v20 }
 0x834   : > { %v1049_v23 = vadd.f32 1e-05, %v1048_v21 }
 0x836   : > { %1539 = vrsqrt.f32 %v1049_v23 }
 0x840   : > { %v1540_v24 = vpop.eup %1539 }
 0x841   : > { %v1051_v26 = vmul.f32 %v1540_v24, %v1043_v15 }
 0x843   : > { %v1058_v27 = vmul.f32 %v1339_v25, %v1051_v26 }
 0x845   : > { %v1065_v28 = vadd.f32 %v1340_v22, %v1058_v27 }
 0x847   : > { %v1066_v29 = vpack.c.bf16 %v1065_v28, %v1065_v28 }
 0x849   : > { %1459 = vmatmul.mubr.msk.bf16.vlgmr.msra.gmra.mrb[24].mxu0 %vm460_vm2, %v1066_v29 }
 0x91c   : > { %v1127_v38 = vpop.f32.mrb[24].mxu0 }
 0x91d   : > { %v1128_v39 = vadd.f32 %v1341_v37, %v1127_v38  ;;  %v1460_v40 = vpop.f32.mrb[25].mxu0 }
 0x91e   : > { %v1130_v41 = vpop.f32.mrb[26].mxu0 }
 0x91f   : > { %v1134_v42 = vmul.f32 0.044715, %v1128_v39  ;;  %v1461_v43 = vpop.f32.mrb[27].mxu0  ;;  %v1133_v49 = vmul.f32 0.5, %v1128_v39 }
 0x921   : > { %v1135_v44 = vmul.f32 %v1134_v42, %v1128_v39 }
 0x923   : > { %v1136_v45 = vmul.f32 %v1135_v44, %v1128_v39 }
 0x925   : > { %v1137_v46 = vadd.f32 %v1136_v45, %v1128_v39 }
 0x927   : > { %v1138_v47 = vmul.f32 0.7978846, %v1137_v46 }
 0x929   : > { %1541 = vtanh.f32 %v1138_v47 }
 0x933   : > { %v1542_v48 = vpop.eup %1541 }
 0x934   : > { %v1140_v9 = vadd.f32 1.0, %v1542_v48 }
 0x936   : > { %v1141_v50 = vmul.f32 %v1140_v9, %v1133_v49 }
 0x938   : > { %v1142_v51 = vpack.c.bf16 %v1141_v50, %v1141_v50 }
 0x93a   : > { %1479 = vmatmul.mubr.bf16.vlgmr.msra.gmra.mrb[16].mxu1 %v1142_v51 }
 0xa0d   : > { %v1248_v53 = vpop.f32.mrb[16].mxu1 }
 0xa0e   : > { %v1249_v54 = vadd.f32 %v1345_v52, %v1248_v53  ;;  %v1480_v55 = vpop.f32.mrb[17].mxu1 }
 0xa0f   : > { %v1251_v56 = vpop.f32.mrb[18].mxu1 }
 0xa10   : > { %v1254_v57 = vadd.f32 %v1249_v54, %v1752_v10  ;;  %v1481_v58 = vpop.f32.mrb[19].mxu1 }
 0xa12   : > { %v1255_v60 = vpack.c.bf16 %v1254_v57, %v1254_v57 }
 0xa14   : > { %v1260_v61 = vsel %vm1258_vm12, %v1255_v60, %v1259_v59 }
 0xa15   : > { %1261 = vst [vmem:[%s408_s25] sm:$0x7] %v1260_v61 }
 0xa16 PF: > { %s22_s21 = sadd.s32 1, %s1549_s21  }
 0xa17   : > { %p19_p4 = scmp.ge.s32.totalorder %s22_s21, 4  }
 0xa19   :  { %21 = sbr.rel (!%p19_p4) target bundleno = 1 (0x1), region = 98 }

</bundles_post_ra>
